<compile_context>
chip_gen: v5e
topology: v5e:2x2
jax: 0.10.0
libtpu: 0.0.40
codegen_flags: <defaults>
</compile_context>

<pallas_src>
import numpy as np
import jax
import jax.numpy as jnp
from jax import lax
from jax.experimental import pallas as pl
from jax.experimental.pallas import tpu as pltpu

EPS = 1e-5
LANE = 128                                  # lanes per *input* channel block of the image tile

# Static conv hyper-parameters from the PyTorch module.
CIN, CMID, COUT = 3, 3, 64
KH1, KW1, PAD1, STR1 = 3, 3, 1, 1           # self.conv  = Conv2d(3, 3, 3, 1, 1)
KH2, KW2, PAD2, STR2 = 11, 11, 2, 4         # self.conv2 = alexnet.features[0] = Conv2d(3, 64, 11, 4, 2)


def _derived_dims(H, W):
    OH2 = (H + 2 * PAD2 - KH2) // STR2 + 1
    OW2 = (W + 2 * PAD2 - KW2) // STR2 + 1
    OHP = ((OH2 + 7) // 8) * 8              # sublane-padded conv2 output rows
    OWL = ((OW2 + 7) // 8) * 8              # lanes per conv2 output channel (COUT*OWL % 128 == 0)
    CHL = W + 2 * PAD2                      # compact lanes per conv1/BN channel (conv2-padded width)
    OUTL = CMID * CHL                       # conv1/BN activation lane width
    return OH2, OW2, OHP, OWL, CHL, OUTL


# --------------------------- one-time parameter packing ---------------------------

def pack_params(w1, b1, gamma, beta, w2, b2, H, W):
    """Repack module parameters into lane-dense matmul operands.  Called ONCE at init."""
    f32, bf16 = jnp.float32, jnp.bfloat16
    OH2, OW2, OHP, OWL, CHL, OUTL = _derived_dims(H, W)
    assert W + 2 * PAD1 <= LANE, "image width (+conv1 pad) must fit one 128-lane block"

    # conv1 weights -> (KH1, CIN*LANE, CMID*CHL): width taps + conv2's pad offset folded in.
    wp = jnp.arange(LANE)[:, None]                  # input lane  = conv1-padded image col
    wt = jnp.arange(CHL)[None, :]                   # output lane = conv2-padded image col
    kk1 = wp - (wt - PAD2)                          # conv1 kw tap
    v1 = (kk1 >= 0) & (kk1 < KW1) & (wt >= PAD2) & (wt < W + PAD2) & (wp < W + 2 * PAD1)
    w1g = w1[:, :, :, jnp.clip(kk1, 0, KW1 - 1)] * v1[None, None, None].astype(f32)
    w1big = jnp.transpose(w1g, (2, 1, 3, 0, 4)).reshape(KH1, CIN * LANE, CMID * CHL).astype(bf16)

    wt_valid = ((jnp.arange(CHL) >= PAD2) & (jnp.arange(CHL) < W + PAD2)).astype(f32)
    b1lane = (b1[:, None] * wt_valid[None, :]).reshape(1, OUTL)
    msk = jnp.broadcast_to(wt_valid[None, :], (CMID, CHL)).reshape(1, OUTL)
    gam = jnp.broadcast_to(gamma[:, None], (CMID, CHL)).reshape(1, OUTL)
    bet = jnp.broadcast_to(beta[:, None], (CMID, CHL)).reshape(1, OUTL)

    # One 0/1 matrix gathering all 11 conv2 height taps (incl. zero height-pad rows).
    oh = jnp.arange(OHP)[None, :, None]
    hh = jnp.arange(H)[None, None, :]
    kh = jnp.arange(KH2)[:, None, None]
    selh = ((hh == STR2 * oh + kh - PAD2) & (oh < OH2)).astype(bf16)       # (KH2, OHP, H)
    selh_all = selh.reshape(KH2 * OHP, H)

    # conv2 weights -> (KH2, CMID*CHL, COUT*OWL): width taps + stride folded in, bf16.
    wp2 = jnp.arange(CHL)[:, None]
    ow = jnp.arange(OWL)[None, :]
    kk2 = wp2 - STR2 * ow
    v2 = (kk2 >= 0) & (kk2 < KW2) & (ow < OW2)
    w2g = w2[:, :, :, jnp.clip(kk2, 0, KW2 - 1)] * v2[None, None, None].astype(f32)
    w2big = jnp.transpose(w2g, (2, 1, 3, 0, 4)).reshape(KH2, CMID * CHL, COUT * OWL).astype(bf16)

    ow_valid = (jnp.arange(OWL) < OW2).astype(f32)
    b2lane = (b2[:, None] * ow_valid[None, :]).reshape(1, COUT * OWL)

    return dict(w1big=w1big, b1lane=b1lane, gam=gam, bet=bet, msk=msk,
                selh_all=selh_all, w2big=w2big, b2lane=b2lane)


# --------------------------------- fused forward ----------------------------------

def _fused_forward(x, p):
    """x: (1, 3, H, W) f32.  p: dict from pack_params (built for the same H, W)."""
    n, cin, H, W = x.shape
    assert n == 1 and cin == CIN, "kernel specialized to batch 1, 3 input channels"
    OH2, OW2, OHP, OWL, CHL, OUTL = _derived_dims(H, W)
    assert p["w2big"].shape == (KH2, CMID * CHL, COUT * OWL)
    inv_hw = 1.0 / float(H * W)
    bf16 = jnp.bfloat16

    # Per-call image prep (small): conv1-padded image, one 128-lane block per channel, bf16.
    xp = jnp.pad(x[0], ((0, 0), (PAD1, PAD1), (PAD1, PAD1)))                 # (3, H+2, W+2)
    xp = jnp.pad(xp, ((0, 0), (0, 0), (0, LANE - (W + 2 * PAD1))))           # (3, H+2, 128)
    xpad = jnp.transpose(xp, (1, 0, 2)).reshape(H + 2 * PAD1, CIN * LANE).astype(bf16)

    def kernel(x_ref, w1_ref, b1_ref, gam_ref, bet_ref, msk_ref, sel_ref,
               w2_ref, b2_ref, o_ref, yg_ref):
        k = pl.program_id(0)

        @pl.when(k == 0)
        def _():
            # ---- conv1 (3x3 / s1 / p1): three height taps, bf16 matmuls, f32 acc ----
            y = jnp.dot(x_ref[pl.ds(0, H), :], w1_ref[0],
                        preferred_element_type=jnp.float32)
            for t in range(1, KH1):
                y = y + jnp.dot(x_ref[pl.ds(t, H), :], w1_ref[t],
                                preferred_element_type=jnp.float32)
            y = y + b1_ref[...]                                   # (H, OUTL); pad lanes == 0

            # ---- BatchNorm2d with batch statistics -----------------------------------
            # Pad lanes are exactly zero, so per-channel lane-block sums equal sums over
            # the H*W valid pixels.  Reduce + broadcast-back matrices built from iota.
            s = jnp.concatenate([jnp.sum(y, axis=0, keepdims=True),
                                 jnp.sum(y * y, axis=0, keepdims=True)], axis=0)  # (2, OUTL)
            r_lane = lax.broadcasted_iota(jnp.int32, (OUTL, CMID), 0)
            r_ch = lax.broadcasted_iota(jnp.int32, (OUTL, CMID), 1)
            c_ch = lax.broadcasted_iota(jnp.int32, (CMID, OUTL), 0)
            c_lane = lax.broadcasted_iota(jnp.int32, (CMID, OUTL), 1)
            ch_of = lambda lane: sum((lane >= m * CHL).astype(jnp.int32)
                                     for m in range(1, CMID))
            red = jnp.where(ch_of(r_lane) == r_ch, inv_hw, 0.0).astype(jnp.float32)
            bcast = jnp.where(c_ch == ch_of(c_lane), 1.0, 0.0).astype(jnp.float32)
            st = jnp.dot(jnp.dot(s, red, preferred_element_type=jnp.float32), bcast,
                         preferred_element_type=jnp.float32)      # (2, OUTL)
            mean = st[0:1]
            var = st[1:2] - mean * mean                           # biased (training-mode) var
            scale = gam_ref[...] * lax.rsqrt(var + EPS)
            shift = (bet_ref[...] - mean * scale) * msk_ref[...]  # pad lanes stay exactly 0
            yn = (y * scale + shift).astype(bf16)                 # (H, OUTL)

            # ---- gather all 11 conv2 height taps in one 0/1 selection matmul ---------
            g = jnp.dot(sel_ref[...], yn, preferred_element_type=jnp.float32)
            yg_ref[...] = g.astype(bf16)                          # (KH2*OHP, OUTL), resident

            # ---- init the conv2 accumulator (resident output block) with the bias ----
            o_ref[...] = jnp.broadcast_to(b2_ref[...], o_ref.shape)

        # ---- conv2 height tap k: one lane-dense bf16 matmul, f32 accumulation --------
        row0 = pl.multiple_of(k * OHP, OHP)
        o_ref[...] += jnp.dot(yg_ref[pl.ds(row0, OHP), :], w2_ref[0],
                              preferred_element_type=jnp.float32)

    out = pl.pallas_call(
        kernel,
        out_shape=jax.ShapeDtypeStruct((OHP, COUT * OWL), jnp.float32),
        grid=(KH2,),
        in_specs=[
            pl.BlockSpec((H + 2 * PAD1, CIN * LANE), lambda k: (0, 0)),       # xpad (pinned)
            pl.BlockSpec((KH1, CIN * LANE, OUTL), lambda k: (0, 0, 0)),       # w1big (pinned)
            pl.BlockSpec((1, OUTL), lambda k: (0, 0)),                        # b1lane
            pl.BlockSpec((1, OUTL), lambda k: (0, 0)),                        # gamma lanes
            pl.BlockSpec((1, OUTL), lambda k: (0, 0)),                        # beta lanes
            pl.BlockSpec((1, OUTL), lambda k: (0, 0)),                        # valid-lane mask
            pl.BlockSpec((KH2 * OHP, H), lambda k: (0, 0)),                   # tap selection
            pl.BlockSpec((1, CMID * CHL, COUT * OWL), lambda k: (k, 0, 0)),   # w2big (streamed)
            pl.BlockSpec((1, COUT * OWL), lambda k: (0, 0)),                  # b2lane
        ],
        out_specs=pl.BlockSpec((OHP, COUT * OWL), lambda k: (0, 0)),
        scratch_shapes=[pltpu.VMEM((KH2 * OHP, OUTL), jnp.bfloat16)],
        compiler_params=pltpu.CompilerParams(dimension_semantics=("arbitrary",)),
    )(xpad, p["w1big"], p["b1lane"], p["gam"], p["bet"], p["msk"],
      p["selh_all"], p["w2big"], p["b2lane"])

    out = out[:OH2].reshape(OH2, COUT, OWL)[:, :, :OW2]            # (OH2, 64, OW2)
    return jnp.transpose(out, (1, 0, 2))[None]                     # (1, 64, OH2, OW2)  NCHW


model_forward = jax.jit(_fused_forward)


# ------------------------------- pure-JAX reference --------------------------------

def _reference(x, w1, b1, gamma, beta, w2, b2):
    dn = ('NCHW', 'OIHW', 'NCHW')
    hp = lax.Precision.HIGHEST
    y = lax.conv_general_dilated(x, w1, (1, 1), ((1, 1), (1, 1)),
                                 dimension_numbers=dn, precision=hp) + b1[None, :, None, None]
    mean = jnp.mean(y, axis=(0, 2, 3), keepdims=True)
    var = jnp.mean((y - mean) ** 2, axis=(0, 2, 3), keepdims=True)
    y = (y - mean) * lax.rsqrt(var + EPS) * gamma[None, :, None, None] \
        + beta[None, :, None, None]
    z = lax.conv_general_dilated(y, w2, (4, 4), ((2, 2), (2, 2)),
                                 dimension_numbers=dn, precision=hp) + b2[None, :, None, None]
    return z


# -------------------------------------- main ---------------------------------------

if __name__ == "__main__":
    key = jax.random.PRNGKey(0)
    ks = jax.random.split(key, 5)

    # Small shapes consistent with the module (NCHW, 3 input channels).
    N, C, H, W = 1, 3, 64, 64
    x = jax.random.normal(ks[0], (N, C, H, W), jnp.float32)

    # conv = Conv2d(3, 3, 3, stride=1, padding=1)
    fan1 = CIN * KH1 * KW1
    w1 = jax.random.uniform(ks[1], (CMID, CIN, KH1, KW1), jnp.float32, -1.0, 1.0) / jnp.sqrt(fan1)
    b1 = jax.random.uniform(ks[2], (CMID,), jnp.float32, -1.0, 1.0) / jnp.sqrt(fan1)

    # bn = BatchNorm2d(3): default init; forward (train mode) uses batch statistics.
    gamma = jnp.ones((CMID,), jnp.float32)
    beta = jnp.zeros((CMID,), jnp.float32)

    # conv2 = torchvision alexnet.features[0] = Conv2d(3, 64, 11, stride=4, padding=2)
    fan2 = CIN * KH2 * KW2
    w2 = jax.random.uniform(ks[3], (COUT, CIN, KH2, KW2), jnp.float32, -1.0, 1.0) / jnp.sqrt(fan2)
    b2 = jax.random.uniform(ks[4], (COUT,), jnp.float32, -1.0, 1.0) / jnp.sqrt(fan2)

    # One-time packing (hoisted out of the per-call forward path).
    packed = jax.block_until_ready(pack_params(w1, b1, gamma, beta, w2, b2, H, W))

    out = jax.block_until_ready(model_forward(x, packed))
    ref = jax.block_until_ready(_reference(x, w1, b1, gamma, beta, w2, b2))
    assert out.shape == ref.shape, (out.shape, ref.shape)
    np.testing.assert_allclose(np.asarray(out), np.asarray(ref), rtol=2e-2, atol=2e-2)

    print("KERNEL_OK")
</pallas_src>

<mosaic_0001>
module attributes {stable_mosaic.version = 11 : i64} {
  func.func @kernel(%arg0: i32, %arg1: memref<66x384xbf16, #tpu.memory_space<vmem>>, %arg2: memref<3x384x204xbf16, #tpu.memory_space<vmem>>, %arg3: memref<1x204xf32, #tpu.memory_space<vmem>>, %arg4: memref<1x204xf32, #tpu.memory_space<vmem>>, %arg5: memref<1x204xf32, #tpu.memory_space<vmem>>, %arg6: memref<1x204xf32, #tpu.memory_space<vmem>>, %arg7: memref<176x64xbf16, #tpu.memory_space<vmem>>, %arg8: memref<1x204x1024xbf16, #tpu.memory_space<vmem>>, %arg9: memref<1x1024xf32, #tpu.memory_space<vmem>>, %arg10: memref<16x1024xf32, #tpu.memory_space<vmem>>, %arg11: memref<176x204xbf16, #tpu.memory_space<vmem>>) attributes {dimension_semantics = [#tpu.dimension_semantics<arbitrary>], iteration_bounds = array<i64: 11>, scalar_prefetch = 0 : i64, scratch_operands = 1 : i64, tpu.core_type = #tpu.core_type<tc>, window_params = [{pipeline_mode = #tpu.pipeline_mode<synchronous>, transform_indices = @transform_0, window_bounds = array<i64: 66, 384>}, {pipeline_mode = #tpu.pipeline_mode<synchronous>, transform_indices = @transform_1, window_bounds = array<i64: 3, 384, 204>}, {pipeline_mode = #tpu.pipeline_mode<synchronous>, transform_indices = @transform_2, window_bounds = array<i64: 1, 204>}, {pipeline_mode = #tpu.pipeline_mode<synchronous>, transform_indices = @transform_3, window_bounds = array<i64: 1, 204>}, {pipeline_mode = #tpu.pipeline_mode<synchronous>, transform_indices = @transform_4, window_bounds = array<i64: 1, 204>}, {pipeline_mode = #tpu.pipeline_mode<synchronous>, transform_indices = @transform_5, window_bounds = array<i64: 1, 204>}, {pipeline_mode = #tpu.pipeline_mode<synchronous>, transform_indices = @transform_6, window_bounds = array<i64: 176, 64>}, {transform_indices = @transform_7, window_bounds = array<i64: 1, 204, 1024>}, {pipeline_mode = #tpu.pipeline_mode<synchronous>, transform_indices = @transform_8, window_bounds = array<i64: 1, 1024>}, {pipeline_mode = #tpu.pipeline_mode<synchronous>, transform_indices = @transform_9, window_bounds = array<i64: 16, 1024>}]} {
    %c0_i32 = arith.constant 0 : i32
    %0 = arith.cmpi eq, %arg0, %c0_i32 : i32
    %1 = arith.extui %0 : i1 to i32
    %c0_i32_0 = arith.constant 0 : i32
    %2 = arith.cmpi ne, %1, %c0_i32_0 : i32
    scf.if %2 {
      %c0_8 = arith.constant 0 : index
      %c0_9 = arith.constant 0 : index
      %13 = vector.load %arg1[%c0_8, %c0_9] : memref<66x384xbf16, #tpu.memory_space<vmem>>, vector<64x384xbf16>
      %c0_10 = arith.constant 0 : index
      %c0_11 = arith.constant 0 : index
      %c0_12 = arith.constant 0 : index
      %14 = vector.load %arg2[%c0_10, %c0_11, %c0_12] : memref<3x384x204xbf16, #tpu.memory_space<vmem>>, vector<1x384x204xbf16>
      %15 = vector.shape_cast %14 : vector<1x384x204xbf16> to vector<384x204xbf16>
      %cst_13 = arith.constant dense<0.000000e+00> : vector<64x204xf32>
      %16 = tpu.matmul %13, %15, %cst_13 {dimension_numbers = #tpu.dot_dimension_numbers<[1], [0], [0], [1], [0, 0, 1, 1], [], []>} : vector<64x384xbf16>, vector<384x204xbf16>, vector<64x204xf32> -> vector<64x204xf32>
      %c1 = arith.constant 1 : index
      %c0_14 = arith.constant 0 : index
      %17 = vector.load %arg1[%c1, %c0_14] : memref<66x384xbf16, #tpu.memory_space<vmem>>, vector<64x384xbf16>
      %c1_15 = arith.constant 1 : index
      %c0_16 = arith.constant 0 : index
      %c0_17 = arith.constant 0 : index
      %18 = vector.load %arg2[%c1_15, %c0_16, %c0_17] : memref<3x384x204xbf16, #tpu.memory_space<vmem>>, vector<1x384x204xbf16>
      %19 = vector.shape_cast %18 : vector<1x384x204xbf16> to vector<384x204xbf16>
      %cst_18 = arith.constant dense<0.000000e+00> : vector<64x204xf32>
      %20 = tpu.matmul %17, %19, %cst_18 {dimension_numbers = #tpu.dot_dimension_numbers<[1], [0], [0], [1], [0, 0, 1, 1], [], []>} : vector<64x384xbf16>, vector<384x204xbf16>, vector<64x204xf32> -> vector<64x204xf32>
      %21 = arith.addf %16, %20 : vector<64x204xf32>
      %c2 = arith.constant 2 : index
      %c0_19 = arith.constant 0 : index
      %22 = vector.load %arg1[%c2, %c0_19] : memref<66x384xbf16, #tpu.memory_space<vmem>>, vector<64x384xbf16>
      %c2_20 = arith.constant 2 : index
      %c0_21 = arith.constant 0 : index
      %c0_22 = arith.constant 0 : index
      %23 = vector.load %arg2[%c2_20, %c0_21, %c0_22] : memref<3x384x204xbf16, #tpu.memory_space<vmem>>, vector<1x384x204xbf16>
      %24 = vector.shape_cast %23 : vector<1x384x204xbf16> to vector<384x204xbf16>
      %cst_23 = arith.constant dense<0.000000e+00> : vector<64x204xf32>
      %25 = tpu.matmul %22, %24, %cst_23 {dimension_numbers = #tpu.dot_dimension_numbers<[1], [0], [0], [1], [0, 0, 1, 1], [], []>} : vector<64x384xbf16>, vector<384x204xbf16>, vector<64x204xf32> -> vector<64x204xf32>
      %26 = arith.addf %21, %25 : vector<64x204xf32>
      %c0_24 = arith.constant 0 : index
      %c0_25 = arith.constant 0 : index
      %27 = vector.load %arg3[%c0_24, %c0_25] : memref<1x204xf32, #tpu.memory_space<vmem>>, vector<1x204xf32>
      %28 = vector.broadcast %27 : vector<1x204xf32> to vector<64x204xf32>
      %29 = arith.addf %26, %28 : vector<64x204xf32>
      %cst_26 = arith.constant dense<0.000000e+00> : vector<204xf32>
      %30 = vector.multi_reduction <add>, %29, %cst_26 [0] : vector<64x204xf32> to vector<204xf32>
      %31 = vector.shape_cast %30 : vector<204xf32> to vector<1x204xf32>
      %32 = arith.mulf %29, %29 : vector<64x204xf32>
      %cst_27 = arith.constant dense<0.000000e+00> : vector<204xf32>
      %33 = vector.multi_reduction <add>, %32, %cst_27 [0] : vector<64x204xf32> to vector<204xf32>
      %34 = vector.shape_cast %33 : vector<204xf32> to vector<1x204xf32>
      %35 = tpu.concatenate %31, %34 in 0 : vector<1x204xf32>, vector<1x204xf32> -> vector<2x204xf32>
      %36 = tpu.iota {dimensions = array<i32: 0>} : vector<204x3xi32>
      %37 = tpu.iota {dimensions = array<i32: 1>} : vector<204x3xi32>
      %38 = tpu.iota {dimensions = array<i32: 0>} : vector<3x204xi32>
      %39 = tpu.iota {dimensions = array<i32: 1>} : vector<3x204xi32>
      %c68_i32 = arith.constant 68 : i32
      %40 = vector.broadcast %c68_i32 : i32 to vector<204x3xi32>
      %41 = arith.cmpi sge, %36, %40 : vector<204x3xi32>
      %42 = arith.extui %41 : vector<204x3xi1> to vector<204x3xi32>
      %c0_i32_28 = arith.constant 0 : i32
      %43 = vector.broadcast %c0_i32_28 : i32 to vector<204x3xi32>
      %44 = arith.addi %43, %42 : vector<204x3xi32>
      %c136_i32 = arith.constant 136 : i32
      %45 = vector.broadcast %c136_i32 : i32 to vector<204x3xi32>
      %46 = arith.cmpi sge, %36, %45 : vector<204x3xi32>
      %47 = arith.extui %46 : vector<204x3xi1> to vector<204x3xi32>
      %48 = arith.addi %44, %47 : vector<204x3xi32>
      %49 = arith.cmpi eq, %48, %37 : vector<204x3xi32>
      %cst_29 = arith.constant 2.44140625E-4 : f32
      %cst_30 = arith.constant 0.000000e+00 : f32
      %50 = vector.broadcast %cst_29 : f32 to vector<204x3xf32>
      %51 = vector.broadcast %cst_30 : f32 to vector<204x3xf32>
      %52 = arith.select %49, %50, %51 : vector<204x3xi1>, vector<204x3xf32>
      %c68_i32_31 = arith.constant 68 : i32
      %53 = vector.broadcast %c68_i32_31 : i32 to vector<3x204xi32>
      %54 = arith.cmpi sge, %39, %53 : vector<3x204xi32>
      %55 = arith.extui %54 : vector<3x204xi1> to vector<3x204xi32>
      %c0_i32_32 = arith.constant 0 : i32
      %56 = vector.broadcast %c0_i32_32 : i32 to vector<3x204xi32>
      %57 = arith.addi %56, %55 : vector<3x204xi32>
      %c136_i32_33 = arith.constant 136 : i32
      %58 = vector.broadcast %c136_i32_33 : i32 to vector<3x204xi32>
      %59 = arith.cmpi sge, %39, %58 : vector<3x204xi32>
      %60 = arith.extui %59 : vector<3x204xi1> to vector<3x204xi32>
      %61 = arith.addi %57, %60 : vector<3x204xi32>
      %62 = arith.cmpi eq, %38, %61 : vector<3x204xi32>
      %cst_34 = arith.constant 1.000000e+00 : f32
      %cst_35 = arith.constant 0.000000e+00 : f32
      %63 = vector.broadcast %cst_34 : f32 to vector<3x204xf32>
      %64 = vector.broadcast %cst_35 : f32 to vector<3x204xf32>
      %65 = arith.select %62, %63, %64 : vector<3x204xi1>, vector<3x204xf32>
      %cst_36 = arith.constant dense<0.000000e+00> : vector<2x3xf32>
      %66 = tpu.matmul %35, %52, %cst_36 {dimension_numbers = #tpu.dot_dimension_numbers<[1], [0], [0], [1], [0, 0, 1, 1], [], []>} : vector<2x204xf32>, vector<204x3xf32>, vector<2x3xf32> -> vector<2x3xf32>
      %cst_37 = arith.constant dense<0.000000e+00> : vector<2x204xf32>
      %67 = tpu.matmul %66, %65, %cst_37 {dimension_numbers = #tpu.dot_dimension_numbers<[1], [0], [0], [1], [0, 0, 1, 1], [], []>} : vector<2x3xf32>, vector<3x204xf32>, vector<2x204xf32> -> vector<2x204xf32>
      %68 = vector.extract_strided_slice %67 {offsets = [0, 0], sizes = [1, 204], strides = [1, 1]} : vector<2x204xf32> to vector<1x204xf32>
      %69 = vector.extract_strided_slice %67 {offsets = [1, 0], sizes = [1, 204], strides = [1, 1]} : vector<2x204xf32> to vector<1x204xf32>
      %70 = arith.mulf %68, %68 : vector<1x204xf32>
      %71 = arith.subf %69, %70 : vector<1x204xf32>
      %c0_38 = arith.constant 0 : index
      %c0_39 = arith.constant 0 : index
      %72 = vector.load %arg4[%c0_38, %c0_39] : memref<1x204xf32, #tpu.memory_space<vmem>>, vector<1x204xf32>
      %cst_40 = arith.constant 9.99999974E-6 : f32
      %73 = vector.broadcast %cst_40 : f32 to vector<1x204xf32>
      %74 = arith.addf %71, %73 : vector<1x204xf32>
      %75 = math.rsqrt %74 : vector<1x204xf32>
      %76 = arith.mulf %72, %75 : vector<1x204xf32>
      %c0_41 = arith.constant 0 : index
      %c0_42 = arith.constant 0 : index
      %77 = vector.load %arg5[%c0_41, %c0_42] : memref<1x204xf32, #tpu.memory_space<vmem>>, vector<1x204xf32>
      %78 = arith.mulf %68, %76 : vector<1x204xf32>
      %79 = arith.subf %77, %78 : vector<1x204xf32>
      %c0_43 = arith.constant 0 : index
      %c0_44 = arith.constant 0 : index
      %80 = vector.load %arg6[%c0_43, %c0_44] : memref<1x204xf32, #tpu.memory_space<vmem>>, vector<1x204xf32>
      %81 = arith.mulf %79, %80 : vector<1x204xf32>
      %82 = vector.broadcast %76 : vector<1x204xf32> to vector<64x204xf32>
      %83 = arith.mulf %29, %82 : vector<64x204xf32>
      %84 = vector.broadcast %81 : vector<1x204xf32> to vector<64x204xf32>
      %85 = arith.addf %83, %84 : vector<64x204xf32>
      %86 = arith.truncf %85 : vector<64x204xf32> to vector<64x204xbf16>
      %c0_45 = arith.constant 0 : index
      %c0_46 = arith.constant 0 : index
      %87 = vector.load %arg7[%c0_45, %c0_46] : memref<176x64xbf16, #tpu.memory_space<vmem>>, vector<176x64xbf16>
      %cst_47 = arith.constant dense<0.000000e+00> : vector<176x204xf32>
      %88 = tpu.matmul %87, %86, %cst_47 {dimension_numbers = #tpu.dot_dimension_numbers<[1], [0], [0], [1], [0, 0, 1, 1], [], []>} : vector<176x64xbf16>, vector<64x204xbf16>, vector<176x204xf32> -> vector<176x204xf32>
      %89 = arith.truncf %88 : vector<176x204xf32> to vector<176x204xbf16>
      %c0_48 = arith.constant 0 : index
      %c0_49 = arith.constant 0 : index
      %90 = vector.load %arg11[%c0_48, %c0_49] : memref<176x204xbf16, #tpu.memory_space<vmem>>, vector<176x204xbf16>
      tpu.vector_store %arg11[%c0_48, %c0_49], %89 {strides = array<i32>} : memref<176x204xbf16, #tpu.memory_space<vmem>>, vector<176x204xbf16>,
      %c0_50 = arith.constant 0 : index
      %c0_51 = arith.constant 0 : index
      %91 = vector.load %arg9[%c0_50, %c0_51] : memref<1x1024xf32, #tpu.memory_space<vmem>>, vector<1x1024xf32>
      %92 = vector.shape_cast %91 : vector<1x1024xf32> to vector<1x1024xf32>
      %93 = vector.broadcast %92 : vector<1x1024xf32> to vector<16x1024xf32>
      %c0_52 = arith.constant 0 : index
      %c0_53 = arith.constant 0 : index
      %94 = vector.load %arg10[%c0_52, %c0_53] : memref<16x1024xf32, #tpu.memory_space<vmem>>, vector<16x1024xf32>
      tpu.vector_store %arg10[%c0_52, %c0_53], %93 {strides = array<i32>} : memref<16x1024xf32, #tpu.memory_space<vmem>>, vector<16x1024xf32>,
    } else {
    }
    %c16_i32 = arith.constant 16 : i32
    %3 = arith.muli %arg0, %c16_i32 : i32
    %4 = tpu.assume_multiple %3, 16 : i32
    %c0 = arith.constant 0 : index
    %c0_1 = arith.constant 0 : index
    %5 = vector.load %arg10[%c0, %c0_1] : memref<16x1024xf32, #tpu.memory_space<vmem>>, vector<16x1024xf32>
    %6 = arith.index_cast %4 : i32 to index
    %c0_2 = arith.constant 0 : index
    %7 = vector.load %arg11[%6, %c0_2] : memref<176x204xbf16, #tpu.memory_space<vmem>>, vector<16x204xbf16>
    %c0_3 = arith.constant 0 : index
    %c0_4 = arith.constant 0 : index
    %c0_5 = arith.constant 0 : index
    %8 = vector.load %arg8[%c0_3, %c0_4, %c0_5] : memref<1x204x1024xbf16, #tpu.memory_space<vmem>>, vector<1x204x1024xbf16>
    %9 = vector.shape_cast %8 : vector<1x204x1024xbf16> to vector<204x1024xbf16>
    %cst = arith.constant dense<0.000000e+00> : vector<16x1024xf32>
    %10 = tpu.matmul %7, %9, %cst {dimension_numbers = #tpu.dot_dimension_numbers<[1], [0], [0], [1], [0, 0, 1, 1], [], []>} : vector<16x204xbf16>, vector<204x1024xbf16>, vector<16x1024xf32> -> vector<16x1024xf32>
    %11 = arith.addf %5, %10 : vector<16x1024xf32>
    %c0_6 = arith.constant 0 : index
    %c0_7 = arith.constant 0 : index
    %12 = vector.load %arg10[%c0_6, %c0_7] : memref<16x1024xf32, #tpu.memory_space<vmem>>, vector<16x1024xf32>
    tpu.vector_store %arg10[%c0_6, %c0_7], %11 {strides = array<i32>} : memref<16x1024xf32, #tpu.memory_space<vmem>>, vector<16x1024xf32>,
    return
  }
  func.func @transform_0(%arg0: i32) -> (i32, i32) {
    %c0_i32 = arith.constant 0 : i32
    %c0_i32_0 = arith.constant 0 : i32
    %c0_i32_1 = arith.constant 0 : i32
    return %c0_i32, %c0_i32_0 : i32, i32
  }
  func.func @transform_1(%arg0: i32) -> (i32, i32, i32) {
    %c0_i32 = arith.constant 0 : i32
    %c0_i32_0 = arith.constant 0 : i32
    %c0_i32_1 = arith.constant 0 : i32
    %c0_i32_2 = arith.constant 0 : i32
    return %c0_i32, %c0_i32_0, %c0_i32_1 : i32, i32, i32
  }
  func.func @transform_2(%arg0: i32) -> (i32, i32) {
    %c0_i32 = arith.constant 0 : i32
    %c0_i32_0 = arith.constant 0 : i32
    %c0_i32_1 = arith.constant 0 : i32
    return %c0_i32, %c0_i32_0 : i32, i32
  }
  func.func @transform_3(%arg0: i32) -> (i32, i32) {
    %c0_i32 = arith.constant 0 : i32
    %c0_i32_0 = arith.constant 0 : i32
    %c0_i32_1 = arith.constant 0 : i32
    return %c0_i32, %c0_i32_0 : i32, i32
  }
  func.func @transform_4(%arg0: i32) -> (i32, i32) {
    %c0_i32 = arith.constant 0 : i32
    %c0_i32_0 = arith.constant 0 : i32
    %c0_i32_1 = arith.constant 0 : i32
    return %c0_i32, %c0_i32_0 : i32, i32
  }
  func.func @transform_5(%arg0: i32) -> (i32, i32) {
    %c0_i32 = arith.constant 0 : i32
    %c0_i32_0 = arith.constant 0 : i32
    %c0_i32_1 = arith.constant 0 : i32
    return %c0_i32, %c0_i32_0 : i32, i32
  }
  func.func @transform_6(%arg0: i32) -> (i32, i32) {
    %c0_i32 = arith.constant 0 : i32
    %c0_i32_0 = arith.constant 0 : i32
    %c0_i32_1 = arith.constant 0 : i32
    return %c0_i32, %c0_i32_0 : i32, i32
  }
  func.func @transform_7(%arg0: i32) -> (i32, i32, i32) {
    %c0_i32 = arith.constant 0 : i32
    %c0_i32_0 = arith.constant 0 : i32
    %c0_i32_1 = arith.constant 0 : i32
    return %arg0, %c0_i32, %c0_i32_0 : i32, i32, i32
  }
  func.func @transform_8(%arg0: i32) -> (i32, i32) {
    %c0_i32 = arith.constant 0 : i32
    %c0_i32_0 = arith.constant 0 : i32
    %c0_i32_1 = arith.constant 0 : i32
    return %c0_i32, %c0_i32_0 : i32, i32
  }
  func.func @transform_9(%arg0: i32) -> (i32, i32) {
    %c0_i32 = arith.constant 0 : i32
    %c0_i32_0 = arith.constant 0 : i32
    %c0_i32_1 = arith.constant 0 : i32
    return %c0_i32, %c0_i32_0 : i32, i32
  }
}

</mosaic_0001>

<bundles_post_ra>
// kernel: _fused_forward.1
= control target key start
LH: loop header
LB: loop body
LE: loop exit
PB: predicated region body
PF: predicated region fallthrough
CT: control target
= control target key end

     0   :  { %s8139_s0 = inlined_call_operand.vmem [shape: bf16[66,384], index: 0, kind: input, shape index: {}]   ;;  %s8140_s1 = inlined_call_operand.vmem [shape: bf16[3,384,204], index: 1, kind: input, shape index: {}]   ;;  %s8141_s2 = inlined_call_operand.hbm [shape: f32[1,204], index: 2, kind: input, shape index: {}]   ;;  %s8142_s3 = inlined_call_operand.hbm [shape: f32[1,204], index: 3, kind: input, shape index: {}]   ;;  %s8143_s4 = inlined_call_operand.hbm [shape: f32[1,204], index: 4, kind: input, shape index: {}]   ;;  %s8144_s5 = inlined_call_operand.hbm [shape: f32[1,204], index: 5, kind: input, shape index: {}]   ;;  %s8145_s6 = inlined_call_operand.vmem [shape: bf16[176,64], index: 6, kind: input, shape index: {}]   ;;  %s8146_s7 = inlined_call_operand.hbm [shape: bf16[11,204,1024], index: 7, kind: input, shape index: {}]   ;;  %s8147_s8 = inlined_call_operand.hbm [shape: f32[1,1024], index: 8, kind: input, shape index: {}]   ;;  %s8148_s9 = inlined_call_operand.vmem [shape: f32[16,1024], index: 9, kind: output, shape index: {}]  }
   0x1   :  { %8149 = sst [smem:[#allocation17_spill]] %s8141_s2 }
   0x2   :  { %8150 = sst [smem:[#allocation18_spill]] %s8142_s3 }
   0x3   :  { %14 = vsyncpa [#allocation4], 0 }
   0x4   :  { %15 = vsyncpa [#allocation6], 0 }
   0x5   :  { %16 = vsyncpa [#allocation9], 0  ;;  %s5905_s30 = smov 0   ;;  %s5907_s10 = smov 0  }
   0x6   :  { %s5909_s11 = smov 0   ;;  %s5911_s12 = smov 0  }
   0x7 LB: > { %s5924_s13 = sadd.s32 4294967295, %s5843_s12   ;;  %p189_p0 = scmp.ne.s32.totalorder %s5835_s10, %s5831_s30  ;;  %s5843_s12 = sphi %s5911_s12, %s8162_s12   ;;  %s5839_s11 = sphi %s5909_s11, %s8161_s11   ;;  %s5835_s10 = sphi %s5907_s10, %s8160_s10   ;;  %s5831_s30 = sphi %s5905_s30, %s8159_s30  }
   0x8   : > { %p190_p1 = scmp.eq.s32.totalorder %s5924_s13, 0  ;;  %p3958_p2 = scmp.ge.s32.totalorder %s5843_s12, 1 }
   0x9   : > { %p242_p3 = scmp.lt.s32.totalorder %s5843_s12, 12  ;;  %p3959_p4 = scmp.ne.s32.totalorder %s5924_s13, 0 }
   0xa   : > { %p5933_p5 = por %p190_p1, %p189_p0  ;;  %s8152_s3 = sld [smem:[#allocation18_spill]] }
   0xb   : > { %p5940_p6 = pnand %p3958_p2, %p242_p3  ;;  %s5845_s19 = smov [#allocation5]  }
   0xc   : > { %s274_s20 = sshll.u32 %s5845_s19, 4  ;;  %s8154_s2 = sld [smem:[#allocation17_spill]]  ;;  %s275_s20 = int_to_ptr.vmem [resolvable:$true] %s274_s20 }
   0xd   : > { %p5536_p7 = pneg %p5940_p6  ;;  %s284_s27 = sshll.u32 %s8143_s4, 4  ;;  %s285_s27 = int_to_ptr.hbm [resolvable:$true] %s284_s27 }
   0xe   : > { %s5846_s28 = smov [#allocation3]   ;;  %s296_s16 = sshll.u32 %s8144_s5, 4  ;;  %s297_s16 = int_to_ptr.hbm [resolvable:$true] %s296_s16 }
   0xf   : > { %p5951_p8 = pnand %p5536_p7, %p190_p1  ;;  %s262_s29 = sshll.u32 %s5846_s28, 4  ;;  %s263_s29 = int_to_ptr.vmem [resolvable:$true] %s262_s29 }
  0x10   : > { %s272_s17 = sshll.u32 %s8152_s3, 4  ;;  %s5847_s19 = smov [#allocation7]   ;;  %s273_s17 = int_to_ptr.hbm [resolvable:$true] %s272_s17 }
  0x11   : > { %5542 = dma.hbm_to_vmem [thread:$0]  (!%p5951_p8), %s273_s17, 32, %s275_s20, [#allocation6]  }
  0x12   : > { %s260_s23 = sshll.u32 %s8154_s2, 4  ;;  %s286_s21 = sshll.u32 %s5847_s19, 4  ;;  %s261_s23 = int_to_ptr.hbm [resolvable:$true] %s260_s23  ;;  %s287_s21 = int_to_ptr.vmem [resolvable:$true] %s286_s21 }
  0x13   : > { %5539 = dma.hbm_to_vmem [thread:$0]  (!%p5951_p8), %s261_s23, 32, %s263_s29, [#allocation4]  }
  0x14   : > { %5545 = dma.hbm_to_vmem [thread:$0]  (!%p5951_p8), %s285_s27, 32, %s287_s21, [#allocation6]  }
  0x15   : > { %s5848_s17 = smov [#allocation8]   ;;  %s311_s25 = sshll.u32 %s8147_s8, 4  ;;  %s312_s25 = int_to_ptr.hbm [resolvable:$true] %s311_s25 }
  0x16   : > { %s298_s20 = sshll.u32 %s5848_s17, 4  ;;  %s5849_s26 = smov [#allocation11]   ;;  %s299_s20 = int_to_ptr.vmem [resolvable:$true] %s298_s20 }
  0x17   : > { %5548 = dma.hbm_to_vmem [thread:$0]  (!%p5951_p8), %s297_s16, 32, %s299_s20, [#allocation9]  }
  0x18   : > { %s313_s28 = sshll.u32 %s5849_s26, 4  ;;  %s5973_s27 = sadd.s32 1, %s5843_s12   ;;  %s314_s28 = int_to_ptr.vmem [resolvable:$true] %s313_s28 }
  0x19   : > { %5551 = dma.hbm_to_vmem [thread:$0]  (!%p5951_p8), %s312_s25, 128, %s314_s28, [#allocation6]  }
  0x1a   : > { %s173_s29 = ssub.s32 %s5843_s12, %s5973_s27  ;;  %s176_s30 = sadd.s32 1, %s5839_s11 }
  0x1b   : > { %p174_p9 = scmp.eq.s32.totalorder %s173_s29, 0  ;;  %p183_p10 = scmp.ne.s32.totalorder %s5839_s11, %s5835_s10 }
  0x1c   : > { %p184_p11 = scmp.eq.s32.totalorder %s5843_s12, 0  ;;  %p5561_p12 = scmp.lt.s32.totalorder %s5843_s12, 11 }
  0x1d   : > { %s5985_s15 = scalar_select %p174_p9, %s5839_s11, %s176_s30  }
  0x1e   : > { %p185_p13 = por %p184_p11, %p183_p10  ;;  %s324_s19 = sand.u32 1, %s5843_s12  }
  0x1f   : > { %s326_s16 = sand.u32 1, %s5839_s11   ;;  %s5512_s24 = smul.u32 832, %s5843_s12 }
  0x20   : > { %s5511_s21 = smul.u32 832, %s326_s16  ;;  %p5989_p0 = pnand %p5561_p12, %p185_p13 }
  0x21   : > { %s333_s23 = scalar_lea.hbm %s8146_s7, %s5512_s24  ;;  %s325_s29 = scalar_lea.sflag [#allocation4], %s324_s19 }
  0x22   : > { %s328_s25 = scalar_lea.vmem [#allocation10], %s5511_s21  ;;  %s334_s28 = sshll.u32 %s333_s23, 4  ;;  %s335_s28 = int_to_ptr.hbm [resolvable:$true] %s334_s28 }
  0x23   : > { %s336_s26 = sshll.u32 %s328_s25, 4  ;;  %s5763_s30 = sshra.s32 %s335_s28, 4  ;;  %s337_s26 = int_to_ptr.vmem [resolvable:$true] %s336_s26  ;;  %s5764_s30 = int_to_ptr.hbm [resolvable:$true] %s5763_s30 }
  0x24   : > { %s5765_s2 = scalar_lea.hbm %s5764_s30, 832  ;;  %p5767_p3 = pneg %p5989_p0 }
  0x25   : > { %p5766_p2 = scmp.ne.s32.totalorder %s5764_s30, %s5765_s2  ;;  %s5770_s3 = scalar_lea.hbm %s8146_s7, 9152 }
  0x26   : > { %p5771_p9 = scmp.lt.s32.totalorder %s5764_s30, %s8146_s7  ;;  %p5772_p10 = scmp.lt.s32.totalorder %s5770_s3, %s5765_s2 }
  0x27   : > { %p5768_p7 = pnand %p5767_p3, %p5766_p2 }
  0x28   : > { %p5773_p11 = por %p5772_p10, %p5771_p9 }
  0x29   : > { %p5769_p8 = pneg %p5768_p7 }
  0x2b   : > { %p5774_p12 = pnand %p5773_p11, %p5769_p8 }
  0x2d   : > { %5777 = shalt.err (!%p5774_p12)
}
  0x2e   : > { %s5850_s19 = smov 512   ;;  %s5851_s21 = smov 32  }
  0x2f   : > { %5555 = dma.hbm_to_vmem [thread:$0]  (!%p5989_p0), %s335_s28, 13312, %s337_s26, %s325_s29, %s5850_s19, %s5850_s19, %s5851_s21  }
  0x30   : > { %348 = sbr.rel (%p5940_p6) target bundleno = 1533 (0x5fd), region = 56 }
  0x35   : > { %5810 = dma.done.wait (%p190_p1), [#allocation4], 32  }
  0x36   : > { %5812 = vsyncadd (%p190_p1), [#allocation4], 4294967264 }
  0x37   : > { %5814 = dma.done.wait (%p190_p1), [#allocation6], 64  }
  0x38   : > { %5816 = vsyncadd (%p190_p1), [#allocation6], 4294967232 }
  0x39   : > { %5818 = dma.done.wait (%p190_p1), [#allocation9], 32  }
  0x3a   : > { %5820 = vsyncadd (%p190_p1), [#allocation9], 4294967264  ;;  %s370_s2 = sand.u32 1, %s5924_s13   ;;  %s372_s3 = sand.u32 1, %s5835_s10  }
  0x3b   : > { %s5513_s18 = smul.u32 832, %s372_s3  ;;  %s371_s17 = scalar_lea.sflag [#allocation4], %s370_s2 }
  0x3d   : > { %s6023_s22 = scalar_lea.vmem [#allocation10], %s5513_s18 }
  0x3e   : > { %5822 = dma.done.wait (%p5933_p5), %s371_s17, 13312  }
  0x3f   : > { %5824 = vsyncadd (%p5933_p5), %s371_s17, 4294953984 }
  0x40   : > { %5826 = dma.done.wait (%p190_p1), [#allocation6], 128  }
  0x41   : > { %5828 = vsyncadd (%p190_p1), [#allocation6], 4294967168  ;;  %414 = sbr.rel (%p3959_p4) target bundleno = 1270 (0x4f6), region = 84 }
  0x46   : > { %v4115_v0 = vld [vmem:[%s8140_s1 + $0x1f0] sm:$0xf]  ;;  %v5312_v1 = vld [vmem:[%s8140_s1 + $0x1f4] sm:$0xf0]  ;;  %v4107_v5 = vld [vmem:[%s8140_s1 + $0x1e0] sm:$0xf] }
  0x47   : > { %v4179_v2 = vld [vmem:[%s8140_s1 + $0x270] sm:$0xf]  ;;  %v4116_v3 = vor.u32 %v5312_v1, %v4115_v0  ;;  %v5328_v4 = vld [vmem:[%s8140_s1 + $0x274] sm:$0xf0]  ;;  %v5310_v6 = vld [vmem:[%s8140_s1 + $0x1e4] sm:$0xf0] }
  0x48   : > { %v4180_v7 = vor.u32 %v5328_v4, %v4179_v2  ;;  %v4171_v8 = vld [vmem:[%s8140_s1 + $0x260] sm:$0xf]  ;;  %v5326_v9 = vld [vmem:[%s8140_s1 + $0x264] sm:$0xf0]  ;;  %v4108_v10 = vor.u32 %v5310_v6, %v4107_v5  ;;  %v4099_v12 = vld [vmem:[%s8140_s1 + $0x1d0] sm:$0xf] }
  0x49   : > { %951 = vmatpush.bf16.msra.mxu0 %v4116_v3  ;;  %v4172_v11 = vor.u32 %v5326_v9, %v4171_v8  ;;  %v5308_v13 = vld [vmem:[%s8140_s1 + $0x1d4] sm:$0xf0]  ;;  %v4163_v14 = vld [vmem:[%s8140_s1 + $0x250] sm:$0xf]  ;;  %v4091_v18 = vld [vmem:[%s8140_s1 + $0x1c0] sm:$0xf] }
  0x4a   : > { %980 = vmatpush.bf16.msra.mxu1 %v4180_v7  ;;  %v5324_v15 = vld [vmem:[%s8140_s1 + $0x254] sm:$0xf0]  ;;  %v4100_v16 = vor.u32 %v5308_v13, %v4099_v12  ;;  %v5306_v19 = vld [vmem:[%s8140_s1 + $0x1c4] sm:$0xf0]  ;;  %v4155_v20 = vld [vmem:[%s8140_s1 + $0x240] sm:$0xf] }
  0x4b   : > { %v4164_v17 = vor.u32 %v5324_v15, %v4163_v14  ;;  %v5322_v21 = vld [vmem:[%s8140_s1 + $0x244] sm:$0xf0]  ;;  %v415_v22 = vld [vmem:[%s8139_s0] sm:$0xff]  ;;  %v4092_v23 = vor.u32 %v5306_v19, %v4091_v18  ;;  %v6089_v24 = vld [vmem:[%s8139_s0 + $0xc] sm:$0xff]  ;;  %vm590_vm0 = vsmask.f32 7424 }
  0x4c   : > { %v548_v25 = vunpack.c.l.b16 %v415_v22  ;;  %v4156_v26 = vor.u32 %v5322_v21, %v4155_v20  ;;  %v4083_v27 = vld [vmem:[%s8140_s1 + $0x1b0] sm:$0xf]  ;;  %v5304_v28 = vld [vmem:[%s8140_s1 + $0x1b4] sm:$0xf0]  ;;  %v551_v29 = vunpack.c.l.b16 %v6089_v24  ;;  %v549_v30 = vunpack.c.h.b16 %v415_v22  ;;  %v5241_v36 = vld [vmem:[%s8139_s0 + $0x20] sm:$0xf0] }
  0x4d   : > { %952 = vmatpush.bf16.msra.mxu0 %v4108_v10  ;;  %v552_v31 = vunpack.c.h.b16 %v6089_v24  ;;  %v4147_v32 = vld [vmem:[%s8140_s1 + $0x230] sm:$0xf]  ;;  %v5320_v33 = vld [vmem:[%s8140_s1 + $0x234] sm:$0xf0]  ;;  %v4084_v35 = vor.u32 %v5304_v28, %v4083_v27  ;;  %v5240_v38 = vld [vmem:[%s8139_s0 + $0x1c] sm:$0xf] }
  0x4e   : > { %981 = vmatpush.bf16.msra.mxu1 %v4172_v11  ;;  %v4023_v34 = vld [vmem:[%s8139_s0 + $0x18] sm:$0xf]  ;;  %v6113_v37 = vpack.c.b16 %v551_v29, %v548_v25  ;;  %v4025_v39 = vld [vmem:[%s8139_s0 + $0x24] sm:$0xf0]  ;;  %v4148_v40 = vor.u32 %v5320_v33, %v4147_v32  ;;  %v4075_v41 = vld [vmem:[%s8140_s1 + $0x1a0] sm:$0xf] }
  0x4f   : > { %v5302_v42 = vld [vmem:[%s8140_s1 + $0x1a4] sm:$0xf0]  ;;  %v6129_v43 = vpack.c.b16 %v552_v31, %v549_v30  ;;  %v4139_v44 = vld [vmem:[%s8140_s1 + $0x220] sm:$0xf]  ;;  %v6137_v46 = vor.u32 %v5241_v36, %v4023_v34  ;;  %v6139_v47 = vor.u32 %v5240_v38, %v4025_v39  ;;  %v4067_v51 = vld [vmem:[%s8140_s1 + $0x190] sm:$0xf] }
  0x50   : > { %v5318_v45 = vld [vmem:[%s8140_s1 + $0x224] sm:$0xf0]  ;;  %v4076_v48 = vor.u32 %v5302_v42, %v4075_v41  ;;  %v594_v49 = vshll.u32 %v6113_v37, 16  ;;  %v5300_v52 = vld [vmem:[%s8140_s1 + $0x194] sm:$0xf0]  ;;  %v592_v62 = vshrl.u32 %v6113_v37, 16 }
  0x51   : > { %953 = vmatpush.bf16.msra.mxu0 %v4100_v16  ;;  %v4140_v50 = vor.u32 %v5318_v45, %v4139_v44  ;;  %v606_v53 = vshll.u32 %v6129_v43, 16  ;;  %v4131_v54 = vld [vmem:[%s8140_s1 + $0x210] sm:$0xf]  ;;  %v5316_v55 = vld [vmem:[%s8140_s1 + $0x214] sm:$0xf0]  ;;  %v599_v58 = vshll.u32 %v6137_v46, 16  ;;  %v4068_v60 = vor.u32 %v5300_v52, %v4067_v51 }
  0x52   : > { %982 = vmatpush.bf16.msra.mxu1 %v4164_v17  ;;  %v4059_v56 = vld [vmem:[%s8140_s1 + $0x180] sm:$0xf]  ;;  %v5298_v57 = vld [vmem:[%s8140_s1 + $0x184] sm:$0xf0]  ;;  %v611_v59 = vshll.u32 %v6139_v47, 16  ;;  %v596_v63 = vrot.slane %v594_v49, 1  ;;  %v4132_v2 = vor.u32 %v5316_v55, %v4131_v54 }
  0x53   : > { %v4123_v61 = vld [vmem:[%s8140_s1 + $0x200] sm:$0xf]  ;;  %v4307_v0 = vld [vmem:[%s8140_s1 + $0x70] sm:$0xf]  ;;  %v5264_v1 = vld [vmem:[%s8140_s1 + $0x74] sm:$0xf0]  ;;  %v4060_v14 = vor.u32 %v5298_v57, %v4059_v56 }
  0x54   : > { %v604_v3 = vshrl.u32 %v6129_v43, 16  ;;  %v608_v4 = vrot.slane %v606_v53, 1  ;;  %v4308_v5 = vor.u32 %v5264_v1, %v4307_v0  ;;  %v4371_v6 = vld [vmem:[%s8140_s1 + $0xf0] sm:$0xf]  ;;  %v5280_v7 = vld [vmem:[%s8140_s1 + $0xf4] sm:$0xf0]  ;;  %v597_v15 = vor.u32 %v596_v63, %v592_v62 }
  0x55   : > { %954 = vmatpush.bf16.msra.mxu0 %v4092_v23  ;;  %v5314_v8 = vld [vmem:[%s8140_s1 + $0x204] sm:$0xf0]  ;;  %v4243_v9 = vld [vmem:[%s8140_s1 + $0x2f0] sm:$0xf]  ;;  %v5344_v10 = vld [vmem:[%s8140_s1 + $0x2f4] sm:$0xf0]  ;;  %v4372_v11 = vor.u32 %v5280_v7, %v4371_v6 }
  0x56   : > { %983 = vmatpush.bf16.msra.mxu1 %v4156_v26  ;;  %v5311_v12 = vld [vmem:[%s8140_s1 + $0x1f4] sm:$0xf]  ;;  %v4117_v13 = vld [vmem:[%s8140_s1 + $0x1f8] sm:$0xf0]  ;;  %1377 = vmatpush.bf16.msra.mxu2 %v4308_v5  ;;  %v6195_v16 = vrot.slane %v599_v58, 1  ;;  %v4124_v17 = vor.u32 %v5314_v8, %v4123_v61  ;;  %v609_v18 = vor.u32 %v608_v4, %v604_v3  ;;  %v6197_v19 = vrot.slane %v611_v59, 1 }
  0x57   : > { %1406 = vmatpush.bf16.msra.mxu3 %v4372_v11  ;;  %v4244_v20 = vor.u32 %v5344_v10, %v4243_v9  ;;  %v4035_v21 = vld [vmem:[%s8139_s0 + $0x30] sm:$0xf]  ;;  %v5244_v22 = vld [vmem:[%s8139_s0 + $0x38] sm:$0xf0]  ;;  %v4120_v23 = vor.u32 %v5311_v12, %v4117_v13  ;;  %v4235_v25 = vld [vmem:[%s8140_s1 + $0x2e0] sm:$0xf] }
  0x58   : > { %v5342_v26 = vld [vmem:[%s8140_s1 + $0x2e4] sm:$0xf0]  ;;  %v5309_v27 = vld [vmem:[%s8140_s1 + $0x1e4] sm:$0xf]  ;;  %v4109_v28 = vld [vmem:[%s8140_s1 + $0x1e8] sm:$0xf0]  ;;  %v6219_v30 = vsel %vm590_vm0, %v597_v15, %v6195_v16  ;;  %v6221_v32 = vor.u32 %v5244_v22, %v4035_v21  ;;  %v6225_v33 = vsel %vm590_vm0, %v609_v18, %v6197_v19 }
  0x59   : > { %955 = vmatpush.bf16.msra.mxu0 %v4084_v35  ;;  %v4236_v34 = vor.u32 %v5342_v26, %v4235_v25  ;;  %v5243_v35 = vld [vmem:[%s8139_s0 + $0x34] sm:$0xf]  ;;  %v4037_v36 = vld [vmem:[%s8139_s0 + $0x3c] sm:$0xf0]  ;;  %v4227_v38 = vld [vmem:[%s8140_s1 + $0x2d0] sm:$0xf]  ;;  %v4112_v39 = vor.u32 %v5309_v27, %v4109_v28 }
  0x5a   : > { %984 = vmatpush.bf16.msra.mxu1 %v4148_v40  ;;  %v5340_v40 = vld [vmem:[%s8140_s1 + $0x2d4] sm:$0xf0]  ;;  %v4299_v41 = vld [vmem:[%s8140_s1 + $0x60] sm:$0xf]  ;;  %v5262_v42 = vld [vmem:[%s8140_s1 + $0x64] sm:$0xf0]  ;;  %v6255_v51 = vor.u32 %v5243_v35, %v4037_v36 }
  0x5b   : > { %v5307_v44 = vld [vmem:[%s8140_s1 + $0x1d4] sm:$0xf]  ;;  %v4101_v45 = vld [vmem:[%s8140_s1 + $0x1d8] sm:$0xf0]  ;;  %v627_v49 = vshrl.u32 %v6137_v46, 16  ;;  %v635_v52 = vshrl.u32 %v6139_v47, 16  ;;  %v4228_v54 = vor.u32 %v5340_v40, %v4227_v38 }
  0x5c   : > { %v4219_v53 = vld [vmem:[%s8140_s1 + $0x2c0] sm:$0xf]  ;;  %v5338_v55 = vld [vmem:[%s8140_s1 + $0x2c4] sm:$0xf0]  ;;  %v4104_v58 = vor.u32 %v5307_v44, %v4101_v45  ;;  %v5260_v61 = vld [vmem:[%s8140_s1 + $0x54] sm:$0xf0] }
  0x5d   : > { %956 = vmatpush.bf16.msra.mxu0 %v4076_v48  ;;  %v4300_v48 = vor.u32 %v5262_v42, %v4299_v41  ;;  %v4363_v56 = vld [vmem:[%s8140_s1 + $0xe0] sm:$0xf]  ;;  %v5278_v57 = vld [vmem:[%s8140_s1 + $0xe4] sm:$0xf0]  ;;  %v4355_v62 = vld [vmem:[%s8140_s1 + $0xd0] sm:$0xf]  ;;  %v4220_v8 = vor.u32 %v5338_v55, %v4219_v53  ;;  %v629_v22 = vor.u32 %v627_v49, %v6195_v16  ;;  %v637_v28 = vor.u32 %v635_v52, %v6197_v19 }
  0x5e   : > { %985 = vmatpush.bf16.msra.mxu1 %v4140_v50  ;;  %v631_v50 = vshll.u32 %v6221_v32, 16  ;;  %v4364_v59 = vor.u32 %v5278_v57, %v4363_v56  ;;  %v5305_v63 = vld [vmem:[%s8140_s1 + $0x1c4] sm:$0xf]  ;;  %v4093_v0 = vld [vmem:[%s8140_s1 + $0x1c8] sm:$0xf0]  ;;  %v639_v4 = vshll.u32 %v6255_v51, 16 }
  0x5f   : > { %1378 = vmatpush.bf16.msra.mxu2 %v4300_v48  ;;  %v4283_v6 = vld [vmem:[%s8140_s1 + $0x40] sm:$0xf]  ;;  %v5258_v7 = vld [vmem:[%s8140_s1 + $0x44] sm:$0xf0]  ;;  %v4211_v9 = vld [vmem:[%s8140_s1 + $0x2b0] sm:$0xf]  ;;  %v4096_v13 = vor.u32 %v5305_v63, %v4093_v0 }
  0x60   : > { %v6288_v3 = vrot.slane %v631_v50, 1  ;;  %1407 = vmatpush.bf16.msra.mxu3 %v4364_v59  ;;  %v4284_v10 = vor.u32 %v5258_v7, %v4283_v6  ;;  %v4347_v11 = vld [vmem:[%s8140_s1 + $0xc0] sm:$0xf]  ;;  %v5274_v12 = vld [vmem:[%s8140_s1 + $0xc4] sm:$0xf0]  ;;  %v651_v53 = vshrl.u32 %v6221_v32, 16 }
  0x61   : > { %957 = vmatpush.bf16.msra.mxu0 %v4068_v60  ;;  %v4291_v60 = vld [vmem:[%s8140_s1 + $0x50] sm:$0xf]  ;;  %v4047_v18 = vld [vmem:[%s8139_s0 + $0x48] sm:$0xf]  ;;  %v4085_v21 = vld [vmem:[%s8140_s1 + $0x1b8] sm:$0xf0]  ;;  %v4348_v27 = vor.u32 %v5274_v12, %v4347_v11 }
  0x62   : > { %986 = vmatpush.bf16.msra.mxu1 %v4132_v2  ;;  %v4292_v1 = vor.u32 %v5260_v61, %v4291_v60  ;;  %v5276_v2 = vld [vmem:[%s8140_s1 + $0xd4] sm:$0xf0]  ;;  %v4275_v15 = vld [vmem:[%s8140_s1 + $0x30] sm:$0xf]  ;;  %v5246_v25 = vld [vmem:[%s8139_s0 + $0x4c] sm:$0xf]  ;;  %v6361_v48 = vsel %vm590_vm0, %v629_v22, %v6288_v3 }
  0x63   : > { %v4356_v5 = vor.u32 %v5276_v2, %v4355_v62  ;;  %v4049_v26 = vld [vmem:[%s8139_s0 + $0x54] sm:$0xf0]  ;;  %v4339_v36 = vld [vmem:[%s8140_s1 + $0xb0] sm:$0xf]  ;;  %v4203_v19 = vld [vmem:[%s8140_s1 + $0x2a0] sm:$0xf] }
  0x64   : > { %1379 = vmatpush.bf16.msra.mxu2 %v4292_v1  ;;  %v5272_v38 = vld [vmem:[%s8140_s1 + $0xb4] sm:$0xf0]  ;;  %v5334_v40 = vld [vmem:[%s8140_s1 + $0x2a4] sm:$0xf0]  ;;  %v6351_v42 = vor.u32 %v5246_v25, %v4049_v26  ;;  %v5301_v44 = vld [vmem:[%s8140_s1 + $0x1a4] sm:$0xf] }
  0x65   : > { %958 = vmatpush.bf16.msra.mxu0 %v4060_v14  ;;  %v5336_v14 = vld [vmem:[%s8140_s1 + $0x2b4] sm:$0xf0]  ;;  %1408 = vmatpush.bf16.msra.mxu3 %v4356_v5  ;;  %v4077_v45 = vld [vmem:[%s8140_s1 + $0x1a8] sm:$0xf0]  ;;  %v4340_v49 = vor.u32 %v5272_v38, %v4339_v36  ;;  %v4204_v52 = vor.u32 %v5334_v40, %v4203_v19  ;;  %v4267_v55 = vld [vmem:[%s8140_s1 + $0x20] sm:$0xf] }
  0x66   : > { %987 = vmatpush.bf16.msra.mxu1 %v4124_v17  ;;  %v5256_v17 = vld [vmem:[%s8140_s1 + $0x34] sm:$0xf0]  ;;  %v4212_v16 = vor.u32 %v5336_v14, %v4211_v9  ;;  %v5254_v56 = vld [vmem:[%s8140_s1 + $0x24] sm:$0xf0]  ;;  %v663_v59 = vshll.u32 %v6351_v42, 16  ;;  %vm1610_vm1 = vcmask 1046528  }
  0x67   : > { %v4276_v35 = vor.u32 %v5256_v17, %v4275_v15  ;;  %v4268_v60 = vor.u32 %v5254_v56, %v4267_v55  ;;  %v4195_v61 = vld [vmem:[%s8140_s1 + $0x290] sm:$0xf]  ;;  %v5332_v62 = vld [vmem:[%s8140_s1 + $0x294] sm:$0xf0]  ;;  %v5299_v63 = vld [vmem:[%s8140_s1 + $0x194] sm:$0xf] }
  0x68   : > { %959 = vmatmul.bf16.vlgmr.msra.gmra.mxu0 %v6219_v30  ;;  %1380 = vmatpush.bf16.msra.mxu2 %v4284_v10  ;;  %v4196_v0 = vor.u32 %v5332_v62, %v4195_v61  ;;  %v4069_v1 = vld [vmem:[%s8140_s1 + $0x198] sm:$0xf0]  ;;  %v4331_v2 = vld [vmem:[%s8140_s1 + $0xa0] sm:$0xf]  ;;  %v4259_v7 = vld [vmem:[%s8140_s1 + $0x10] sm:$0xf] }
  0x69   : > { %1009 = vmatpush.bf16.msrb.mxu0 %v4244_v20  ;;  %988 = vmatmul.bf16.vlgmr.msra.gmra.mxu1 %v6225_v33  ;;  %v5303_v20 = vld [vmem:[%s8140_s1 + $0x1b4] sm:$0xf]  ;;  %v4072_v5 = vor.u32 %v5299_v63, %v4069_v1  ;;  %v4323_v9 = vld [vmem:[%s8140_s1 + $0x90] sm:$0xf]  ;;  %v5268_v11 = vld [vmem:[%s8140_s1 + $0x94] sm:$0xf0] }
  0x6a   : > { %1038 = vmatpush.bf16.msrb.mxu1 %v4120_v23  ;;  %v5247_v23 = vld [vmem:[%s8139_s0 + $0x50] sm:$0xf0]  ;;  %1409 = vmatpush.bf16.msra.mxu3 %v4348_v27  ;;  %v4187_v12 = vld [vmem:[%s8140_s1 + $0x280] sm:$0xf]  ;;  %v4324_v14 = vor.u32 %v5268_v11, %v4323_v9  ;;  %v5250_v17 = vld [vmem:[%s8140_s1 + $0x4] sm:$0xf0]  ;;  %v653_v27 = vor.u32 %v651_v53, %v6288_v3 }
  0x6b   : > { %v6349_v41 = vor.u32 %v5247_v23, %v4047_v18  ;;  %v4251_v15 = vld [vmem:[%s8140_s1] sm:$0xf]  ;;  %v5297_v18 = vld [vmem:[%s8140_s1 + $0x184] sm:$0xf]  ;;  %v4061_v22 = vld [vmem:[%s8140_s1 + $0x188] sm:$0xf0] }
  0x6c   : > { %1381 = vmatpush.bf16.msra.mxu2 %v4276_v35  ;;  %v4315_v23 = vld [vmem:[%s8140_s1 + $0x80] sm:$0xf]  ;;  %v5266_v25 = vld [vmem:[%s8140_s1 + $0x84] sm:$0xf0]  ;;  %v4064_v26 = vor.u32 %v5297_v18, %v4061_v22  ;;  %v665_v36 = vrot.slane %v663_v59, 1  ;;  %vm2419_vm7 = vcmask 1043456  }
  0x6d   : > { %1010 = vmatpush.bf16.msrb.mxu0 %v4236_v34  ;;  %v6335_v34 = vrot.slane %v639_v4, 1  ;;  %v655_v57 = vshll.u32 %v6349_v41, 16  ;;  %v5270_v4 = vld [vmem:[%s8140_s1 + $0xa4] sm:$0xf0]  ;;  %v479_v38 = vld [vmem:[%s8139_s0 + $0x60] sm:$0x11] }
  0x6e   : > { %1039 = vmatpush.bf16.msrb.mxu1 %v4112_v39  ;;  %v4088_v39 = vor.u32 %v5303_v20, %v4085_v21  ;;  %1410 = vmatpush.bf16.msra.mxu3 %v4340_v49  ;;  %v4332_v6 = vor.u32 %v5270_v4, %v4331_v2  ;;  %v4252_v21 = vor.u32 %v5250_v17, %v4251_v15  ;;  %v572_v19 = vunpack.c.l.b16 %v479_v38  ;;  %v5343_v49 = vld [vmem:[%s8140_s1 + $0x2f4] sm:$0xf]  ;;  %v5325_v55 = vld [vmem:[%s8140_s1 + $0x264] sm:$0xf]  ;;  %v4173_v56 = vld [vmem:[%s8140_s1 + $0x268] sm:$0xf0] }
  0x6f   : > { %v6365_v50 = vsel %vm590_vm0, %v637_v28, %v6335_v34  ;;  %v657_v28 = vrot.slane %v655_v57, 1  ;;  %v573_v40 = vunpack.c.h.b16 %v479_v38  ;;  %v4237_v59 = vld [vmem:[%s8140_s1 + $0x2e8] sm:$0xf0]  ;;  %v675_v61 = vshrl.u32 %v6349_v41, 16  ;;  %v416_v63 = vld [vmem:[%s8139_s0 + $0x8] sm:$0xf] }
  0x70   : > { %1382 = vmatpush.bf16.msra.mxu2 %v4268_v60  ;;  %v4176_v60 = vor.u32 %v5325_v55, %v4173_v56  ;;  %v683_v2 = vshrl.u32 %v6351_v42, 16  ;;  %v5242_v15 = vld [vmem:[%s8139_s0 + $0x28] sm:$0xf0]  ;;  %v5339_v22 = vld [vmem:[%s8140_s1 + $0x2d4] sm:$0xf]  ;;  %vm2187_vm8 = vcmask 1040384  }
  0x71   : > { %1011 = vmatpush.bf16.msrb.mxu0 %v4228_v54  ;;  %v4080_v54 = vor.u32 %v5301_v44, %v4077_v45  ;;  %v5327_v44 = vld [vmem:[%s8140_s1 + $0x274] sm:$0xf]  ;;  %v4181_v45 = vld [vmem:[%s8140_s1 + $0x278] sm:$0xf0]  ;;  %v5245_v55 = vld [vmem:[%s8139_s0 + $0x40] sm:$0xf0] }
  0x72   : > { %1040 = vmatpush.bf16.msrb.mxu1 %v4104_v58  ;;  %v659_v58 = vshrl.u32 %v6255_v51, 16  ;;  %1411 = vmatpush.bf16.msra.mxu3 %v4332_v6  ;;  %v4184_v53 = vor.u32 %v5327_v44, %v4181_v45  ;;  %v685_v9 = vor.u32 %v683_v2, %v665_v36  ;;  %v4205_v2 = vld [vmem:[%s8140_s1 + $0x2a8] sm:$0xf0]  ;;  %v5369_v24 = vld [vmem:[%s8140_s1 + $0x3c4] sm:$0xf]  ;;  %vm2115_vm9 = vcmask 621568  }
  0x73   : > { %vm2467_vm11 = vcmask 1042432   ;;  %vm2463_vm15 = vcmask 23552  }
  0x74   : > { %v661_v35 = vor.u32 %v659_v58, %v6335_v34  ;;  %v6448_v34 = vpack.c.b16 %v572_v19, %v572_v19  ;;  %v5341_v58 = vld [vmem:[%s8140_s1 + $0x2e4] sm:$0xf] }
  0x75   : > { %1012 = vmatpush.bf16.msrb.mxu0 %v4220_v8  ;;  %v5252_v8 = vld [vmem:[%s8140_s1 + $0x14] sm:$0xf0]  ;;  %v4240_v1 = vor.u32 %v5341_v58, %v4237_v59  ;;  %v4149_v58 = vld [vmem:[%s8140_s1 + $0x238] sm:$0xf0]  ;;  %v5335_v59 = vld [vmem:[%s8140_s1 + $0x2b4] sm:$0xf] }
  0x76   : > { %1041 = vmatpush.bf16.msrb.mxu1 %v4096_v13  ;;  %v4260_v10 = vor.u32 %v5252_v8, %v4259_v7  ;;  %v5330_v13 = vld [vmem:[%s8140_s1 + $0x284] sm:$0xf0]  ;;  %1412 = vmatpush.bf16.msra.mxu3 %v4324_v14  ;;  %v6443_v3 = vsel %vm590_vm0, %v661_v35, %v665_v36  ;;  %v679_v62 = vshll.u32 %v6448_v34, 16  ;;  %v677_v7 = vor.u32 %v675_v61, %v657_v28  ;;  %v4031_v14 = vld [vmem:[%s8139_s0 + $0x20] sm:$0xf] }
  0x77   : > { %v4188_v20 = vor.u32 %v5330_v13, %v4187_v12  ;;  %v6510_v18 = vor.u32 %v5242_v15, %v4031_v14  ;;  %v4221_v35 = vld [vmem:[%s8140_s1 + $0x2c8] sm:$0xf0]  ;;  %v4213_v61 = vld [vmem:[%s8140_s1 + $0x2b8] sm:$0xf0]  ;;  %v4055_v15 = vld [vmem:[%s8139_s0 + $0x50] sm:$0xf] }
  0x78   : > { %964 = vmatmul.bf16.gmra.mxu0 %v6361_v48  ;;  %1383 = vmatpush.bf16.msra.mxu2 %v4260_v10  ;;  %v681_v8 = vrot.slane %v679_v62, 1  ;;  %v4141_v62 = vld [vmem:[%s8140_s1 + $0x228] sm:$0xf0] }
  0x79   : > { %1013 = vmatpush.bf16.msrb.mxu0 %v4212_v16  ;;  %993 = vmatmul.bf16.gmra.mxu1 %v6365_v50  ;;  %v4316_v16 = vor.u32 %v5266_v25, %v4315_v23  ;;  %v4229_v25 = vld [vmem:[%s8140_s1 + $0x2d8] sm:$0xf0] }
  0x7a   : > { %1042 = vmatpush.bf16.msrb.mxu1 %v4088_v39  ;;  %v6439_v39 = vsel %vm590_vm0, %v653_v27, %v657_v28  ;;  %v6494_v12 = vsel %vm590_vm0, %v677_v7, %v681_v8  ;;  %v4157_v27 = vld [vmem:[%s8140_s1 + $0x248] sm:$0xf0]  ;;  %v4232_v28 = vor.u32 %v5339_v22, %v4229_v25  ;;  %v4133_v22 = vld [vmem:[%s8140_s1 + $0x218] sm:$0xf0] }
  0x7b   : > { %1413 = vmatpush.bf16.msra.mxu3 %v4316_v16  ;;  %v5337_v16 = vld [vmem:[%s8140_s1 + $0x2c4] sm:$0xf] }
  0x7c   : > { %1384 = vmatpush.bf16.msra.mxu2 %v4252_v21  ;;  %v4165_v21 = vld [vmem:[%s8140_s1 + $0x258] sm:$0xf0]  ;;  %v4224_v44 = vor.u32 %v5337_v16, %v4221_v35  ;;  %v5329_v16 = vld [vmem:[%s8140_s1 + $0x284] sm:$0xf]  ;;  %v4189_v35 = vld [vmem:[%s8140_s1 + $0x288] sm:$0xf0] }
  0x7d   : > { %1014 = vmatpush.bf16.msrb.mxu0 %v4204_v52  ;;  %v6459_v52 = vpack.c.b16 %v573_v40, %v573_v40  ;;  %v623_v40 = vshll.u32 %v6510_v18, 16 }
  0x7e   : > { %1043 = vmatpush.bf16.msrb.mxu1 %v4080_v54  ;;  %1414 = vmatmul.bf16.vlgmr.msra.gmra.mxu3 %v6129_v43  ;;  %v4245_v54 = vld [vmem:[%s8140_s1 + $0x2f8] sm:$0xf0] }
  0x7f   : > { %1385 = vmatmul.bf16.vlgmr.msra.gmra.mxu2 %v6113_v37  ;;  %v4248_v57 = vor.u32 %v5343_v49, %v4245_v54  ;;  %v687_v4 = vshll.u32 %v6459_v52, 16  ;;  %v625_v49 = vrot.slane %v623_v40, 1  ;;  %v4043_v54 = vld [vmem:[%s8139_s0 + $0x38] sm:$0xf]  ;;  %v4192_v40 = vor.u32 %v5329_v16, %v4189_v35  ;;  %v4285_v16 = vld [vmem:[%s8140_s1 + $0x48] sm:$0xf0] }
  0x80   : > { %v6551_v56 = vor.u32 %v5245_v55, %v4043_v54 }
  0x81   : > { %1015 = vmatpush.bf16.msrb.mxu0 %v4196_v0  ;;  %v6484_v0 = vld [vmem:[%s8139_s0 + $0x14] sm:$0xf]  ;;  %v689_v10 = vrot.slane %v687_v4, 1 }
  0x82   : > { %1044 = vmatpush.bf16.msrb.mxu1 %v4072_v5  ;;  %v550_v5 = vunpack.c.l.b16 %v416_v63  ;;  %v553_v6 = vunpack.c.l.b16 %v6484_v0  ;;  %v4216_v63 = vor.u32 %v5335_v59, %v4213_v61  ;;  %v647_v7 = vshll.u32 %v6551_v56, 16  ;;  %v5296_v59 = vld [vmem:[%s8140_s1 + $0x174] sm:$0xf0]  ;;  %v4549_v0 = vld [vmem:[%s8140_s1 + $0x378] sm:$0xf0] }
  0x83   : > { %v6498_v13 = vsel %vm590_vm0, %v685_v9, %v689_v10 }
  0x84   : > { %v6491_v11 = vpack.c.b16 %v553_v6, %v550_v5  ;;  %v643_v5 = vshrl.u32 %v6510_v18, 16  ;;  %v649_v10 = vrot.slane %v647_v7, 1  ;;  %v4301_v7 = vld [vmem:[%s8140_s1 + $0x68] sm:$0xf0] }
  0x85   : > { %1016 = vmatpush.bf16.msrb.mxu0 %v4188_v20  ;;  %v5323_v20 = vld [vmem:[%s8140_s1 + $0x254] sm:$0xf] }
  0x86   : > { %1045 = vmatpush.bf16.msrb.mxu1 %v4064_v26  ;;  %v618_v17 = vshll.u32 %v6491_v11, 16  ;;  %v4168_v23 = vor.u32 %v5323_v20, %v4165_v21  ;;  %v5321_v26 = vld [vmem:[%s8140_s1 + $0x244] sm:$0xf]  ;;  %v616_v38 = vshrl.u32 %v6491_v11, 16  ;;  %v645_v9 = vor.u32 %v643_v5, %v625_v49  ;;  %v5315_v21 = vld [vmem:[%s8140_s1 + $0x214] sm:$0xf] }
  0x87   : > { %v4160_v36 = vor.u32 %v5321_v26, %v4157_v27  ;;  %v4136_v25 = vor.u32 %v5315_v21, %v4133_v22  ;;  %v4197_v26 = vld [vmem:[%s8140_s1 + $0x298] sm:$0xf0]  ;;  %v4125_v27 = vld [vmem:[%s8140_s1 + $0x208] sm:$0xf0]  ;;  %v5292_v21 = vld [vmem:[%s8140_s1 + $0x154] sm:$0xf0] }
  0x88   : > { %969 = vmatmul.bf16.gmra.mxu0 %v6439_v39  ;;  %v620_v19 = vrot.slane %v618_v17, 1  ;;  %v6580_v14 = vsel %vm590_vm0, %v645_v9, %v649_v10  ;;  %v5248_v17 = vld [vmem:[%s8139_s0 + $0x58] sm:$0xf0]  ;;  %v5259_v22 = vld [vmem:[%s8140_s1 + $0x54] sm:$0xf] }
  0x89   : > { %998 = vmatmul.bf16.gmra.mxu1 %v6443_v3  ;;  %1067 = vmatpush.bf16.msra.mxu0 %v4184_v53  ;;  %v6592_v20 = vor.u32 %v5248_v17, %v4055_v15  ;;  %v4419_v17 = vld [vmem:[%s8140_s1 + $0x150] sm:$0xf] }
  0x8a   : > { %1096 = vmatpush.bf16.msra.mxu1 %v4248_v57  ;;  %v621_v45 = vor.u32 %v620_v19, %v616_v38  ;;  %v5319_v57 = vld [vmem:[%s8140_s1 + $0x234] sm:$0xf]  ;;  %v667_v38 = vshrl.u32 %v6551_v56, 16 }
  0x8b   : > { %v671_v19 = vshll.u32 %v6592_v20, 16 }
  0x8c   : > { %v6539_v53 = vsel %vm590_vm0, %v621_v45, %v625_v49  ;;  %v480_v49 = vld [vmem:[%s8139_s0 + $0x68] sm:$0x1] }
  0x8d   : > { %1068 = vmatpush.bf16.msra.mxu0 %v4176_v60  ;;  %v4152_v60 = vor.u32 %v5319_v57, %v4149_v58  ;;  %v673_v45 = vrot.slane %v671_v19, 1  ;;  %v574_v55 = vunpack.c.l.b16 %v480_v49  ;;  %v4435_v58 = vld [vmem:[%s8140_s1 + $0x170] sm:$0xf] }
  0x8e   : > { %1097 = vmatpush.bf16.msra.mxu1 %v4240_v1  ;;  %1419 = vmatmul.bf16.gmra.mxu3 %v6139_v47  ;;  %v5333_v1 = vld [vmem:[%s8140_s1 + $0x2a4] sm:$0xf]  ;;  %v4436_v61 = vor.u32 %v5296_v59, %v4435_v58 }
  0x8f   : > { %1390 = vmatmul.bf16.gmra.mxu2 %v6137_v46  ;;  %v4208_v8 = vor.u32 %v5333_v1, %v4205_v2  ;;  %v6628_v57 = vpack.c.b16 %v574_v55, %v574_v55  ;;  %v4427_v1 = vld [vmem:[%s8140_s1 + $0x160] sm:$0xf]  ;;  %v5294_v2 = vld [vmem:[%s8140_s1 + $0x164] sm:$0xf0]  ;;  %v5277_v59 = vld [vmem:[%s8140_s1 + $0xe4] sm:$0xf] }
  0x90   : > { %v4428_v5 = vor.u32 %v5294_v2, %v4427_v1  ;;  %v4429_v1 = vld [vmem:[%s8140_s1 + $0x168] sm:$0xf0] }
  0x91   : > { %1069 = vmatpush.bf16.msra.mxu0 %v4168_v23  ;;  %v5331_v23 = vld [vmem:[%s8140_s1 + $0x294] sm:$0xf] }
  0x92   : > { %1098 = vmatpush.bf16.msra.mxu1 %v4232_v28  ;;  %v4200_v28 = vor.u32 %v5331_v23, %v4197_v26  ;;  %v4420_v23 = vor.u32 %v5292_v21, %v4419_v17  ;;  %v4421_v17 = vld [vmem:[%s8140_s1 + $0x158] sm:$0xf0] }
  0x95   : > { %1070 = vmatpush.bf16.msra.mxu0 %v4160_v36 }
  0x96   : > { %1099 = vmatpush.bf16.msra.mxu1 %v4224_v44  ;;  %v669_v44 = vor.u32 %v667_v38, %v649_v10  ;;  %v4373_v38 = vld [vmem:[%s8140_s1 + $0xf8] sm:$0xf0] }
  0x98   : > { %974 = vmatmul.bf16.gmra.mxu0 %v6494_v12  ;;  %v6624_v54 = vsel %vm590_vm0, %v669_v44, %v673_v45  ;;  %v5295_v44 = vld [vmem:[%s8140_s1 + $0x174] sm:$0xf] }
  0x99   : > { %1003 = vmatmul.bf16.gmra.mxu1 %v6498_v13  ;;  %1071 = vmatpush.bf16.msra.mxu0 %v4152_v60  ;;  %v5263_v60 = vld [vmem:[%s8140_s1 + $0x74] sm:$0xf] }
  0x9a   : > { %1100 = vmatpush.bf16.msra.mxu1 %v4216_v63  ;;  %v695_v63 = vshll.u32 %v6628_v57, 16 }
  0x9c   : > { %v697_v9 = vrot.slane %v695_v63, 1 }
  0x9e   : > { %1424 = vmatmul.bf16.gmra.mxu3 %v6255_v51  ;;  %1101 = vmatpush.bf16.msra.mxu1 %v4208_v8 }
  0x9f   : > { %1395 = vmatmul.bf16.gmra.mxu2 %v6221_v32 }
  0xa2   : > { %1102 = vmatpush.bf16.msra.mxu1 %v4200_v28 }
  0xa6   : > { %1103 = vmatpush.bf16.msra.mxu1 %v4192_v40 }
  0xa8   : > { %1017 = vmatmul.bf16.vlgmr.msrb.gmra.mxu0 %v6539_v53 }
  0xa9   : > { %1046 = vmatmul.bf16.vlgmr.msrb.gmra.mxu1 %v6219_v30  ;;  %v5317_v30 = vld [vmem:[%s8140_s1 + $0x224] sm:$0xf] }
  0xaa   : > { %v4144_v4 = vor.u32 %v5317_v30, %v4141_v62  ;;  %v4309_v30 = vld [vmem:[%s8140_s1 + $0x78] sm:$0xf0]  ;;  %v691_v62 = vshrl.u32 %v6592_v20, 16 }
  0xac   : > { %1072 = vmatpush.bf16.msra.mxu0 %v4144_v4  ;;  %v5261_v4 = vld [vmem:[%s8140_s1 + $0x64] sm:$0xf]  ;;  %v693_v8 = vor.u32 %v691_v62, %v673_v45  ;;  %v4437_v45 = vld [vmem:[%s8140_s1 + $0x178] sm:$0xf0]  ;;  %v5255_v62 = vld [vmem:[%s8140_s1 + $0x34] sm:$0xf] }
  0xad   : > { %v4304_v10 = vor.u32 %v5261_v4, %v4301_v7  ;;  %v4440_v55 = vor.u32 %v5295_v44, %v4437_v45  ;;  %v4357_v7 = vld [vmem:[%s8140_s1 + $0xd8] sm:$0xf0]  ;;  %v5271_v44 = vld [vmem:[%s8140_s1 + $0xb4] sm:$0xf] }
  0xae   : > { %1429 = vmatmul.bf16.gmra.mxu3 %v6351_v42  ;;  %v6657_v15 = vsel %vm590_vm0, %v693_v8, %v697_v9  ;;  %v4341_v45 = vld [vmem:[%s8140_s1 + $0xb8] sm:$0xf0] }
  0xaf   : > { %1400 = vmatmul.bf16.gmra.mxu2 %v6349_v41  ;;  %1522 = vmatpush.bf16.msrb.mxu3 %v4440_v55 }
  0xb0   : > { %1073 = vmatpush.bf16.msra.mxu0 %v4136_v25  ;;  %v4293_v25 = vld [vmem:[%s8140_s1 + $0x58] sm:$0xf0] }
  0xb1   : > { %v4296_v26 = vor.u32 %v5259_v22, %v4293_v25  ;;  %v4395_v25 = vld [vmem:[%s8140_s1 + $0x120] sm:$0xf] }
  0xb8   : > { %1022 = vmatmul.bf16.gmra.mxu0 %v6580_v14 }
  0xb9   : > { %1051 = vmatmul.bf16.gmra.mxu1 %v6361_v48  ;;  %v5313_v48 = vld [vmem:[%s8140_s1 + $0x204] sm:$0xf] }
  0xba   : > { %v4128_v36 = vor.u32 %v5313_v48, %v4125_v27  ;;  %v5290_v48 = vld [vmem:[%s8140_s1 + $0x144] sm:$0xf0]  ;;  %v5257_v27 = vld [vmem:[%s8140_s1 + $0x44] sm:$0xf] }
  0xbb   : > { %v4288_v35 = vor.u32 %v5257_v27, %v4285_v16  ;;  %v4349_v27 = vld [vmem:[%s8140_s1 + $0xc8] sm:$0xf0] }
  0xbc   : > { %1074 = vmatpush.bf16.msra.mxu0 %v4128_v36  ;;  %v5279_v36 = vld [vmem:[%s8140_s1 + $0xf4] sm:$0xf]  ;;  %v4269_v16 = vld [vmem:[%s8140_s1 + $0x28] sm:$0xf0] }
  0xbd   : > { %v4376_v19 = vor.u32 %v5279_v36, %v4373_v38  ;;  %v5289_v38 = vld [vmem:[%s8140_s1 + $0x144] sm:$0xf] }
  0xbf   : > { %1493 = vmatpush.bf16.msrb.mxu2 %v4376_v19  ;;  %v4413_v19 = vld [vmem:[%s8140_s1 + $0x148] sm:$0xf0] }
  0xc0   : > { %1435 = vmatpush.bf16.msrb.mxu0 %v4436_v61 }
  0xc4   : > { %1436 = vmatpush.bf16.msrb.mxu0 %v4428_v5  ;;  %v5275_v5 = vld [vmem:[%s8140_s1 + $0xd4] sm:$0xf] }
  0xc5   : > { %v4360_v8 = vor.u32 %v5275_v5, %v4357_v7  ;;  %v4397_v5 = vld [vmem:[%s8140_s1 + $0x128] sm:$0xf0] }
  0xc8   : > { %1027 = vmatmul.bf16.gmra.mxu0 %v6624_v54 }
  0xc9   : > { %1056 = vmatmul.bf16.gmra.mxu1 %v6439_v39  ;;  %v4312_v39 = vor.u32 %v5263_v60, %v4309_v30  ;;  %1437 = vmatpush.bf16.msrb.mxu0 %v4420_v23  ;;  %v4365_v60 = vld [vmem:[%s8140_s1 + $0xe8] sm:$0xf0]  ;;  %v4403_v30 = vld [vmem:[%s8140_s1 + $0x130] sm:$0xf] }
  0xca   : > { %v4368_v61 = vor.u32 %v5277_v59, %v4365_v60  ;;  %v5287_v59 = vld [vmem:[%s8140_s1 + $0x134] sm:$0xf]  ;;  %v4405_v60 = vld [vmem:[%s8140_s1 + $0x138] sm:$0xf0] }
  0xcb   : > { %1464 = vmatpush.bf16.msrb.mxu1 %v4312_v39  ;;  %v5288_v39 = vld [vmem:[%s8140_s1 + $0x134] sm:$0xf0] }
  0xcc   : > { %v4404_v63 = vor.u32 %v5288_v39, %v4403_v30  ;;  %1494 = vmatpush.bf16.msrb.mxu2 %v4368_v61  ;;  %v4408_v30 = vor.u32 %v5287_v59, %v4405_v60 }
  0xcf   : > { %1465 = vmatpush.bf16.msrb.mxu1 %v4304_v10  ;;  %v5291_v10 = vld [vmem:[%s8140_s1 + $0x154] sm:$0xf] }
  0xd0   : > { %1495 = vmatpush.bf16.msrb.mxu2 %v4360_v8  ;;  %v4424_v22 = vor.u32 %v5291_v10, %v4421_v17  ;;  %v4325_v10 = vld [vmem:[%s8140_s1 + $0x98] sm:$0xf0] }
  0xd3   : > { %1466 = vmatpush.bf16.msrb.mxu1 %v4296_v26  ;;  %v5286_v26 = vld [vmem:[%s8140_s1 + $0x124] sm:$0xf0] }
  0xd7   : > { %1467 = vmatpush.bf16.msrb.mxu1 %v4288_v35 }
  0xd8   : > { %1032 = vmatmul.bf16.gmra.mxu0 %v6657_v15 }
  0xd9   : > { %1061 = vmatmul.bf16.gmra.mxu1 %v6494_v12  ;;  %v4411_v12 = vld [vmem:[%s8140_s1 + $0x140] sm:$0xf] }
  0xda   : > { %v4412_v28 = vor.u32 %v5290_v48, %v4411_v12  ;;  %v5273_v12 = vld [vmem:[%s8140_s1 + $0xc4] sm:$0xf]  ;;  %v4396_v48 = vor.u32 %v5286_v26, %v4395_v25  ;;  %v4389_v25 = vld [vmem:[%s8140_s1 + $0x118] sm:$0xf0] }
  0xdb   : > { %v4352_v35 = vor.u32 %v5273_v12, %v4349_v27  ;;  %v4379_v27 = vld [vmem:[%s8140_s1 + $0x100] sm:$0xf] }
  0xdc   : > { %1438 = vmatpush.bf16.msrb.mxu0 %v4412_v28  ;;  %v5253_v28 = vld [vmem:[%s8140_s1 + $0x24] sm:$0xf] }
  0xdd   : > { %v4272_v36 = vor.u32 %v5253_v28, %v4269_v16  ;;  %1496 = vmatpush.bf16.msrb.mxu2 %v4352_v35  ;;  %v5282_v28 = vld [vmem:[%s8140_s1 + $0x104] sm:$0xf0]  ;;  %v5265_v16 = vld [vmem:[%s8140_s1 + $0x84] sm:$0xf] }
  0xde   : > { %v4380_v35 = vor.u32 %v5282_v28, %v4379_v27 }
  0xe0   : > { %1439 = vmatpush.bf16.msrb.mxu0 %v4404_v63  ;;  %v4333_v63 = vld [vmem:[%s8140_s1 + $0xa8] sm:$0xf0] }
  0xe4   : > { %1440 = vmatpush.bf16.msrb.mxu0 %v4396_v48 }
  0xe5   : > { %v960_v40 = vpop.f32.mrf.mxu0 }
  0xe6   : > { %v989_v49 = vpop.f32.mrf.mxu1 }
  0xe7   : > { %v6697_v58 = vadd.f32 %v989_v49, %v960_v40  ;;  %v4416_v40 = vor.u32 %v5289_v38, %v4413_v19  ;;  %v4344_v49 = vor.u32 %v5271_v44, %v4341_v45  ;;  %v5249_v38 = vld [vmem:[%s8140_s1 + $0x4] sm:$0xf]  ;;  %v4253_v19 = vld [vmem:[%s8140_s1 + $0x8] sm:$0xf0] }
  0xe8   : > { %1075 = vmatmul.bf16.vlgmr.msra.gmra.mxu0 %v6225_v33  ;;  %v4277_v33 = vld [vmem:[%s8140_s1 + $0x38] sm:$0xf0]  ;;  %v4256_v44 = vor.u32 %v5249_v38, %v4253_v19  ;;  %v5281_v45 = vld [vmem:[%s8140_s1 + $0x104] sm:$0xf]  ;;  %v4587_v19 = vld [vmem:[%s8140_s1 + $0x3c0] sm:$0xf] }
  0xe9   : > { %1104 = vmatmul.bf16.vlgmr.msra.gmra.mxu1 %v6539_v53  ;;  %v5293_v53 = vld [vmem:[%s8140_s1 + $0x164] sm:$0xf]  ;;  %v4280_v2 = vor.u32 %v5255_v62, %v4277_v33  ;;  %1497 = vmatpush.bf16.msrb.mxu2 %v4344_v49  ;;  %v4381_v49 = vld [vmem:[%s8140_s1 + $0x108] sm:$0xf0] }
  0xea   : > { %v4432_v4 = vor.u32 %v5293_v53, %v4429_v1  ;;  %v5269_v62 = vld [vmem:[%s8140_s1 + $0xa4] sm:$0xf]  ;;  %v4387_v53 = vld [vmem:[%s8140_s1 + $0x110] sm:$0xf]  ;;  %v5284_v1 = vld [vmem:[%s8140_s1 + $0x114] sm:$0xf0] }
  0xeb   : > { %1468 = vmatpush.bf16.msrb.mxu1 %v4280_v2  ;;  %v4336_v33 = vor.u32 %v5269_v62, %v4333_v63  ;;  %v5251_v2 = vld [vmem:[%s8140_s1 + $0x14] sm:$0xf]  ;;  %v5360_v62 = vld [vmem:[%s8140_s1 + $0x374] sm:$0xf0] }
  0xec   : > { %1523 = vmatpush.bf16.msrb.mxu3 %v4432_v4  ;;  %v4388_v4 = vor.u32 %v5284_v1, %v4387_v53 }
  0xed   : > { %v962_v9 = vpop.f32.mrf.mxu0  ;;  %1498 = vmatpush.bf16.msrb.mxu2 %v4336_v33 }
  0xee   : > { %v991_v21 = vpop.f32.mrf.mxu1  ;;  %1441 = vmatpush.bf16.msrb.mxu0 %v4388_v4  ;;  %v5358_v4 = vld [vmem:[%s8140_s1 + $0x364] sm:$0xf0] }
  0xef   : > { %v6737_v23 = vadd.f32 %v991_v21, %v962_v9  ;;  %1469 = vmatpush.bf16.msrb.mxu1 %v4272_v36  ;;  %v5267_v9 = vld [vmem:[%s8140_s1 + $0x94] sm:$0xf]  ;;  %v4317_v36 = vld [vmem:[%s8140_s1 + $0x88] sm:$0xf0] }
  0xf0   : > { %1524 = vmatpush.bf16.msrb.mxu3 %v4424_v22  ;;  %v4328_v17 = vor.u32 %v5267_v9, %v4325_v10  ;;  %v5283_v22 = vld [vmem:[%s8140_s1 + $0x114] sm:$0xf] }
  0xf1   : > { %v4392_v12 = vor.u32 %v5283_v22, %v4389_v25  ;;  %v5356_v22 = vld [vmem:[%s8140_s1 + $0x354] sm:$0xf0] }
  0xf2   : > { %1499 = vmatpush.bf16.msrb.mxu2 %v4328_v17  ;;  %1442 = vmatpush.bf16.msrb.mxu0 %v4380_v35  ;;  %v4523_v35 = vld [vmem:[%s8140_s1 + $0x340] sm:$0xf] }
  0xf4   : > { %1525 = vmatpush.bf16.msrb.mxu3 %v4416_v40  ;;  %v4320_v40 = vor.u32 %v5265_v16, %v4317_v36  ;;  %v5354_v36 = vld [vmem:[%s8140_s1 + $0x344] sm:$0xf0] }
  0xf5   : > { %v965_v55 = vpop.f32.mrf.mxu0  ;;  %v4524_v38 = vor.u32 %v5354_v36, %v4523_v35  ;;  %v4643_v36 = vld [vmem:[%s8140_s1 + $0x430] sm:$0xf] }
  0xf6   : > { %v994_v61 = vpop.f32.mrf.mxu1  ;;  %1500 = vmatpush.bf16.msrb.mxu2 %v4320_v40  ;;  %v5370_v40 = vld [vmem:[%s8140_s1 + $0x3c4] sm:$0xf0] }
  0xf7   : > { %v6775_v39 = vadd.f32 %v994_v61, %v965_v55  ;;  %v4384_v55 = vor.u32 %v5281_v45, %v4381_v49  ;;  %v4588_v45 = vor.u32 %v5370_v40, %v4587_v19  ;;  %v4675_v49 = vld [vmem:[%s8140_s1 + $0x470] sm:$0xf] }
  0xf8   : > { %1080 = vmatmul.bf16.gmra.mxu0 %v6365_v50  ;;  %1526 = vmatpush.bf16.msrb.mxu3 %v4408_v30  ;;  %v4261_v50 = vld [vmem:[%s8140_s1 + $0x18] sm:$0xf0]  ;;  %v4547_v30 = vld [vmem:[%s8140_s1 + $0x370] sm:$0xf] }
  0xf9   : > { %1109 = vmatmul.bf16.gmra.mxu1 %v6580_v14  ;;  %v5285_v14 = vld [vmem:[%s8140_s1 + $0x124] sm:$0xf]  ;;  %v4264_v7 = vor.u32 %v5251_v2, %v4261_v50  ;;  %1501 = vmatmul.bf16.vlgmr.msrb.gmra.mxu2 %v6129_v43  ;;  %v4548_v63 = vor.u32 %v5360_v62, %v4547_v30  ;;  %v4611_v43 = vld [vmem:[%s8140_s1 + $0x3f0] sm:$0xf]  ;;  %v4539_v2 = vld [vmem:[%s8140_s1 + $0x360] sm:$0xf] }
  0xfa   : > { %v4400_v8 = vor.u32 %v5285_v14, %v4397_v5  ;;  %v4540_v50 = vor.u32 %v5358_v4, %v4539_v2  ;;  %v4603_v14 = vld [vmem:[%s8140_s1 + $0x3e0] sm:$0xf]  ;;  %v5374_v5 = vld [vmem:[%s8140_s1 + $0x3e4] sm:$0xf0]  ;;  %v4579_v2 = vld [vmem:[%s8140_s1 + $0x3b0] sm:$0xf] }
  0xfb   : > { %1470 = vmatpush.bf16.msrb.mxu1 %v4264_v7  ;;  %1890 = vmatpush.bf16.msra.mxu0 %v4548_v63  ;;  %v4604_v7 = vor.u32 %v5374_v5, %v4603_v14 }
  0xfc   : > { %1527 = vmatpush.bf16.msrb.mxu3 %v4400_v8 }
  0xfd   : > { %v967_v21 = vpop.f32.mrf.mxu0 }
  0xfe   : > { %v996_v26 = vpop.f32.mrf.mxu1 }
  0xff   : > { %v6815_v48 = vadd.f32 %v996_v26, %v967_v21  ;;  %1471 = vmatpush.bf16.msrb.mxu1 %v4256_v44  ;;  %1891 = vmatpush.bf16.msra.mxu0 %v4540_v50  ;;  %v4531_v21 = vld [vmem:[%s8140_s1 + $0x350] sm:$0xf]  ;;  %v5388_v50 = vld [vmem:[%s8140_s1 + $0x454] sm:$0xf0] }
 0x100   : > { %1528 = vmatpush.bf16.msrb.mxu3 %v4392_v12  ;;  %v4532_v25 = vor.u32 %v5356_v22, %v4531_v21  ;;  %v4595_v26 = vld [vmem:[%s8140_s1 + $0x3d0] sm:$0xf]  ;;  %v4651_v22 = vld [vmem:[%s8140_s1 + $0x440] sm:$0xf] }
 0x102   : > { %v6879_v17 = vpop.f32.mrf.mxu2 }
 0x103   : > { %1892 = vmatpush.bf16.msra.mxu0 %v4532_v25  ;;  %v5386_v25 = vld [vmem:[%s8140_s1 + $0x444] sm:$0xf0] }
 0x104   : > { %1529 = vmatpush.bf16.msrb.mxu3 %v4384_v55  ;;  %v5392_v55 = vld [vmem:[%s8140_s1 + $0x474] sm:$0xf0] }
 0x105   : > { %v970_v59 = vpop.f32.mrf.mxu0 }
 0x106   : > { %v999_v60 = vpop.f32.mrf.mxu1 }
 0x107   : > { %v6842_v61 = vadd.f32 %v999_v60, %v970_v59  ;;  %1530 = vmatmul.bf16.vlgmr.msrb.gmra.mxu3 %v6491_v11  ;;  %1893 = vmatpush.bf16.msra.mxu0 %v4524_v38  ;;  %v4676_v59 = vor.u32 %v5392_v55, %v4675_v49  ;;  %v5384_v38 = vld [vmem:[%s8140_s1 + $0x434] sm:$0xf0] }
 0x108   : > { %1085 = vmatmul.bf16.gmra.mxu0 %v6443_v3  ;;  %v5376_v3 = vld [vmem:[%s8140_s1 + $0x3f4] sm:$0xf0]  ;;  %v4644_v19 = vor.u32 %v5384_v38, %v4643_v36  ;;  %v4555_v36 = vld [vmem:[%s8140_s1 + $0x380] sm:$0xf]  ;;  %v5362_v38 = vld [vmem:[%s8140_s1 + $0x384] sm:$0xf0] }
 0x109   : > { %1114 = vmatmul.bf16.gmra.mxu1 %v6624_v54  ;;  %v4612_v33 = vor.u32 %v5376_v3, %v4611_v43  ;;  %1506 = vmatmul.bf16.gmra.mxu2 %v6139_v47  ;;  %v4667_v43 = vld [vmem:[%s8140_s1 + $0x460] sm:$0xf]  ;;  %v5390_v3 = vld [vmem:[%s8140_s1 + $0x464] sm:$0xf0] }
 0x10a   : > { %v6909_v44 = vpop.f32.mrf.mxu2  ;;  %1948 = vmatpush.bf16.msra.mxu2 %v4676_v59  ;;  %v4635_v59 = vld [vmem:[%s8140_s1 + $0x420] sm:$0xf] }
 0x10b   : > { %1919 = vmatpush.bf16.msra.mxu1 %v4612_v33  ;;  %v4668_v33 = vor.u32 %v5390_v3, %v4667_v43 }
 0x10d   : > { %v972_v54 = vpop.f32.mrf.mxu0 }
 0x10e   : > { %v1001_v53 = vpop.f32.mrf.mxu1  ;;  %1949 = vmatpush.bf16.msra.mxu2 %v4668_v33  ;;  %v4499_v33 = vld [vmem:[%s8140_s1 + $0x310] sm:$0xf] }
 0x10f   : > { %v6859_v1 = vadd.f32 %v1001_v53, %v972_v54  ;;  %1920 = vmatpush.bf16.msra.mxu1 %v4604_v7  ;;  %v5352_v54 = vld [vmem:[%s8140_s1 + $0x334] sm:$0xf0] }
 0x112   : > { %v1391_v7 = vpop.f32.mrf.mxu2 }
 0x115   : > { %v975_v8 = vpop.f32.mrf.mxu0 }
 0x116   : > { %v1004_v9 = vpop.f32.mrf.mxu1 }
 0x117   : > { %v6874_v10 = vadd.f32 %v1004_v9, %v975_v8  ;;  %1535 = vmatmul.bf16.gmra.mxu3 %v6510_v18 }
 0x118   : > { %1090 = vmatmul.bf16.gmra.mxu0 %v6498_v13  ;;  %v5372_v13 = vld [vmem:[%s8140_s1 + $0x3d4] sm:$0xf0] }
 0x119   : > { %1119 = vmatmul.bf16.gmra.mxu1 %v6657_v15  ;;  %v6893_v15 = vpop.f32.mrf.mxu3  ;;  %v4596_v12 = vor.u32 %v5372_v13, %v4595_v26  ;;  %1511 = vmatmul.bf16.gmra.mxu2 %v6255_v51  ;;  %v4507_v26 = vld [vmem:[%s8140_s1 + $0x320] sm:$0xf]  ;;  %v4652_v13 = vor.u32 %v5386_v25, %v4651_v22 }
 0x11a   : > { %v6985_v55 = vpop.f32.mrf.mxu2 }
 0x11b   : > { %1921 = vmatpush.bf16.msra.mxu1 %v4596_v12 }
 0x11d   : > { %v977_v27 = vpop.f32.mrf.mxu0 }
 0x11e   : > { %v1006_v28 = vpop.f32.mrf.mxu1 }
 0x11f   : > { %v6895_v16 = vadd.f32 %v1006_v28, %v977_v27  ;;  %1922 = vmatpush.bf16.msra.mxu1 %v4588_v45  ;;  %v4571_v27 = vld [vmem:[%s8140_s1 + $0x3a0] sm:$0xf]  ;;  %v5366_v28 = vld [vmem:[%s8140_s1 + $0x3a4] sm:$0xf0] }
 0x120   : > { %v4572_v35 = vor.u32 %v5366_v28, %v4571_v27 }
 0x121   : > { %v6917_v30 = vpop.f32.mrf.mxu3 }
 0x122   : > { %v1396_v28 = vpop.f32.mrf.mxu2 }
 0x125   : > { %v1018_v60 = vpop.f32.mrf.mxu0 }
 0x126   : > { %v6920_v62 = vadd.f32 %v1018_v60, %v6697_v58  ;;  %v6922_v63 = vpop.f32.mrf.mxu1  ;;  %v4515_v58 = vld [vmem:[%s8140_s1 + $0x330] sm:$0xf]  ;;  %v5382_v60 = vld [vmem:[%s8140_s1 + $0x424] sm:$0xf0] }
 0x127   : > { %1540 = vmatmul.bf16.gmra.mxu3 %v6551_v56  ;;  %v4516_v53 = vor.u32 %v5352_v54, %v4515_v58  ;;  %v5348_v58 = vld [vmem:[%s8140_s1 + $0x314] sm:$0xf0] }
 0x128   : > { %1443 = vmatmul.bf16.vlgmr.msrb.gmra.mxu0 %v6491_v11  ;;  %v5368_v11 = vld [vmem:[%s8140_s1 + $0x3b4] sm:$0xf0] }
 0x129   : > { %1472 = vmatmul.bf16.vlgmr.msrb.gmra.mxu1 %v6113_v37  ;;  %v4580_v4 = vor.u32 %v5368_v11, %v4579_v2  ;;  %v4659_v37 = vld [vmem:[%s8140_s1 + $0x450] sm:$0xf]  ;;  %1894 = vmatpush.bf16.msra.mxu0 %v4516_v53  ;;  %v1420_v21 = vpop.f32.mrf.mxu3  ;;  %v4500_v53 = vor.u32 %v5348_v58, %v4499_v33  ;;  %v5364_v11 = vld [vmem:[%s8140_s1 + $0x394] sm:$0xf0] }
 0x12a   : > { %v4660_v14 = vor.u32 %v5388_v50, %v4659_v37  ;;  %1516 = vmatmul.bf16.gmra.mxu2 %v6351_v42  ;;  %v4563_v2 = vld [vmem:[%s8140_s1 + $0x390] sm:$0xf]  ;;  %v5380_v50 = vld [vmem:[%s8140_s1 + $0x414] sm:$0xf0] }
 0x12b   : > { %1923 = vmatpush.bf16.msra.mxu1 %v4580_v4  ;;  %v4564_v4 = vor.u32 %v5364_v11, %v4563_v2  ;;  %v4627_v37 = vld [vmem:[%s8140_s1 + $0x410] sm:$0xf]  ;;  %v4613_v2 = vld [vmem:[%s8140_s1 + $0x3f8] sm:$0xf0] }
 0x12c   : > { %1950 = vmatpush.bf16.msra.mxu2 %v4660_v14  ;;  %v4628_v14 = vor.u32 %v5380_v50, %v4627_v37  ;;  %v4541_v37 = vld [vmem:[%s8140_s1 + $0x368] sm:$0xf0]  ;;  %v5391_v50 = vld [vmem:[%s8140_s1 + $0x474] sm:$0xf] }
 0x12d   : > { %v1020_v5 = vpop.f32.mrf.mxu0 }
 0x12e   : > { %v6953_v8 = vadd.f32 %v1020_v5, %v6737_v23  ;;  %v6955_v9 = vpop.f32.mrf.mxu1  ;;  %v5350_v23 = vld [vmem:[%s8140_s1 + $0x324] sm:$0xf0] }
 0x12f   : > { %v4508_v12 = vor.u32 %v5350_v23, %v4507_v26  ;;  %1924 = vmatpush.bf16.msra.mxu1 %v4572_v35  ;;  %v4619_v26 = vld [vmem:[%s8140_s1 + $0x400] sm:$0xf]  ;;  %v5378_v23 = vld [vmem:[%s8140_s1 + $0x404] sm:$0xf0] }
 0x130   : > { %1951 = vmatpush.bf16.msra.mxu2 %v4652_v13  ;;  %v4491_v13 = vld [vmem:[%s8140_s1 + $0x300] sm:$0xf] }
 0x131   : > { %1895 = vmatpush.bf16.msra.mxu0 %v4508_v12  ;;  %v6996_v3 = vpop.f32.mrf.mxu3  ;;  %v4620_v12 = vor.u32 %v5378_v23, %v4619_v26 }
 0x133   : > { %1925 = vmatpush.bf16.msra.mxu1 %v4564_v4 }
 0x134   : > { %1952 = vmatpush.bf16.msra.mxu2 %v4644_v19  ;;  %v5359_v19 = vld [vmem:[%s8140_s1 + $0x374] sm:$0xf] }
 0x135   : > { %v1023_v40 = vpop.f32.mrf.mxu0  ;;  %1896 = vmatpush.bf16.msra.mxu0 %v4500_v53 }
 0x136   : > { %v1024_v45 = vadd.f32 %v1023_v40, %v6775_v39  ;;  %v6982_v49 = vpop.f32.mrf.mxu1  ;;  %v4636_v39 = vor.u32 %v5382_v60, %v4635_v59  ;;  %v1618_v59 = vrot.slane %v6510_v18, 1  ;;  %v4552_v60 = vor.u32 %v5359_v19, %v4549_v0  ;;  %v1551_v0 = vld [vmem:[%s8139_s0] sm:$0xee] }
 0x137   : > { %1545 = vmatmul.bf16.gmra.mxu3 %v6592_v20 }
 0x138   : > { %v1392_v43 = vadd.f32 %v1391_v7, %v1024_v45  ;;  %1448 = vmatmul.bf16.gmra.mxu0 %v6510_v18  ;;  %1953 = vmatpush.bf16.msra.mxu2 %v4636_v39  ;;  %v1552_v7 = vld [vmem:[%s8139_s0 + $0x8] sm:$0xe]  ;;  %v4556_v45 = vor.u32 %v5362_v38, %v4555_v36  ;;  %v5375_v18 = vld [vmem:[%s8140_s1 + $0x3f4] sm:$0xf]  ;;  %v5389_v36 = vld [vmem:[%s8140_s1 + $0x464] sm:$0xf] }
 0x139   : > { %1477 = vmatmul.bf16.gmra.mxu1 %v6137_v46  ;;  %v1606_v25 = vunpack.c.l.b16 %v1552_v7  ;;  %v1425_v40 = vpop.f32.mrf.mxu3  ;;  %1977 = vmatpush.bf16.msra.mxu3 %v4552_v60  ;;  %v4616_v4 = vor.u32 %v5375_v18, %v4613_v2  ;;  %v4669_v38 = vld [vmem:[%s8140_s1 + $0x468] sm:$0xf0]  ;;  %v1605_v2 = vunpack.c.h.b16 %v1551_v0 }
 0x13a   : > { %v7004_v54 = vadd.f32 %v1420_v21, %v1392_v43  ;;  %1926 = vmatpush.bf16.msra.mxu1 %v4556_v45  ;;  %v1624_v45 = vrot.slane %v6551_v56, 1 }
 0x13b   : > { %v1609_v27 = vpack.c.b16 %v553_v6, %v1606_v25 }
 0x13c   : > { %1954 = vmatpush.bf16.msra.mxu2 %v4628_v14  ;;  %v4677_v14 = vld [vmem:[%s8140_s1 + $0x478] sm:$0xf0] }
 0x13d   : > { %v1025_v5 = vpop.f32.mrf.mxu0  ;;  %v1617_v6 = vrot.slane %v1609_v27, 1  ;;  %v4680_v25 = vor.u32 %v5391_v50, %v4677_v14  ;;  %v4605_v27 = vld [vmem:[%s8140_s1 + $0x3e8] sm:$0xf0] }
 0x13e   : > { %v7022_v21 = vadd.f32 %v1025_v5, %v6815_v48  ;;  %v7024_v22 = vpop.f32.mrf.mxu1  ;;  %v5346_v48 = vld [vmem:[%s8140_s1 + $0x304] sm:$0xf0]  ;;  %v7082_v5 = vpop.f32.mrf.mxu2  ;;  %v4525_v14 = vld [vmem:[%s8140_s1 + $0x348] sm:$0xf0] }
 0x13f   : > { %v4492_v35 = vor.u32 %v5346_v48, %v4491_v13  ;;  %v7054_v39 = vsel %vm1610_vm1, %v1617_v6, %v1618_v59  ;;  %2035 = vmatpush.bf16.msrb.mxu1 %v4680_v25  ;;  %v7114_v6 = vsel %vm1610_vm1, %v1618_v59, %v1624_v45  ;;  %v5371_v59 = vld [vmem:[%s8140_s1 + $0x3d4] sm:$0xf]  ;;  %v4661_v25 = vld [vmem:[%s8140_s1 + $0x458] sm:$0xf0] }
 0x140   : > { %1955 = vmatpush.bf16.msra.mxu2 %v4620_v12  ;;  %v5373_v12 = vld [vmem:[%s8140_s1 + $0x3e4] sm:$0xf] }
 0x141   : > { %1897 = vmatpush.bf16.msra.mxu0 %v4492_v35  ;;  %v7084_v23 = vpop.f32.mrf.mxu3  ;;  %v4608_v35 = vor.u32 %v5373_v12, %v4605_v27  ;;  %v1608_v12 = vpack.c.b16 %v552_v31, %v1605_v2  ;;  %v5351_v31 = vld [vmem:[%s8140_s1 + $0x334] sm:$0xf] }
 0x143   : > { %1956 = vmatmul.bf16.vlgmr.msra.gmra.mxu2 %v7054_v39 }
 0x145   : > { %v1028_v43 = vpop.f32.mrf.mxu0  ;;  %2006 = vmatpush.bf16.msrb.mxu0 %v4616_v4  ;;  %v5353_v4 = vld [vmem:[%s8140_s1 + $0x344] sm:$0xf] }
 0x146   : > { %v1029_v33 = vadd.f32 %v1028_v43, %v6842_v61  ;;  %v7057_v58 = vpop.f32.mrf.mxu1  ;;  %v5357_v61 = vld [vmem:[%s8140_s1 + $0x364] sm:$0xf]  ;;  %v1401_v43 = vpop.f32.mrf.mxu2  ;;  %v4528_v27 = vor.u32 %v5353_v4, %v4525_v14 }
 0x147   : > { %v4544_v7 = vor.u32 %v5357_v61, %v4541_v37 }
 0x148   : > { %v1397_v53 = vadd.f32 %v1396_v28, %v1029_v33  ;;  %1453 = vmatmul.bf16.gmra.mxu0 %v6551_v56  ;;  %v5355_v28 = vld [vmem:[%s8140_s1 + $0x354] sm:$0xf]  ;;  %v1604_v56 = vunpack.c.l.b16 %v1551_v0  ;;  %v4517_v0 = vld [vmem:[%s8140_s1 + $0x338] sm:$0xf0] }
 0x149   : > { %1482 = vmatmul.bf16.gmra.mxu1 %v6221_v32  ;;  %1978 = vmatpush.bf16.msra.mxu3 %v4544_v7  ;;  %v1430_v18 = vpop.f32.mrf.mxu3  ;;  %v5387_v7 = vld [vmem:[%s8140_s1 + $0x454] sm:$0xf] }
 0x14a   : > { %v7071_v11 = vadd.f32 %v1425_v40, %v1397_v53  ;;  %v4672_v40 = vor.u32 %v5389_v36, %v4669_v38  ;;  %2007 = vmatpush.bf16.msrb.mxu0 %v4608_v35 }
 0x14c   : > { %2036 = vmatpush.bf16.msrb.mxu1 %v4672_v40  ;;  %v1614_v40 = vrot.slane %v1608_v12, 1 }
 0x14d   : > { %v1030_v26 = vpop.f32.mrf.mxu0 }
 0x14e   : > { %v7087_v13 = vadd.f32 %v1030_v26, %v6859_v1  ;;  %v7089_v48 = vpop.f32.mrf.mxu1  ;;  %v4533_v1 = vld [vmem:[%s8140_s1 + $0x358] sm:$0xf0]  ;;  %v1607_v26 = vpack.c.b16 %v551_v29, %v1604_v56  ;;  %v4589_v29 = vld [vmem:[%s8140_s1 + $0x3c8] sm:$0xf0]  ;;  %v1630_v56 = vrot.slane %v6592_v20, 1 }
 0x14f   : > { %v4536_v19 = vor.u32 %v5355_v28, %v4533_v1  ;;  %v4664_v28 = vor.u32 %v5387_v7, %v4661_v25  ;;  %v4509_v7 = vld [vmem:[%s8140_s1 + $0x328] sm:$0xf0]  ;;  %v5383_v25 = vld [vmem:[%s8140_s1 + $0x434] sm:$0xf] }
 0x150   : > { %v1611_v38 = vrot.slane %v1607_v26, 1  ;;  %v7173_v2 = vsel %vm1610_vm1, %v1624_v45, %v1630_v56  ;;  %v4581_v45 = vld [vmem:[%s8140_s1 + $0x3b8] sm:$0xf0] }
 0x151   : > { %1979 = vmatpush.bf16.msra.mxu3 %v4536_v19  ;;  %2037 = vmatpush.bf16.msrb.mxu1 %v4664_v28  ;;  %v1612_v19 = vrot.slane %v6137_v46, 1  ;;  %v5385_v46 = vld [vmem:[%s8140_s1 + $0x444] sm:$0xf]  ;;  %v4645_v26 = vld [vmem:[%s8140_s1 + $0x438] sm:$0xf0] }
 0x153   : > { %1961 = vmatmul.bf16.gmra.mxu2 %v7114_v6 }
 0x155   : > { %v1033_v60 = vpop.f32.mrf.mxu0  ;;  %1980 = vmatpush.bf16.msra.mxu3 %v4528_v27  ;;  %v4648_v27 = vor.u32 %v5383_v25, %v4645_v26  ;;  %v4629_v26 = vld [vmem:[%s8140_s1 + $0x418] sm:$0xf0] }
 0x156   : > { %v1034_v33 = vadd.f32 %v1033_v60, %v6874_v10  ;;  %v7117_v53 = vpop.f32.mrf.mxu1  ;;  %v4597_v10 = vld [vmem:[%s8140_s1 + $0x3d8] sm:$0xf0]  ;;  %v4653_v60 = vld [vmem:[%s8140_s1 + $0x448] sm:$0xf0] }
 0x157   : > { %v4600_v50 = vor.u32 %v5371_v59, %v4597_v10  ;;  %v1613_v59 = vsel %vm1610_vm1, %v1611_v38, %v1612_v19 }
 0x158   : > { %v1402_v61 = vadd.f32 %v1401_v43, %v1034_v33  ;;  %1458 = vmatmul.bf16.gmra.mxu0 %v6592_v20  ;;  %v1615_v43 = vrot.slane %v6139_v47, 1  ;;  %v4520_v33 = vor.u32 %v5351_v31, %v4517_v0  ;;  %v5367_v20 = vld [vmem:[%s8140_s1 + $0x3b4] sm:$0xf]  ;;  %v4573_v31 = vld [vmem:[%s8140_s1 + $0x3a8] sm:$0xf0] }
 0x159   : > { %1487 = vmatmul.bf16.gmra.mxu1 %v6349_v41  ;;  %2008 = vmatpush.bf16.msrb.mxu0 %v4600_v50  ;;  %v4584_v14 = vor.u32 %v5367_v20, %v4581_v45  ;;  %v5345_v45 = vld [vmem:[%s8140_s1 + $0x304] sm:$0xf] }
 0x15a   : > { %v7131_v37 = vadd.f32 %v1430_v18, %v1402_v61  ;;  %v4656_v18 = vor.u32 %v5385_v46, %v4653_v60  ;;  %1981 = vmatpush.bf16.msra.mxu3 %v4520_v33  ;;  %v7178_v50 = vsel %vm1610_vm1, %v1614_v40, %v1615_v43  ;;  %v1620_v40 = vrot.slane %v6221_v32, 1  ;;  %v5381_v32 = vld [vmem:[%s8140_s1 + $0x424] sm:$0xf]  ;;  %v4637_v46 = vld [vmem:[%s8140_s1 + $0x428] sm:$0xf0] }
 0x15b   : > { %v1622_v60 = vrot.slane %v6255_v51, 1  ;;  %v4493_v51 = vld [vmem:[%s8140_s1 + $0x308] sm:$0xf0] }
 0x15c   : > { %2038 = vmatpush.bf16.msrb.mxu1 %v4656_v18  ;;  %v4640_v18 = vor.u32 %v5381_v32, %v4637_v46  ;;  %v1621_v20 = vsel %vm1610_vm1, %v1612_v19, %v1620_v40  ;;  %v5363_v19 = vld [vmem:[%s8140_s1 + $0x394] sm:$0xf]  ;;  %v1628_v32 = vrot.slane %v6351_v42, 1 }
 0x15d   : > { %v1035_v35 = vpop.f32.mrf.mxu0 }
 0x15e   : > { %v7147_v1 = vadd.f32 %v1035_v35, %v6895_v16  ;;  %v7149_v36 = vpop.f32.mrf.mxu1  ;;  %v4592_v16 = vor.u32 %v5369_v24, %v4589_v29  ;;  %v5365_v29 = vld [vmem:[%s8140_s1 + $0x3a4] sm:$0xf] }
 0x15f   : > { %v4576_v0 = vor.u32 %v5365_v29, %v4573_v31  ;;  %v5361_v29 = vld [vmem:[%s8140_s1 + $0x384] sm:$0xf]  ;;  %v4557_v31 = vld [vmem:[%s8140_s1 + $0x388] sm:$0xf0] }
 0x160   : > { %2009 = vmatpush.bf16.msrb.mxu0 %v4592_v16  ;;  %2039 = vmatpush.bf16.msrb.mxu1 %v4648_v27  ;;  %v5347_v16 = vld [vmem:[%s8140_s1 + $0x314] sm:$0xf] }
 0x163   : > { %1966 = vmatmul.bf16.gmra.mxu2 %v7173_v2 }
 0x164   : > { %2010 = vmatpush.bf16.msrb.mxu0 %v4584_v14  ;;  %2040 = vmatpush.bf16.msrb.mxu1 %v4640_v18  ;;  %v7238_v14 = vsel %vm1610_vm1, %v1615_v43, %v1622_v60  ;;  %v5379_v43 = vld [vmem:[%s8140_s1 + $0x414] sm:$0xf] }
 0x165   : > { %v1076_v61 = vpop.f32.mrf.mxu0 }
 0x166   : > { %v1077_v10 = vadd.f32 %v1076_v61, %v6922_v63  ;;  %v1105_v4 = vpop.f32.mrf.mxu1  ;;  %v5349_v63 = vld [vmem:[%s8140_s1 + $0x324] sm:$0xf]  ;;  %v1636_v61 = vrot.slane %v6628_v57, 1 }
 0x167   : > { %v4512_v12 = vor.u32 %v5349_v63, %v4509_v7 }
 0x168   : > { %v7181_v47 = vadd.f32 %v1105_v4, %v1077_v10  ;;  %1898 = vmatmul.bf16.vlgmr.msra.gmra.mxu0 %v1613_v59  ;;  %v7227_v10 = vsel %vm1610_vm1, %v1630_v56, %v1636_v61  ;;  %v4496_v56 = vor.u32 %v5345_v45, %v4493_v51  ;;  %v7278_v45 = vsel %vm1610_vm1, %v1622_v60, %v1628_v32  ;;  %v7290_v60 = vpop.f32.mrf.mxu3 }
 0x169   : > { %1927 = vmatmul.bf16.vlgmr.msra.gmra.mxu1 %v7178_v50  ;;  %1982 = vmatpush.bf16.msra.mxu3 %v4512_v12  ;;  %v4632_v12 = vor.u32 %v5379_v43, %v4629_v26 }
 0x16a   : > { %2011 = vmatpush.bf16.msrb.mxu0 %v4576_v0  ;;  %v1626_v0 = vrot.slane %v6349_v41, 1 }
 0x16b   : > { %2041 = vmatpush.bf16.msrb.mxu1 %v4632_v12 }
 0x16c   : > { %v1627_v18 = vsel %vm1610_vm1, %v1620_v40, %v1626_v0  ;;  %v1632_v40 = vrot.slane %v6448_v34, 1 }
 0x16d   : > { %v1078_v28 = vpop.f32.mrf.mxu0 }
 0x16e   : > { %v1079_v35 = vadd.f32 %v1078_v28, %v6955_v9  ;;  %v1107_v38 = vpop.f32.mrf.mxu1  ;;  %v4501_v9 = vld [vmem:[%s8140_s1 + $0x318] sm:$0xf0]  ;;  %v1633_v43 = vsel %vm1610_vm1, %v1626_v0, %v1632_v40 }
 0x16f   : > { %v4504_v33 = vor.u32 %v5347_v16, %v4501_v9  ;;  %v7268_v16 = vpop.f32.mrf.mxu2  ;;  %v4621_v9 = vld [vmem:[%s8140_s1 + $0x408] sm:$0xf0] }
 0x170   : > { %v7204_v24 = vadd.f32 %v1107_v38, %v1079_v35 }
 0x171   : > { %1983 = vmatpush.bf16.msra.mxu3 %v4504_v33 }
 0x173   : > { %1971 = vmatmul.bf16.gmra.mxu2 %v7227_v10 }
 0x175   : > { %v1081_v4 = vpop.f32.mrf.mxu0  ;;  %1984 = vmatpush.bf16.msra.mxu3 %v4496_v56 }
 0x176   : > { %v1082_v63 = vadd.f32 %v1081_v4, %v6982_v49  ;;  %v1110_v57 = vpop.f32.mrf.mxu1  ;;  %v4565_v49 = vld [vmem:[%s8140_s1 + $0x398] sm:$0xf0] }
 0x177   : > { %v4568_v25 = vor.u32 %v5363_v19, %v4565_v49 }
 0x178   : > { %v7241_v7 = vadd.f32 %v1110_v57, %v1082_v63  ;;  %1903 = vmatmul.bf16.gmra.mxu0 %v1621_v20  ;;  %1985 = vmatmul.bf16.vlgmr.msra.gmra.mxu3 %v1613_v59  ;;  %v5377_v59 = vld [vmem:[%s8140_s1 + $0x404] sm:$0xf] }
 0x179   : > { %1932 = vmatmul.bf16.gmra.mxu1 %v7238_v14  ;;  %2012 = vmatpush.bf16.msrb.mxu0 %v4568_v25  ;;  %v4624_v46 = vor.u32 %v5377_v59, %v4621_v9 }
 0x17b   : > { %2042 = vmatpush.bf16.msrb.mxu1 %v4624_v46 }
 0x17c   : > { %v1502_v51 = vpop.f32.mrf.mxu2 }
 0x17d   : > { %v1083_v27 = vpop.f32.mrf.mxu0 }
 0x17e   : > { %v1084_v28 = vadd.f32 %v1083_v27, %v7024_v22  ;;  %v1112_v35 = vpop.f32.mrf.mxu1  ;;  %v4560_v22 = vor.u32 %v5361_v29, %v4557_v31 }
 0x180   : > { %v7257_v38 = vadd.f32 %v1112_v35, %v1084_v28  ;;  %2013 = vmatpush.bf16.msrb.mxu0 %v4560_v22  ;;  %v1387_v35 = vadd.f32 %v6879_v17, %v6920_v62 }
 0x182   : > { %v1416_v29 = vadd.f32 %v6893_v15, %v1387_v35 }
 0x184   : > { %v7288_v19 = vpop.f32.mrf.mxu2 }
 0x185   : > { %v1086_v33 = vpop.f32.mrf.mxu0 }
 0x186   : > { %v1087_v61 = vadd.f32 %v1086_v33, %v7057_v58  ;;  %v1115_v4 = vpop.f32.mrf.mxu1  ;;  %v1634_v58 = vrot.slane %v6459_v52, 1 }
 0x188   : > { %v7280_v41 = vadd.f32 %v1115_v4, %v1087_v61  ;;  %1908 = vmatmul.bf16.gmra.mxu0 %v1627_v18  ;;  %1990 = vmatmul.bf16.gmra.mxu3 %v1621_v20  ;;  %v7295_v26 = vsel %vm1610_vm1, %v1628_v32, %v1634_v58 }
 0x189   : > { %1937 = vmatmul.bf16.gmra.mxu1 %v7278_v45 }
 0x18a   : > { %v1531_v34 = vpop.f32.mrf.mxu3 }
 0x18c   : > { %v1507_v52 = vpop.f32.mrf.mxu2 }
 0x18d   : > { %v1088_v42 = vpop.f32.mrf.mxu0 }
 0x18e   : > { %v1089_v63 = vadd.f32 %v1088_v42, %v7089_v48  ;;  %v1117_v57 = vpop.f32.mrf.mxu1 }
 0x190   : > { %v7284_v56 = vadd.f32 %v1117_v57, %v1089_v63 }
 0x192   : > { %v7306_v59 = vpop.f32.mrf.mxu3 }
 0x194   : > { %v7310_v9 = vpop.f32.mrf.mxu2 }
 0x195   : > { %v1091_v49 = vpop.f32.mrf.mxu0 }
 0x196   : > { %v1092_v25 = vadd.f32 %v1091_v49, %v7117_v53  ;;  %v1120_v20 = vpop.f32.mrf.mxu1 }
 0x198   : > { %v7297_v48 = vadd.f32 %v1120_v20, %v1092_v25  ;;  %1913 = vmatmul.bf16.gmra.mxu0 %v1633_v43  ;;  %1995 = vmatmul.bf16.gmra.mxu3 %v1627_v18  ;;  %v1399_v25 = vadd.f32 %v7082_v5, %v7087_v13 }
 0x199   : > { %1942 = vmatmul.bf16.gmra.mxu1 %v7295_v26 }
 0x19c   : > { %v1512_v4 = vpop.f32.mrf.mxu2 }
 0x19d   : > { %v1093_v12 = vpop.f32.mrf.mxu0 }
 0x19e   : > { %v1094_v27 = vadd.f32 %v1093_v12, %v7149_v36  ;;  %v1122_v28 = vpop.f32.mrf.mxu1  ;;  %v1389_v36 = vadd.f32 %v6909_v44, %v6953_v8 }
 0x1a0   : > { %v7303_v53 = vadd.f32 %v1122_v28, %v1094_v27  ;;  %v1418_v15 = vadd.f32 %v6917_v30, %v1389_v36 }
 0x1a5   : > { %v1444_v31 = vpop.f32.mrf.mxu0 }
 0x1a6   : > { %v7308_v0 = vadd.f32 %v1444_v31, %v1416_v29  ;;  %v1473_v22 = vpop.f32.mrf.mxu1 }
 0x1a7   : > { %v1474_v32 = vadd.f32 %v1473_v22, %v7181_v47  ;;  %v1536_v47 = vpop.f32.mrf.mxu3 }
 0x1a8   : > { %2014 = vmatmul.bf16.vlgmr.msrb.gmra.mxu0 %v7178_v50  ;;  %2000 = vmatmul.bf16.gmra.mxu3 %v1633_v43 }
 0x1a9   : > { %v1503_v17 = vadd.f32 %v1502_v51, %v1474_v32  ;;  %2043 = vmatmul.bf16.vlgmr.msrb.gmra.mxu1 %v7054_v39  ;;  %v1394_v51 = vadd.f32 %v6985_v55, %v7022_v21 }
 0x1ab   : > { %v7317_v62 = vadd.f32 %v1531_v34, %v1503_v17 }
 0x1ad   : > { %v1446_v46 = vpop.f32.mrf.mxu0 }
 0x1ae   : > { %v7320_v33 = vadd.f32 %v1446_v46, %v1418_v15  ;;  %v1475_v18 = vpop.f32.mrf.mxu1  ;;  %v2190_v46 = vlaneseq }
 0x1af   : > { %v7323_v61 = vadd.f32 %v1475_v18, %v7204_v24  ;;  %v7333_v42 = vpop.f32.mrf.mxu3  ;;  %v7335_v24 = vpop.f32.mrf.mxu2 }
 0x1b5   : > { %v1449_v44 = vpop.f32.mrf.mxu0 }
 0x1b6   : > { %v7326_v8 = vadd.f32 %v1449_v44, %v7004_v54  ;;  %v1478_v50 = vpop.f32.mrf.mxu1  ;;  %v1423_v54 = vadd.f32 %v6996_v3, %v1394_v51 }
 0x1b7   : > { %v1479_v39 = vadd.f32 %v1478_v50, %v7241_v7  ;;  %v1541_v55 = vpop.f32.mrf.mxu3  ;;  %v1517_v21 = vpop.f32.mrf.mxu2 }
 0x1b8   : > { %2019 = vmatmul.bf16.gmra.mxu0 %v7238_v14 }
 0x1b9   : > { %v1508_v30 = vadd.f32 %v1507_v52, %v1479_v39  ;;  %2048 = vmatmul.bf16.gmra.mxu1 %v7114_v6  ;;  %v7396_v39 = vshrl.u32 %v2190_v46, 7 }
 0x1bb   : > { %v7337_v63 = vadd.f32 %v1536_v47, %v1508_v30  ;;  %v2199_v51 = vadd.s32 64, %v7396_v39 }
 0x1bd   : > { %v1451_v57 = vpop.f32.mrf.mxu0  ;;  %vm2228_vm3 = vcmp.ge.s32.totalorder %v2199_v51, 68 }
 0x1be   : > { %v7340_v40 = vadd.f32 %v1451_v57, %v1423_v54  ;;  %v1480_v7 = vpop.f32.mrf.mxu1  ;;  %v5853_v54 = vmov 0  }
 0x1bf   : > { %v7343_v58 = vadd.f32 %v1480_v7, %v7257_v38  ;;  %v1428_v38 = vadd.f32 %v7084_v23, %v1399_v25  ;;  %v7356_v52 = vpop.f32.mrf.mxu3  ;;  %v7360_v27 = vpop.f32.mrf.mxu2  ;;  %v1404_v23 = vadd.f32 %v7268_v16, %v7147_v1  ;;  %v2254_v57 = vsel %vm2228_vm3, 1, %v5853_v54 }
 0x1c5   : > { %v1454_v14 = vpop.f32.mrf.mxu0 }
 0x1c6   : > { %v7346_v6 = vadd.f32 %v1454_v14, %v7071_v11  ;;  %v1483_v49 = vpop.f32.mrf.mxu1 }
 0x1c7   : > { %v1484_v43 = vadd.f32 %v1483_v49, %v7280_v41  ;;  %v1546_v28 = vpop.f32.mrf.mxu3  ;;  %v1957_v35 = vpop.f32.mrf.mxu2 }
 0x1c8   : > { %2024 = vmatmul.bf16.gmra.mxu0 %v7278_v45 }
 0x1c9   : > { %v1513_v3 = vadd.f32 %v1512_v4, %v1484_v43  ;;  %2053 = vmatmul.bf16.gmra.mxu1 %v7173_v2  ;;  %v7381_v4 = vand.u32 127, %v2190_v46 }
 0x1cb   : > { %v7353_v20 = vadd.f32 %v1541_v55, %v1513_v3  ;;  %vm4689_vm2 = vcmp.eq.s32.totalorder %v7381_v4, 1  ;;  %vm2358_vm4 = vcmp.eq.s32.totalorder %v2254_v57, %v7381_v4  ;;  %vm4681_vm5 = vcmp.eq.s32.totalorder %v7381_v4, 0 }
 0x1cc   : > { %vm4697_vm6 = vcmp.eq.s32.totalorder %v7381_v4, 2  ;;  %vm2402_vm10 = vcmp.ge.s32.totalorder %v7381_v4, 68 }
 0x1cd   : > { %v1456_v34 = vpop.f32.mrf.mxu0 }
 0x1ce   : > { %v7358_v11 = vadd.f32 %v1456_v34, %v1428_v38  ;;  %v1485_v12 = vpop.f32.mrf.mxu1 }
 0x1cf   : > { %v7363_v41 = vadd.f32 %v1485_v12, %v7284_v56  ;;  %v1433_v56 = vadd.f32 %v7290_v60, %v1404_v23  ;;  %v1959_v36 = vpop.f32.mrf.mxu2  ;;  %v5852_v60 = vmov 0.00024414063  }
 0x1d0   : > { %4706 = vmatpush.msk.msrb.mxu2 %vm4689_vm2, %v5852_v60 }
 0x1d2   : > { %4707 = vmatpush.msk.msrb.mxu2 %vm4689_vm2, %v5852_v60 }
 0x1d4   : > { %4708 = vmatpush.msk.msrb.mxu2 %vm4689_vm2, %v5852_v60 }
 0x1d5   : > { %v1459_v5 = vpop.f32.mrf.mxu0 }
 0x1d6   : > { %v7366_v13 = vadd.f32 %v1459_v5, %v7131_v37  ;;  %v1488_v2 = vpop.f32.mrf.mxu1  ;;  %4709 = vmatpush.msk.msrb.mxu2 %vm4689_vm2, %v5852_v60  ;;  %v7421_v5 = vpop.f32.mrf.mxu3 }
 0x1d7   : > { %v1489_v45 = vadd.f32 %v1488_v2, %v7297_v48  ;;  %v7423_v2 = vld [vmem:[#allocation3] sm:$0x3] }
 0x1d8   : > { %2029 = vmatmul.bf16.gmra.mxu0 %v7295_v26  ;;  %v1962_v26 = vpop.f32.mrf.mxu2  ;;  %4710 = vmatpush.msk.msrb.mxu2 %vm4689_vm2, %v5852_v60 }
 0x1d9   : > { %v1518_v29 = vadd.f32 %v1517_v21, %v1489_v45  ;;  %2058 = vmatmul.bf16.gmra.mxu1 %v7227_v10 }
 0x1da   : > { %4711 = vmatpush.msk.msrb.mxu2 %vm4689_vm2, %v5852_v60 }
 0x1db   : > { %v7373_v31 = vadd.f32 %v1546_v28, %v1518_v29 }
 0x1dc   : > { %4712 = vmatpush.msk.msrb.mxu2 %vm4689_vm2, %v5852_v60 }
 0x1dd   : > { %v1461_v22 = vpop.f32.mrf.mxu0 }
 0x1de   : > { %v7376_v37 = vadd.f32 %v1461_v22, %v1433_v56  ;;  %v1490_v32 = vpop.f32.mrf.mxu1  ;;  %4713 = vmatpush.msk.msrb.mxu2 %vm2358_vm4, %v5852_v60  ;;  %v2082_v56 = vperm.slane %v7423_v2, 0 }
 0x1df   : > { %v7379_v48 = vadd.f32 %v1490_v32, %v7303_v53 }
 0x1e0   : > { %v1964_v47 = vpop.f32.mrf.mxu2  ;;  %4714 = vmatpush.msk.msrb.mxu2 %vm4681_vm5, %v5852_v60 }
 0x1e2   : > { %4715 = vmatpush.msk.msrb.mxu2 %vm4681_vm5, %v5852_v60 }
 0x1e4   : > { %4716 = vmatpush.msk.msrb.mxu2 %vm4681_vm5, %v5852_v60 }
 0x1e5   : > { %v1899_v1 = vpop.f32.mrf.mxu0 }
 0x1e6   : > { %v1928_v16 = vpop.f32.mrf.mxu1  ;;  %4717 = vmatpush.msk.msrb.mxu2 %vm4681_vm5, %v5852_v60 }
 0x1e7   : > { %v1929_v21 = vadd.f32 %v1928_v16, %v1899_v1 }
 0x1e8   : > { %v1967_v50 = vpop.f32.mrf.mxu2  ;;  %4718 = vmatpush.msk.msrb.mxu2 %vm4681_vm5, %v5852_v60 }
 0x1e9   : > { %v1958_v38 = vadd.f32 %v1957_v35, %v1929_v21 }
 0x1ea   : > { %4719 = vmatpush.msk.msrb.mxu2 %vm4681_vm5, %v5852_v60 }
 0x1eb   : > { %v2064_v35 = vadd.f32 %v1958_v38, %v7308_v0 }
 0x1ec   : > { %4720 = vmatpush.msk.msrb.mxu2 %vm4681_vm5, %v5852_v60 }
 0x1ed   : > { %v1901_v17 = vpop.f32.mrf.mxu0  ;;  %v7444_v0 = vadd.f32 %v2082_v56, %v2064_v35 }
 0x1ee   : > { %v1930_v15 = vpop.f32.mrf.mxu1  ;;  %4721 = vmatpush.msk.msrb.mxu2 %vm4681_vm5, %v5852_v60 }
 0x1ef   : > { %v1931_v55 = vadd.f32 %v1930_v15, %v1901_v17 }
 0x1f0   : > { %v1969_v49 = vpop.f32.mrf.mxu2 }
 0x1f1   : > { %v1960_v43 = vadd.f32 %v1959_v36, %v1931_v55 }
 0x1f3   : > { %v2066_v23 = vadd.f32 %v1960_v43, %v7320_v33 }
 0x1f5   : > { %v1904_v18 = vpop.f32.mrf.mxu0  ;;  %v7438_v36 = vadd.f32 %v2082_v56, %v2066_v23 }
 0x1f6   : > { %v1933_v10 = vpop.f32.mrf.mxu1 }
 0x1f7   : > { %v1934_v14 = vadd.f32 %v1933_v10, %v1904_v18 }
 0x1f8   : > { %v1972_v1 = vpop.f32.mrf.mxu2 }
 0x1f9   : > { %v1963_v34 = vadd.f32 %v1962_v26, %v1934_v14 }
 0x1fb   : > { %v2068_v22 = vadd.f32 %v1963_v34, %v7326_v8  ;;  %v7449_v18 = vpop.f32.mrf.mxu3 }
 0x1fd   : > { %v1906_v53 = vpop.f32.mrf.mxu0  ;;  %v7446_v17 = vadd.f32 %v2082_v56, %v2068_v22 }
 0x1fe   : > { %v1935_v44 = vpop.f32.mrf.mxu1 }
 0x1ff   : > { %v1936_v25 = vadd.f32 %v1935_v44, %v1906_v53  ;;  %v2137_v44 = vmul.f32 %v7444_v0, %v7444_v0 }
 0x201   : > { %v1965_v28 = vadd.f32 %v1964_v47, %v1936_v25  ;;  %v1974_v25 = vpop.f32.mrf.mxu2 }
 0x203   : > { %v2070_v33 = vadd.f32 %v1965_v28, %v7340_v40  ;;  %v2139_v40 = vmul.f32 %v7438_v36, %v7438_v36  ;;  %v1988_v28 = vpop.f32.mrf.mxu3 }
 0x205   : > { %v1909_v30 = vpop.f32.mrf.mxu0  ;;  %v7456_v10 = vadd.f32 %v2082_v56, %v2070_v33  ;;  %v2153_v57 = vadd.f32 %v2139_v40, %v2137_v44 }
 0x206   : > { %v1938_v7 = vpop.f32.mrf.mxu1 }
 0x207   : > { %v1939_v45 = vadd.f32 %v1938_v7, %v1909_v30 }
 0x209   : > { %v1968_v32 = vadd.f32 %v1967_v50, %v1939_v45  ;;  %v2141_v50 = vmul.f32 %v7446_v17, %v7446_v17 }
 0x20b   : > { %v2072_v15 = vadd.f32 %v1968_v32, %v7346_v6  ;;  %v2102_v6 = vadd.f32 %v7438_v36, %v7444_v0  ;;  %v2154_v14 = vadd.f32 %v2153_v57, %v2141_v50  ;;  %v1991_v50 = vpop.f32.mrf.mxu3 }
 0x20d   : > { %v1911_v3 = vpop.f32.mrf.mxu0  ;;  %v7465_v51 = vadd.f32 %v2082_v56, %v2072_v15  ;;  %v2103_v7 = vadd.f32 %v2102_v6, %v7446_v17 }
 0x20e   : > { %v1940_v12 = vpop.f32.mrf.mxu1 }
 0x20f   : > { %v1941_v29 = vadd.f32 %v1940_v12, %v1911_v3  ;;  %v2145_v3 = vmul.f32 %v7465_v51, %v7465_v51 }
 0x211   : > { %v1970_v16 = vadd.f32 %v1969_v49, %v1941_v29  ;;  %v2104_v49 = vadd.f32 %v2103_v7, %v7456_v10  ;;  %v5854_v29 = vmov 0.0  }
 0x212   : > { %v2401_v35 = vsel %vm4697_vm6, 0.00024414063, %v5854_v29 }
 0x213   : > { %v2074_v47 = vadd.f32 %v1970_v16, %v7358_v11  ;;  %v2143_v11 = vmul.f32 %v7456_v10, %v7456_v10  ;;  %v2105_v12 = vadd.f32 %v2104_v49, %v7465_v51  ;;  %4722 = vmatpush.msk.msrb.mxu3 %vm2419_vm7, %v2401_v35 }
 0x215   : > { %v1914_v26 = vpop.f32.mrf.mxu0  ;;  %v7471_v55 = vadd.f32 %v2082_v56, %v2074_v47  ;;  %v2155_v34 = vadd.f32 %v2154_v14, %v2143_v11  ;;  %4723 = vmatpush.msk.msrb.mxu3 %vm4697_vm6, %v5852_v60 }
 0x216   : > { %v1943_v8 = vpop.f32.mrf.mxu1 }
 0x217   : > { %v1944_v46 = vadd.f32 %v1943_v8, %v1914_v26  ;;  %v2147_v45 = vmul.f32 %v7471_v55, %v7471_v55  ;;  %v2156_v22 = vadd.f32 %v2155_v34, %v2145_v3  ;;  %v2106_v32 = vadd.f32 %v2105_v12, %v7471_v55  ;;  %4724 = vmatpush.msk.msrb.mxu3 %vm4697_vm6, %v5852_v60  ;;  %v1993_v3 = vpop.f32.mrf.mxu3 }
 0x219   : > { %v1973_v53 = vadd.f32 %v1972_v1, %v1944_v46  ;;  %v2157_v16 = vadd.f32 %v2156_v22, %v2147_v45  ;;  %4725 = vmatpush.msk.msrb.mxu3 %vm4697_vm6, %v5852_v60 }
 0x21b   : > { %v2076_v30 = vadd.f32 %v1973_v53, %v7366_v13  ;;  %4726 = vmatpush.msk.msrb.mxu3 %vm4697_vm6, %v5852_v60 }
 0x21d   : > { %v1916_v21 = vpop.f32.mrf.mxu0  ;;  %v7476_v38 = vadd.f32 %v2082_v56, %v2076_v30  ;;  %4727 = vmatpush.msk.msrb.mxu3 %vm4697_vm6, %v5852_v60 }
 0x21e   : > { %v1945_v43 = vpop.f32.mrf.mxu1 }
 0x21f   : > { %v1946_v13 = vadd.f32 %v1945_v43, %v1916_v21  ;;  %v2149_v33 = vmul.f32 %v7476_v38, %v7476_v38  ;;  %v2107_v26 = vadd.f32 %v2106_v32, %v7476_v38  ;;  %4728 = vmatpush.msk.msrb.mxu3 %vm4697_vm6, %v5852_v60  ;;  %v1996_v32 = vpop.f32.mrf.mxu3 }
 0x221   : > { %v1975_v23 = vadd.f32 %v1974_v25, %v1946_v13  ;;  %v2158_v40 = vadd.f32 %v2157_v16, %v2149_v33  ;;  %4729 = vmatpush.msk.msrb.mxu3 %vm4697_vm6, %v5852_v60 }
 0x223   : > { %v2078_v1 = vadd.f32 %v1975_v23, %v7376_v37  ;;  %4730 = vmatpush.msk.msrb.mxu3 %vm4697_vm6, %v5852_v60  ;;  %vm2693_vm6 = vcmask 523264  }
 0x225   : > { %v7491_v8 = vadd.f32 %v2082_v56, %v2078_v1  ;;  %v2015_v15 = vpop.f32.mrf.mxu0  ;;  %4731 = vmatpush.msk.msrb.mxu3 %vm4689_vm2, %v5852_v60 }
 0x226   : > { %v2044_v46 = vpop.f32.mrf.mxu1 }
 0x227   : > { %v2108_v47 = vadd.f32 %v2107_v26, %v7491_v8  ;;  %v2151_v53 = vmul.f32 %v7491_v8, %v7491_v8  ;;  %v1505_v26 = vadd.f32 %v7288_v19, %v7323_v61  ;;  %v2083_v61 = vperm.slane %v7423_v2, 1 }
 0x229   : > { %v2109_v37 = vrot.slane %v2108_v47, 4  ;;  %v2159_v44 = vadd.f32 %v2158_v40, %v2151_v53  ;;  %v2016_v40 = vadd.f32 %v2015_v15, %v7449_v18  ;;  %v1534_v60 = vadd.f32 %v7306_v59, %v1505_v26 }
 0x22a   : > { %v1515_v59 = vadd.f32 %v7335_v24, %v7363_v41 }
 0x22b   : > { %v2110_v56 = vadd.f32 %v2109_v37, %v2108_v47  ;;  %v2160_v6 = vrot.slane %v2159_v44, 4  ;;  %v1998_v37 = vpop.f32.mrf.mxu3 }
 0x22d   : > { %v2017_v30 = vpop.f32.mrf.mxu0  ;;  %v2111_v57 = vrot.slane %v2110_v56, 2  ;;  %v2161_v7 = vadd.f32 %v2160_v6, %v2159_v44  ;;  %v1510_v6 = vadd.f32 %v7310_v9, %v7343_v58 }
 0x22e   : > { %v2046_v11 = vpop.f32.mrf.mxu1  ;;  %v2018_v33 = vadd.f32 %v2017_v30, %v1988_v28 }
 0x22f   : > { %v2112_v21 = vadd.f32 %v2111_v57, %v2110_v56  ;;  %v2162_v14 = vrot.slane %v2161_v7, 2  ;;  %v2045_v56 = vadd.f32 %v2044_v46, %v2016_v40  ;;  %v1539_v18 = vadd.f32 %v7333_v42, %v1510_v6 }
 0x230   : > { %v2047_v53 = vadd.f32 %v2046_v11, %v2018_v33 }
 0x231   : > { %v2113_v49 = vrot.slane %v2112_v21, 1  ;;  %v2163_v43 = vadd.f32 %v2162_v14, %v2161_v7  ;;  %v2065_v19 = vadd.f32 %v2045_v56, %v7317_v62 }
 0x232   : > { %v2067_v28 = vadd.f32 %v2047_v53, %v1534_v60 }
 0x233   : > { %v2164_v25 = vrot.slane %v2163_v43, 1  ;;  %v2114_v34 = vadd.f32 %v2113_v49, %v2112_v21  ;;  %v7538_v11 = vadd.f32 %v2083_v61, %v2065_v19 }
 0x234   : > { %v7536_v9 = vadd.f32 %v2083_v61, %v2067_v28 }
 0x235   : > { %v2020_v13 = vpop.f32.mrf.mxu0  ;;  %v2165_v12 = vadd.f32 %v2164_v25, %v2163_v43  ;;  %v2001_v43 = vpop.f32.mrf.mxu3  ;;  %v1544_v25 = vadd.f32 %v7356_v52, %v1515_v59 }
 0x236   : > { %v2049_v45 = vpop.f32.mrf.mxu1  ;;  %v2021_v47 = vadd.f32 %v2020_v13, %v1991_v50  ;;  %v2140_v42 = vmul.f32 %v7536_v9, %v7536_v9  ;;  %v2117_v52 = vsel %vm2115_vm9, %v7536_v9, 0.0 }
 0x237   : > { %v2188_v23 = vsel %vm2187_vm8, %v2114_v34, %v2165_v12  ;;  %v2138_v34 = vmul.f32 %v7538_v11, %v7538_v11 }
 0x238   : > { %2439 = vmatmul.f32.vlgmr.msrb.gmra.mxu2 %v2188_v23  ;;  %v2050_v57 = vadd.f32 %v2049_v45, %v2021_v47  ;;  %v2116_v23 = vsel %vm2115_vm9, %v7538_v11, 0.0 }
 0x239   : > { %v2166_v26 = vsel %vm2115_vm9, %v2138_v34, 0.0  ;;  %v2118_v40 = vadd.f32 %v2117_v52, %v2116_v23 }
 0x23a   : > { %v2069_v15 = vadd.f32 %v2050_v57, %v7337_v63 }
 0x23c   : > { %v7541_v62 = vadd.f32 %v2083_v61, %v2069_v15 }
 0x23d   : > { %v2022_v35 = vpop.f32.mrf.mxu0  ;;  %v2003_v6 = vpop.f32.mrf.mxu3 }
 0x23e   : > { %v2051_v22 = vpop.f32.mrf.mxu1  ;;  %v2023_v44 = vadd.f32 %v2022_v35, %v1993_v3  ;;  %v2142_v12 = vmul.f32 %v7541_v62, %v7541_v62  ;;  %v2167_v35 = vsel %vm2115_vm9, %v2140_v42, 0.0 }
 0x23f   : > { %v2168_v60 = vadd.f32 %v2167_v35, %v2166_v26 }
 0x240   : > { %v2052_v21 = vadd.f32 %v2051_v22, %v2023_v44  ;;  %v2119_v22 = vsel %vm2115_vm9, %v7541_v62, 0.0  ;;  %v2169_v47 = vsel %vm2115_vm9, %v2142_v12, 0.0 }
 0x241   : > { %v2120_v56 = vadd.f32 %v2119_v22, %v2118_v40 }
 0x242   : > { %v2071_v58 = vadd.f32 %v2052_v21, %v1539_v18 }
 0x244   : > { %v7546_v63 = vadd.f32 %v2083_v61, %v2071_v58 }
 0x245   : > { %v2025_v1 = vpop.f32.mrf.mxu0 }
 0x246   : > { %v2054_v16 = vpop.f32.mrf.mxu1  ;;  %v2026_v7 = vadd.f32 %v2025_v1, %v1996_v32  ;;  %v2144_v32 = vmul.f32 %v7546_v63, %v7546_v63  ;;  %v2121_v53 = vsel %vm2115_vm9, %v7546_v63, 0.0 }
 0x247   : > { %v2122_v21 = vadd.f32 %v2121_v53, %v2120_v56  ;;  %v2219_v56 = vadd.s32 128, %v7381_v4 }
 0x248   : > { %v2055_v46 = vadd.f32 %v2054_v16, %v2026_v7  ;;  %v1520_v16 = vadd.f32 %v7360_v27, %v7379_v48  ;;  %v2171_v57 = vsel %vm2115_vm9, %v2144_v32, 0.0 }
 0x249   : > { %vm2407_vm13 = vcmp.ge.s32.totalorder %v2219_v56, 136 }
 0x24a   : > { %v2073_v2 = vadd.f32 %v2055_v46, %v7353_v20  ;;  %v1549_v28 = vadd.f32 %v7421_v5, %v1520_v16 }
 0x24c   : > { %v7554_v20 = vadd.f32 %v2083_v61, %v2073_v2 }
 0x24d   : > { %v2027_v30 = vpop.f32.mrf.mxu0 }
 0x24e   : > { %v2028_v14 = vadd.f32 %v2027_v30, %v1998_v37  ;;  %v2056_v49 = vpop.f32.mrf.mxu1  ;;  %v2146_v37 = vmul.f32 %v7554_v20, %v7554_v20  ;;  %v2123_v27 = vsel %vm2115_vm9, %v7554_v20, 0.0  ;;  %v2170_v30 = vadd.f32 %v2169_v47, %v2168_v60 }
 0x24f   : > { %v2124_v46 = vadd.f32 %v2123_v27, %v2122_v21 }
 0x250   : > { %v2057_v50 = vadd.f32 %v2056_v49, %v2028_v14  ;;  %v2173_v49 = vsel %vm2115_vm9, %v2146_v37, 0.0  ;;  %v2172_v15 = vadd.f32 %v2171_v57, %v2170_v30  ;;  %v2409_v57 = vsel %vm2407_vm13, 1, %v5853_v54 }
 0x251   : > { %v2411_v27 = vadd.s32 1, %v2409_v57 }
 0x252   : > { %v2075_v41 = vadd.f32 %v2057_v50, %v1544_v25 }
 0x253   : > { %vm2413_vm14 = vcmp.eq.s32.totalorder %v7396_v39, %v2411_v27 }
 0x254   : > { %v7563_v33 = vadd.f32 %v2083_v61, %v2075_v41 }
 0x255   : > { %v2030_v24 = vpop.f32.mrf.mxu0 }
 0x256   : > { %v2031_v3 = vadd.f32 %v2030_v24, %v2001_v43  ;;  %v2059_v13 = vpop.f32.mrf.mxu1  ;;  %v2148_v48 = vmul.f32 %v7563_v33, %v7563_v33  ;;  %v2125_v19 = vsel %vm2115_vm9, %v7563_v33, 0.0  ;;  %v2174_v43 = vadd.f32 %v2173_v49, %v2172_v15 }
 0x257   : > { %v2126_v25 = vadd.f32 %v2125_v19, %v2124_v46 }
 0x258   : > { %v2060_v45 = vadd.f32 %v2059_v13, %v2031_v3  ;;  %v2175_v58 = vsel %vm2115_vm9, %v2148_v48, 0.0  ;;  %v2415_v48 = vsel %vm2413_vm14, 1.0, %v5854_v29 }
 0x259   : > { %v2176_v24 = vadd.f32 %v2175_v58, %v2174_v43  ;;  %4735 = vmatpush.msk.msra.mxu3 %vm2467_vm11, %v2415_v48 }
 0x25a   : > { %v2077_v1 = vadd.f32 %v2060_v45, %v7373_v31 }
 0x25c   : > { %v7574_v44 = vadd.f32 %v2083_v61, %v2077_v1 }
 0x25d   : > { %v2032_v31 = vpop.f32.mrf.mxu0 }
 0x25e   : > { %v2033_v7 = vadd.f32 %v2032_v31, %v2003_v6  ;;  %v2061_v14 = vpop.f32.mrf.mxu1  ;;  %v2150_v18 = vmul.f32 %v7574_v44, %v7574_v44  ;;  %v2127_v50 = vsel %vm2115_vm9, %v7574_v44, 0.0  ;;  %v2404_v6 = vsel %vm2402_vm10, 1, %v5853_v54 }
 0x25f   : > { %v2128_v41 = vadd.f32 %v2127_v50, %v2126_v25  ;;  %vm2412_vm12 = vcmp.eq.s32.totalorder %v7396_v39, %v2404_v6 }
 0x260   : > { %v2062_v59 = vadd.f32 %v2061_v14, %v2033_v7  ;;  %v2177_v2 = vsel %vm2115_vm9, %v2150_v18, 0.0  ;;  %v2414_v31 = vsel %vm2412_vm12, 1.0, %v5854_v29 }
 0x261   : > { %v2178_v34 = vadd.f32 %v2177_v2, %v2176_v24  ;;  %4733 = vmatpush.msk.msra.mxu2 %vm2467_vm11, %v2414_v31 }
 0x262   : > { %v2079_v5 = vadd.f32 %v2062_v59, %v1549_v28 }
 0x264   : > { %v7591_v42 = vadd.f32 %v2083_v61, %v2079_v5 }
 0x266   : > { %v2129_v3 = vsel %vm2115_vm9, %v7591_v42, 0.0  ;;  %v2152_v13 = vmul.f32 %v7591_v42, %v7591_v42 }
 0x267   : > { %v2130_v52 = vadd.f32 %v2129_v3, %v2128_v41 }
 0x268   : > { %v2179_v12 = vsel %vm2115_vm9, %v2152_v13, 0.0 }
 0x269   : > { %v2131_v45 = vrot.slane %v2130_v52, 4  ;;  %v2180_v23 = vadd.f32 %v2179_v12, %v2178_v34  ;;  %v2524_v12 = vld [vmem:[#allocation5] sm:$0x3] }
 0x26b   : > { %v2132_v35 = vadd.f32 %v2131_v45, %v2130_v52  ;;  %v2181_v22 = vrot.slane %v2180_v23, 4 }
 0x26d   : > { %v2133_v32 = vrot.slane %v2132_v35, 2  ;;  %v2182_v1 = vadd.f32 %v2181_v22, %v2180_v23 }
 0x26f   : > { %v2134_v61 = vadd.f32 %v2133_v32, %v2132_v35  ;;  %v2183_v16 = vrot.slane %v2182_v1, 2 }
 0x271   : > { %v2135_v26 = vrot.slane %v2134_v61, 1  ;;  %v2184_v40 = vadd.f32 %v2183_v16, %v2182_v1  ;;  %v2555_v1 = vld [vmem:[#allocation7] sm:$0x3] }
 0x273   : > { %v2185_v47 = vrot.slane %v2184_v40, 1  ;;  %v2136_v53 = vadd.f32 %v2135_v26, %v2134_v61 }
 0x275   : > { %v2186_v37 = vadd.f32 %v2185_v47, %v2184_v40  ;;  %v2569_v40 = vld [vmem:[#allocation8] sm:$0x3] }
 0x277   : > { %v2189_v60 = vsel %vm2187_vm8, %v2136_v53, %v2186_v37 }
 0x278   : > { %4732 = vmatmul.msk.f32.vlgmr.msrb.gmra.mxu3 %vm2115_vm9, %v2189_v60 }
 0x2bb   : > { %v2440_v7 = vpop.f32.mrf.mxu2 }
 0x2fb   : > { %v2460_v28 = vpop.f32.mrf.mxu3 }
 0x2fc   : > { %v2461_v4 = vadd.f32 %v2460_v28, %v2440_v7 }
 0x2fe   : > { %4734 = vmatmul.msk.f32.vlgmr.msra.gmra.mxu2 %vm2463_vm15, %v2461_v4  ;;  %4736 = vmatmul.msk.f32.vlgmr.msra.gmra.mxu3 %vm2463_vm15, %v2461_v4 }
 0x381   : > { %v2491_v30 = vpop.f32.mrf.mxu2  ;;  %v2511_v21 = vpop.f32.mrf.mxu3 }
 0x382   : > { %v2514_v14 = vmul.f32 %v2491_v30, %v2491_v30  ;;  %v2515_v49 = vmul.f32 %v2511_v21, %v2511_v21 }
 0x384   : > { %v2518_v19 = vrot.slane %v2514_v14, 7  ;;  %v2519_v18 = vrot.slane %v2515_v49, 7 }
 0x386   : > { %v2522_v54 = vsub.f32 %v2491_v30, %v2518_v19  ;;  %v2523_v59 = vsub.f32 %v2511_v21, %v2519_v18 }
 0x388   : > { %v2525_v15 = vadd.f32 1e-05, %v2522_v54  ;;  %v2526_v46 = vadd.f32 1e-05, %v2523_v59 }
 0x38a   : > { %5609 = vrsqrt.f32 %v2525_v15  ;;  %vm2533_vm2 = vweird.f32 %v2525_v15  ;;  %vm2543_vm4 = vweird.f32 %v2526_v46 }
 0x38b   : > { %5611 = vrsqrt.f32 %v2526_v46 }
 0x390   : > { %v5610_v39 = vpop.eup %5609 }
 0x391   : > { %v5612_v29 = vpop.eup %5611  ;;  %v2528_v58 = vmul.f32 %v5610_v39, %v2525_v15  ;;  %vm2534_vm0 = vweird.f32 %v5610_v39 }
 0x392   : > { %v2538_v50 = vmul.f32 %v5612_v29, %v2526_v46  ;;  %vm2544_vm1 = vweird.f32 %v5612_v29  ;;  %vm2535_vm3 = vmor %vm2533_vm2, %vm2534_vm0 }
 0x393   : > { %v2529_v5 = vmul.f32 %v5610_v39, %v2528_v58  ;;  %vm2545_vm5 = vmor %vm2543_vm4, %vm2544_vm1 }
 0x394   : > { %v2539_v43 = vmul.f32 %v5612_v29, %v2538_v50 }
 0x395   : > { %v2530_v25 = vmul.f32 0.5, %v2529_v5 }
 0x396   : > { %v2540_v2 = vmul.f32 0.5, %v2539_v43 }
 0x397   : > { %v2531_v24 = vsub.f32 1.5, %v2530_v25 }
 0x398   : > { %v2541_v41 = vsub.f32 1.5, %v2540_v2 }
 0x399   : > { %v2532_v3 = vmul.f32 %v5610_v39, %v2531_v24 }
 0x39a   : > { %v2542_v13 = vmul.f32 %v5612_v29, %v2541_v41  ;;  %v5397_v41 = vld [vmem:[%s8145_s6 + $0x20] sm:$0xff] }
 0x39b   : > { %v2536_v34 = vsel %vm2535_vm3, %v5610_v39, %v2532_v3  ;;  %v5398_v3 = vld [vmem:[%s8145_s6 + $0x28] sm:$0xff] }
 0x39c   : > { %2549 = vst [vmem:[#allocation1] sm:$0xff] %v2536_v34  ;;  %v2546_v52 = vsel %vm2545_vm5, %v5612_v29, %v2542_v13  ;;  %v5399_v13 = vld [vmem:[%s8145_s6 + $0x30] sm:$0xff]  ;;  %v5400_v34 = vld [vmem:[%s8145_s6 + $0x38] sm:$0xff] }
 0x39d   : > { %2550 = vst [vmem:[#allocation1 + $0x9] sm:$0xff] %v2546_v52  ;;  %v5401_v52 = vld [vmem:[%s8145_s6 + $0x40] sm:$0xff] }
 0x3a4   : > { %v2552_v45 = vld [vmem:[#allocation1 + $0x1] ss:$9 sm:$0xff] }
 0x3a5   : > { %v2554_v23 = vmul.f32 %v2552_v45, %v2524_v12 }
 0x3a7   : > { %v2557_v35 = vperm.slane %v2554_v23, 0  ;;  %v2558_v22 = vperm.slane %v2554_v23, 1 }
 0x3a9   : > { %v2562_v32 = vmul.f32 %v2558_v22, %v2511_v21  ;;  %v2561_v61 = vmul.f32 %v2557_v35, %v2491_v30  ;;  %v2583_v37 = vmul.f32 %v2557_v35, %v7476_v38  ;;  %v2585_v60 = vmul.f32 %v2557_v35, %v7491_v8 }
 0x3aa   : > { %v2584_v31 = vmul.f32 %v2558_v22, %v7574_v44  ;;  %v2586_v57 = vmul.f32 %v2558_v22, %v7591_v42  ;;  %v2579_v27 = vmul.f32 %v2557_v35, %v7465_v51  ;;  %v2581_v48 = vmul.f32 %v2557_v35, %v7471_v55 }
 0x3ab   : > { %v2565_v16 = vrot.slane %v2562_v32, 7  ;;  %v2580_v7 = vmul.f32 %v2558_v22, %v7554_v20  ;;  %v2582_v28 = vmul.f32 %v2558_v22, %v7563_v33  ;;  %v2575_v42 = vmul.f32 %v2557_v35, %v7446_v17 }
 0x3ac   : > { %v2577_v51 = vmul.f32 %v2557_v35, %v7456_v10  ;;  %v2576_v55 = vmul.f32 %v2558_v22, %v7541_v62  ;;  %v2578_v20 = vmul.f32 %v2558_v22, %v7546_v63  ;;  %v2571_v29 = vmul.f32 %v2557_v35, %v7444_v0  ;;  %v5393_v0 = vld [vmem:[%s8145_s6] sm:$0xff] }
 0x3ad   : > { %v2566_v26 = vsel %vm2187_vm8, %v2561_v61, %v2565_v16  ;;  %v2573_v17 = vmul.f32 %v2557_v35, %v7438_v36  ;;  %v2572_v10 = vmul.f32 %v2558_v22, %v7538_v11  ;;  %v2574_v58 = vmul.f32 %v2558_v22, %v7536_v9  ;;  %v5394_v36 = vld [vmem:[%s8145_s6 + $0x8] sm:$0xff]  ;;  %v5395_v9 = vld [vmem:[%s8145_s6 + $0x10] sm:$0xff]  ;;  %v5396_v11 = vld [vmem:[%s8145_s6 + $0x18] sm:$0xff] }
 0x3ae   : > { %v2568_v47 = vsub.f32 %v2555_v1, %v2566_v26  ;;  %vm2877_vm8 = vcmask 621572   ;;  %v5402_v61 = vld [vmem:[%s8145_s6 + $0x48] sm:$0xff] }
 0x3af   : > { %vm7671_vm9 = vmor %vm2877_vm8, %vm2419_vm7 }
 0x3b0   : > { %v2570_v53 = vmul.f32 %v2569_v40, %v2568_v47 }
 0x3b2   : > { %v2588_v56 = vperm.slane %v2570_v53, 0  ;;  %v2589_v6 = vperm.slane %v2570_v53, 1 }
 0x3b4   : > { %v2604_v4 = vadd.f32 %v2588_v56, %v2583_v37  ;;  %v2606_v30 = vadd.f32 %v2588_v56, %v2585_v60  ;;  %v2605_v21 = vadd.f32 %v2589_v6, %v2584_v31  ;;  %v2607_v38 = vadd.f32 %v2589_v6, %v2586_v57  ;;  %v5403_v60 = vld [vmem:[%s8145_s6 + $0x50] sm:$0xff] }
 0x3b5   : > { %v2600_v14 = vadd.f32 %v2588_v56, %v2579_v27  ;;  %v2602_v8 = vadd.f32 %v2588_v56, %v2581_v48  ;;  %v2601_v18 = vadd.f32 %v2589_v6, %v2580_v7  ;;  %v2603_v44 = vadd.f32 %v2589_v6, %v2582_v28 }
 0x3b6   : > { %v2614_v49 = vpack.c.bf16 %v2606_v30, %v2604_v4  ;;  %v2615_v19 = vpack.c.bf16 %v2607_v38, %v2605_v21  ;;  %v2596_v33 = vadd.f32 %v2588_v56, %v2575_v42  ;;  %v2598_v54 = vadd.f32 %v2588_v56, %v2577_v51 }
 0x3b7   : > { %v2612_v59 = vpack.c.bf16 %v2602_v8, %v2600_v14  ;;  %v2613_v15 = vpack.c.bf16 %v2603_v44, %v2601_v18  ;;  %v2597_v46 = vadd.f32 %v2589_v6, %v2576_v55  ;;  %v2599_v39 = vadd.f32 %v2589_v6, %v2578_v20 }
 0x3b8   : > { %2731 = vmatpush.bf16.msrb.mxu2 %v2614_v49  ;;  %2795 = vmatpush.bf16.msrb.mxu3 %v2615_v19  ;;  %v2610_v50 = vpack.c.bf16 %v2598_v54, %v2596_v33  ;;  %v2592_v62 = vadd.f32 %v2588_v56, %v2571_v29  ;;  %v2594_v63 = vadd.f32 %v2588_v56, %v2573_v17 }
 0x3b9   : > { %v2611_v5 = vpack.c.bf16 %v2599_v39, %v2597_v46  ;;  %v2593_v43 = vadd.f32 %v2589_v6, %v2572_v10  ;;  %v2595_v25 = vadd.f32 %v2589_v6, %v2574_v58 }
 0x3ba   : > { %v2608_v2 = vpack.c.bf16 %v2594_v63, %v2592_v62 }
 0x3bb   : > { %v2609_v24 = vpack.c.bf16 %v2595_v25, %v2593_v43 }
 0x3bc   : > { %2732 = vmatpush.bf16.msrb.mxu2 %v2612_v59  ;;  %2796 = vmatpush.bf16.msrb.mxu3 %v2613_v15 }
 0x3c0   : > { %2733 = vmatpush.bf16.msrb.mxu2 %v2610_v50  ;;  %2797 = vmatpush.bf16.msrb.mxu3 %v2611_v5 }
 0x3c4   : > { %2734 = vmatpush.bf16.msrb.mxu2 %v2608_v2  ;;  %2798 = vmatpush.bf16.msrb.mxu3 %v2609_v24 }
 0x3c7   : > { %4781 = vmatmul.msk.bf16.vlgmr.msrb.gmra.mxu2 %vm2693_vm6, %v5393_v0  ;;  %4792 = vmatmul.msk.bf16.vlgmr.msrb.gmra.mxu3 %vm2693_vm6, %v5393_v0 }
 0x3d7   : > { %4782 = vmatmul.msk.bf16.gmra.mxu2 %vm2693_vm6, %v5394_v36  ;;  %4793 = vmatmul.msk.bf16.gmra.mxu3 %vm2693_vm6, %v5394_v36 }
 0x3e7   : > { %4783 = vmatmul.msk.bf16.gmra.mxu2 %vm2693_vm6, %v5395_v9  ;;  %4794 = vmatmul.msk.bf16.gmra.mxu3 %vm2693_vm6, %v5395_v9  ;;  %v2901_v9 = vld [vmem:[#allocation11] sm:$0xff] }
 0x3f7   : > { %4784 = vmatmul.msk.bf16.gmra.mxu2 %vm2693_vm6, %v5396_v11  ;;  %4795 = vmatmul.msk.bf16.gmra.mxu3 %vm2693_vm6, %v5396_v11  ;;  %v2903_v11 = vperm.slane %v2901_v9, 0 }
 0x3f9   : > { %2919 = vst [vmem:[%s8148_s9] sm:$0xff] %v2903_v11 }
 0x3fa   : > { %2927 = vst [vmem:[%s8148_s9 + $0x40] sm:$0xff] %v2903_v11 }
 0x407   : > { %4785 = vmatmul.msk.bf16.gmra.mxu2 %vm2693_vm6, %v5397_v41  ;;  %4796 = vmatmul.msk.bf16.gmra.mxu3 %vm2693_vm6, %v5397_v41  ;;  %v2904_v41 = vperm.slane %v2901_v9, 1 }
 0x409   : > { %2920 = vst [vmem:[%s8148_s9 + $0x8] sm:$0xff] %v2904_v41 }
 0x40a   : > { %2928 = vst [vmem:[%s8148_s9 + $0x48] sm:$0xff] %v2904_v41 }
 0x417   : > { %4786 = vmatmul.msk.bf16.gmra.mxu2 %vm2693_vm6, %v5398_v3  ;;  %4797 = vmatmul.msk.bf16.gmra.mxu3 %vm2693_vm6, %v5398_v3  ;;  %v2905_v3 = vperm.slane %v2901_v9, 2 }
 0x419   : > { %2921 = vst [vmem:[%s8148_s9 + $0x10] sm:$0xff] %v2905_v3 }
 0x41a   : > { %2929 = vst [vmem:[%s8148_s9 + $0x50] sm:$0xff] %v2905_v3 }
 0x427   : > { %4787 = vmatmul.msk.bf16.gmra.mxu2 %vm2693_vm6, %v5399_v13  ;;  %4798 = vmatmul.msk.bf16.gmra.mxu3 %vm2693_vm6, %v5399_v13  ;;  %v2906_v13 = vperm.slane %v2901_v9, 3 }
 0x429   : > { %2922 = vst [vmem:[%s8148_s9 + $0x18] sm:$0xff] %v2906_v13 }
 0x42a   : > { %2930 = vst [vmem:[%s8148_s9 + $0x58] sm:$0xff] %v2906_v13 }
 0x437   : > { %4788 = vmatmul.msk.bf16.gmra.mxu2 %vm2693_vm6, %v5400_v34  ;;  %4799 = vmatmul.msk.bf16.gmra.mxu3 %vm2693_vm6, %v5400_v34  ;;  %v2907_v34 = vperm.slane %v2901_v9, 4 }
 0x439   : > { %2923 = vst [vmem:[%s8148_s9 + $0x20] sm:$0xff] %v2907_v34 }
 0x43a   : > { %2931 = vst [vmem:[%s8148_s9 + $0x60] sm:$0xff] %v2907_v34 }
 0x447   : > { %4789 = vmatmul.msk.bf16.gmra.mxu2 %vm2693_vm6, %v5401_v52  ;;  %4800 = vmatmul.msk.bf16.gmra.mxu3 %vm2693_vm6, %v5401_v52 }
 0x44a   : > { %v2736_v45 = vpop.f32.mrf.mxu2  ;;  %v2800_v23 = vpop.f32.mrf.mxu3 }
 0x44b   : > { %v2855_v35 = vpack.c.bf16 %v2800_v23, %v2736_v45  ;;  %v2908_v23 = vperm.slane %v2901_v9, 5 }
 0x44d   : > { %2879 = vst.msk [vmem:[#allocation2] sm:$0xff] %vm7671_vm9, %v2855_v35 }
 0x44e   : > { %2924 = vst [vmem:[%s8148_s9 + $0x28] sm:$0xff] %v2908_v23 }
 0x44f   : > { %2932 = vst [vmem:[%s8148_s9 + $0x68] sm:$0xff] %v2908_v23 }
 0x452   : > { %v2738_v22 = vpop.f32.mrf.mxu2  ;;  %v2802_v32 = vpop.f32.mrf.mxu3 }
 0x453   : > { %v2856_v1 = vpack.c.bf16 %v2802_v32, %v2738_v22  ;;  %v2909_v22 = vperm.slane %v2901_v9, 6  ;;  %v2910_v32 = vperm.slane %v2901_v9, 7 }
 0x455   : > { %2880 = vst.msk [vmem:[#allocation2 + $0x8] sm:$0xff] %vm7671_vm9, %v2856_v1 }
 0x456   : > { %2925 = vst [vmem:[%s8148_s9 + $0x30] sm:$0xff] %v2909_v22 }
 0x457   : > { %4790 = vmatmul.msk.bf16.gmra.mxu2 %vm2693_vm6, %v5402_v61  ;;  %4801 = vmatmul.msk.bf16.gmra.mxu3 %vm2693_vm6, %v5402_v61  ;;  %2926 = vst [vmem:[%s8148_s9 + $0x38] sm:$0xff] %v2910_v32 }
 0x458   : > { %2933 = vst [vmem:[%s8148_s9 + $0x70] sm:$0xff] %v2909_v22 }
 0x459   : > { %2934 = vst [vmem:[%s8148_s9 + $0x78] sm:$0xff] %v2910_v32 }
 0x45a   : > { %v2741_v16 = vpop.f32.mrf.mxu2  ;;  %v2805_v26 = vpop.f32.mrf.mxu3 }
 0x45b   : > { %v2857_v40 = vpack.c.bf16 %v2805_v26, %v2741_v16 }
 0x45d   : > { %2881 = vst.msk [vmem:[#allocation2 + $0x10] sm:$0xff] %vm7671_vm9, %v2857_v40 }
 0x462   : > { %v2743_v47 = vpop.f32.mrf.mxu2  ;;  %v2807_v53 = vpop.f32.mrf.mxu3 }
 0x463   : > { %v2858_v37 = vpack.c.bf16 %v2807_v53, %v2743_v47 }
 0x465   : > { %2882 = vst.msk [vmem:[#allocation2 + $0x18] sm:$0xff] %vm7671_vm9, %v2858_v37 }
 0x467   : > { %4791 = vmatmul.msk.bf16.gmra.mxu2 %vm2693_vm6, %v5403_v60  ;;  %4802 = vmatmul.msk.bf16.gmra.mxu3 %vm2693_vm6, %v5403_v60 }
 0x46a   : > { %v2746_v56 = vpop.f32.mrf.mxu2  ;;  %v2810_v6 = vpop.f32.mrf.mxu3 }
 0x46b   : > { %v2859_v31 = vpack.c.bf16 %v2810_v6, %v2746_v56 }
 0x46d   : > { %2883 = vst.msk [vmem:[#allocation2 + $0x20] sm:$0xff] %vm7671_vm9, %v2859_v31 }
 0x472   : > { %v2748_v57 = vpop.f32.mrf.mxu2  ;;  %v2812_v27 = vpop.f32.mrf.mxu3 }
 0x473   : > { %v2860_v48 = vpack.c.bf16 %v2812_v27, %v2748_v57 }
 0x475   : > { %2884 = vst.msk [vmem:[#allocation2 + $0x28] sm:$0xff] %vm7671_vm9, %v2860_v48 }
 0x47a   : > { %v2751_v7 = vpop.f32.mrf.mxu2  ;;  %v2815_v28 = vpop.f32.mrf.mxu3 }
 0x47b   : > { %v2861_v4 = vpack.c.bf16 %v2815_v28, %v2751_v7 }
 0x47d   : > { %2885 = vst.msk [vmem:[#allocation2 + $0x30] sm:$0xff] %vm7671_vm9, %v2861_v4 }
 0x482   : > { %v2753_v30 = vpop.f32.mrf.mxu2  ;;  %v2817_v21 = vpop.f32.mrf.mxu3 }
 0x483   : > { %v2862_v38 = vpack.c.bf16 %v2817_v21, %v2753_v30 }
 0x485   : > { %2886 = vst.msk [vmem:[#allocation2 + $0x38] sm:$0xff] %vm7671_vm9, %v2862_v38 }
 0x48a   : > { %v2756_v14 = vpop.f32.mrf.mxu2  ;;  %v2820_v8 = vpop.f32.mrf.mxu3 }
 0x48b   : > { %v2863_v49 = vpack.c.bf16 %v2820_v8, %v2756_v14 }
 0x48d   : > { %2887 = vst.msk [vmem:[#allocation2 + $0x40] sm:$0xff] %vm7671_vm9, %v2863_v49 }
 0x492   : > { %v2758_v19 = vpop.f32.mrf.mxu2  ;;  %v2822_v18 = vpop.f32.mrf.mxu3 }
 0x493   : > { %v2864_v44 = vpack.c.bf16 %v2822_v18, %v2758_v19 }
 0x495   : > { %2888 = vst.msk [vmem:[#allocation2 + $0x48] sm:$0xff] %vm7671_vm9, %v2864_v44 }
 0x49a   : > { %v2761_v42 = vpop.f32.mrf.mxu2  ;;  %v2825_v51 = vpop.f32.mrf.mxu3 }
 0x49b   : > { %v2865_v55 = vpack.c.bf16 %v2825_v51, %v2761_v42 }
 0x49d   : > { %2889 = vst.msk [vmem:[#allocation2 + $0x50] sm:$0xff] %vm7671_vm9, %v2865_v55 }
 0x4a2   : > { %v2763_v20 = vpop.f32.mrf.mxu2  ;;  %v2827_v33 = vpop.f32.mrf.mxu3 }
 0x4a3   : > { %v2866_v54 = vpack.c.bf16 %v2827_v33, %v2763_v20 }
 0x4a5   : > { %2890 = vst.msk [vmem:[#allocation2 + $0x58] sm:$0xff] %vm7671_vm9, %v2866_v54 }
 0x4aa   : > { %v2766_v59 = vpop.f32.mrf.mxu2  ;;  %v2830_v15 = vpop.f32.mrf.mxu3 }
 0x4ab   : > { %v2867_v46 = vpack.c.bf16 %v2830_v15, %v2766_v59 }
 0x4ad   : > { %2891 = vst.msk [vmem:[#allocation2 + $0x60] sm:$0xff] %vm7671_vm9, %v2867_v46 }
 0x4b2   : > { %v2768_v39 = vpop.f32.mrf.mxu2  ;;  %v2832_v29 = vpop.f32.mrf.mxu3 }
 0x4b3   : > { %v2868_v17 = vpack.c.bf16 %v2832_v29, %v2768_v39 }
 0x4b5   : > { %2892 = vst.msk [vmem:[#allocation2 + $0x68] sm:$0xff] %vm7671_vm9, %v2868_v17 }
 0x4ba   : > { %v2771_v10 = vpop.f32.mrf.mxu2  ;;  %v2835_v58 = vpop.f32.mrf.mxu3 }
 0x4bb   : > { %v2869_v50 = vpack.c.bf16 %v2835_v58, %v2771_v10 }
 0x4bd   : > { %2893 = vst.msk [vmem:[#allocation2 + $0x70] sm:$0xff] %vm7671_vm9, %v2869_v50 }
 0x4c2   : > { %v2773_v62 = vpop.f32.mrf.mxu2  ;;  %v2837_v5 = vpop.f32.mrf.mxu3 }
 0x4c3   : > { %v2870_v63 = vpack.c.bf16 %v2837_v5, %v2773_v62 }
 0x4c5   : > { %2894 = vst.msk [vmem:[#allocation2 + $0x78] sm:$0xff] %vm7671_vm9, %v2870_v63 }
 0x4ca   : > { %v2776_v43 = vpop.f32.mrf.mxu2  ;;  %v2840_v25 = vpop.f32.mrf.mxu3 }
 0x4cb   : > { %v2871_v2 = vpack.c.bf16 %v2840_v25, %v2776_v43 }
 0x4cd   : > { %2895 = vst.msk [vmem:[#allocation2 + $0x80] sm:$0xff] %vm7671_vm9, %v2871_v2 }
 0x4d2   : > { %v2778_v24 = vpop.f32.mrf.mxu2  ;;  %v2842_v0 = vpop.f32.mrf.mxu3 }
 0x4d3   : > { %v2872_v36 = vpack.c.bf16 %v2842_v0, %v2778_v24 }
 0x4d5   : > { %2896 = vst.msk [vmem:[#allocation2 + $0x88] sm:$0xff] %vm7671_vm9, %v2872_v36 }
 0x4da   : > { %v2781_v52 = vpop.f32.mrf.mxu2  ;;  %v2845_v45 = vpop.f32.mrf.mxu3 }
 0x4db   : > { %v2873_v35 = vpack.c.bf16 %v2845_v45, %v2781_v52 }
 0x4dd   : > { %2897 = vst.msk [vmem:[#allocation2 + $0x90] sm:$0xff] %vm7671_vm9, %v2873_v35 }
 0x4e2   : > { %v2783_v1 = vpop.f32.mrf.mxu2  ;;  %v2847_v61 = vpop.f32.mrf.mxu3 }
 0x4e3   : > { %v2874_v16 = vpack.c.bf16 %v2847_v61, %v2783_v1 }
 0x4e5   : > { %2898 = vst.msk [vmem:[#allocation2 + $0x98] sm:$0xff] %vm7671_vm9, %v2874_v16 }
 0x4ea   : > { %v2786_v26 = vpop.f32.mrf.mxu2  ;;  %v2850_v40 = vpop.f32.mrf.mxu3 }
 0x4eb   : > { %v2875_v47 = vpack.c.bf16 %v2850_v40, %v2786_v26 }
 0x4ed   : > { %2899 = vst.msk [vmem:[#allocation2 + $0xa0] sm:$0xff] %vm7671_vm9, %v2875_v47 }
 0x4f2   : > { %v2788_v53 = vpop.f32.mrf.mxu2  ;;  %v2852_v37 = vpop.f32.mrf.mxu3 }
 0x4f3   : > { %v2876_v60 = vpack.c.bf16 %v2852_v37, %v2788_v53 }
 0x4f5   : > { %2900 = vst.msk [vmem:[#allocation2 + $0xa8] sm:$0xff] %vm7671_vm9, %v2876_v60 }
 0x4f6 PF: > { %v5463_v56 = vld [vmem:[%s6023_s22 + $0x1c4] sm:$0xf]  ;;  %vm3588_vm7 = vcmask 1045504   ;;  %v5200_v27 = vld [vmem:[%s6023_s22 + $0x300] sm:$0xf]  ;;  %s4803_s26 = sshll.u32 %s5924_s13, 4 }
 0x4f7   : > { %v5042_v6 = vld [vmem:[%s6023_s22 + $0x1e0] sm:$0xf0]  ;;  %v5507_v7 = vld [vmem:[%s6023_s22 + $0x31c] sm:$0x30]  ;;  %v5208_v45 = vld [vmem:[%s6023_s22 + $0x308] sm:$0xf] }
 0x4f8   : > { %v5503_v31 = vld [vmem:[%s6023_s22 + $0x304] sm:$0xf]  ;;  %v5045_v57 = vor.u32 %v5463_v56, %v5042_v6  ;;  %v5201_v30 = vor.u32 %v5507_v7, %v5200_v27  ;;  %v5040_v8 = vld [vmem:[%s6023_s22 + $0x1c0] sm:$0xf]  ;;  %v5508_v32 = vld [vmem:[%s6023_s22 + $0x324] sm:$0x30] }
 0x4f9   : > { %v5202_v12 = vld [vmem:[%s6023_s22 + $0x320] sm:$0x30]  ;;  %v5467_v19 = vld [vmem:[%s6023_s22 + $0x1dc] sm:$0xf0]  ;;  %v5209_v40 = vor.u32 %v5508_v32, %v5208_v45  ;;  %v5048_v47 = vld [vmem:[%s6023_s22 + $0x1c8] sm:$0xf] }
 0x4fa   : > { %v5205_v48 = vor.u32 %v5503_v31, %v5202_v12  ;;  %v5455_v28 = vld [vmem:[%s6023_s22 + $0x184] sm:$0xf]  ;;  %3641 = vmatpush.bf16.msra.mxu2 %v5045_v57  ;;  %v5168_v18 = vld [vmem:[%s6023_s22 + $0x2c0] sm:$0xf]  ;;  %v3590_v44 = vsel %vm3588_vm7, %v5201_v30, 0  ;;  %v5041_v51 = vor.u32 %v5467_v19, %v5040_v8  ;;  %s7835_s28 = scalar_lea.vmem [#allocation2], %s4803_s26 }
 0x4fb   : > { %v5010_v4 = vld [vmem:[%s6023_s22 + $0x1a0] sm:$0xf0]  ;;  %v5499_v55 = vld [vmem:[%s6023_s22 + $0x2dc] sm:$0xf0]  ;;  %3630 = vmatpush.bf16.msra.mxu1 %v3590_v44  ;;  %v5468_v53 = vld [vmem:[%s6023_s22 + $0x1e4] sm:$0xf0] }
 0x4fc   : > { %v5013_v21 = vor.u32 %v5455_v28, %v5010_v4  ;;  %v5495_v38 = vld [vmem:[%s6023_s22 + $0x2c4] sm:$0xf]  ;;  %v3593_v49 = vsel %vm3588_vm7, %v5205_v48, 0  ;;  %v5169_v33 = vor.u32 %v5499_v55, %v5168_v18  ;;  %3613 = vmatpush.bf16.msra.mxu0 %v5041_v51  ;;  %v5008_v39 = vld [vmem:[%s6023_s22 + $0x180] sm:$0xf]  ;;  %v3596_v12 = vsel %vm3588_vm7, %v5209_v40, 0 }
 0x4fd   : > { %v5170_v14 = vld [vmem:[%s6023_s22 + $0x2e0] sm:$0xf0]  ;;  %3658 = vmatpush.bf16.msra.mxu3 %v3593_v49  ;;  %v5459_v29 = vld [vmem:[%s6023_s22 + $0x19c] sm:$0xf0]  ;;  %v5176_v27 = vld [vmem:[%s6023_s22 + $0x2c8] sm:$0xf]  ;;  %v5049_v7 = vor.u32 %v5468_v53, %v5048_v47 }
 0x4fe   : > { %v5173_v42 = vor.u32 %v5495_v38, %v5170_v14  ;;  %v5447_v20 = vld [vmem:[%s6023_s22 + $0x144] sm:$0xf]  ;;  %3642 = vmatpush.bf16.msra.mxu2 %v5013_v21  ;;  %v5136_v17 = vld [vmem:[%s6023_s22 + $0x280] sm:$0xf]  ;;  %v5009_v10 = vor.u32 %v5459_v29, %v5008_v39  ;;  %v5500_v48 = vld [vmem:[%s6023_s22 + $0x2e4] sm:$0xf0] }
 0x4ff   : > { %v4978_v54 = vld [vmem:[%s6023_s22 + $0x160] sm:$0xf0]  ;;  %v5491_v58 = vld [vmem:[%s6023_s22 + $0x29c] sm:$0xf0]  ;;  %3631 = vmatpush.bf16.msra.mxu1 %v5169_v33  ;;  %v5016_v4 = vld [vmem:[%s6023_s22 + $0x188] sm:$0xf] }
 0x500   : > { %v5487_v59 = vld [vmem:[%s6023_s22 + $0x284] sm:$0xf]  ;;  %v4981_v46 = vor.u32 %v5447_v20, %v4978_v54  ;;  %v4976_v63 = vld [vmem:[%s6023_s22 + $0x140] sm:$0xf]  ;;  %v5137_v43 = vor.u32 %v5491_v58, %v5136_v17  ;;  %3614 = vmatpush.bf16.msra.mxu0 %v5009_v10  ;;  %v5460_v30 = vld [vmem:[%s6023_s22 + $0x1a4] sm:$0xf0] }
 0x501   : > { %v5138_v15 = vld [vmem:[%s6023_s22 + $0x2a0] sm:$0xf0]  ;;  %3659 = vmatpush.bf16.msra.mxu3 %v5173_v42  ;;  %v5451_v24 = vld [vmem:[%s6023_s22 + $0x15c] sm:$0xf0]  ;;  %v4810_v49 = vld [vmem:[%s7835_s28 + $0x8] sm:$0xf0]  ;;  %v5177_v42 = vor.u32 %v5500_v48, %v5176_v27  ;;  %v5017_v20 = vor.u32 %v5460_v30, %v5016_v4 }
 0x502   : > { %v5439_v50 = vld [vmem:[%s6023_s22 + $0x104] sm:$0xf]  ;;  %v5141_v5 = vor.u32 %v5487_v59, %v5138_v15  ;;  %3643 = vmatpush.bf16.msra.mxu2 %v4981_v46  ;;  %v4977_v36 = vor.u32 %v5451_v24, %v4976_v63  ;;  %v5104_v9 = vld [vmem:[%s6023_s22 + $0x240] sm:$0xf]  ;;  %vm3584_vm10 = vcmask 621568  }
 0x503   : > { %v4946_v62 = vld [vmem:[%s6023_s22 + $0x120] sm:$0xf0]  ;;  %v5483_v11 = vld [vmem:[%s6023_s22 + $0x25c] sm:$0xf0]  ;;  %3632 = vmatpush.bf16.msra.mxu1 %v5137_v43  ;;  %v5504_v51 = vld [vmem:[%s6023_s22 + $0x30c] sm:$0xf] }
 0x504   : > { %v5479_v25 = vld [vmem:[%s6023_s22 + $0x244] sm:$0xf]  ;;  %v4949_v0 = vor.u32 %v5439_v50, %v4946_v62  ;;  %v4944_v13 = vld [vmem:[%s6023_s22 + $0x100] sm:$0xf]  ;;  %v5105_v23 = vor.u32 %v5483_v11, %v5104_v9  ;;  %3615 = vmatpush.bf16.msra.mxu0 %v4977_v36  ;;  %v5210_v55 = vld [vmem:[%s6023_s22 + $0x328] sm:$0x30] }
 0x505   : > { %v5106_v2 = vld [vmem:[%s6023_s22 + $0x260] sm:$0xf0]  ;;  %v5443_v34 = vld [vmem:[%s6023_s22 + $0x11c] sm:$0xf0]  ;;  %3660 = vmatpush.bf16.msra.mxu3 %v5141_v5  ;;  %v5144_v54 = vld [vmem:[%s6023_s22 + $0x288] sm:$0xf]  ;;  %v5213_v10 = vor.u32 %v5504_v51, %v5210_v55 }
 0x506   : > { %v5431_v41 = vld [vmem:[%s6023_s22 + $0xc4] sm:$0xf]  ;;  %v5109_v52 = vor.u32 %v5479_v25, %v5106_v2  ;;  %3644 = vmatpush.bf16.msra.mxu2 %v4949_v0  ;;  %v4945_v61 = vor.u32 %v5443_v34, %v4944_v13  ;;  %v5072_v16 = vld [vmem:[%s6023_s22 + $0x200] sm:$0xf]  ;;  %v5492_v59 = vld [vmem:[%s6023_s22 + $0x2a4] sm:$0xf0] }
 0x507   : > { %v4914_v3 = vld [vmem:[%s6023_s22 + $0xe0] sm:$0xf0]  ;;  %v5475_v26 = vld [vmem:[%s6023_s22 + $0x21c] sm:$0xf0]  ;;  %3633 = vmatpush.bf16.msra.mxu1 %v5105_v23  ;;  %v4984_v15 = vld [vmem:[%s6023_s22 + $0x148] sm:$0xf]  ;;  %v5145_v62 = vor.u32 %v5492_v59, %v5144_v54 }
 0x508   : > { %v5471_v35 = vld [vmem:[%s6023_s22 + $0x204] sm:$0xf]  ;;  %v4917_v1 = vor.u32 %v5431_v41, %v4914_v3  ;;  %v4912_v6 = vld [vmem:[%s6023_s22 + $0xc0] sm:$0xf]  ;;  %v5073_v57 = vor.u32 %v5475_v26, %v5072_v16  ;;  %3616 = vmatpush.bf16.msra.mxu0 %v4945_v61  ;;  %v5452_v39 = vld [vmem:[%s6023_s22 + $0x164] sm:$0xf0] }
 0x509   : > { %v5074_v22 = vld [vmem:[%s6023_s22 + $0x220] sm:$0xf0]  ;;  %3661 = vmatpush.bf16.msra.mxu3 %v5109_v52  ;;  %v5435_v31 = vld [vmem:[%s6023_s22 + $0xdc] sm:$0xf0]  ;;  %v5112_v5 = vld [vmem:[%s6023_s22 + $0x248] sm:$0xf]  ;;  %v4985_v43 = vor.u32 %v5452_v39, %v4984_v15 }
 0x50a   : > { %v5423_v37 = vld [vmem:[%s6023_s22 + $0x84] sm:$0xf]  ;;  %v5077_v56 = vor.u32 %v5471_v35, %v5074_v22  ;;  %3645 = vmatpush.bf16.msra.mxu2 %v4917_v1  ;;  %v4913_v38 = vor.u32 %v5435_v31, %v4912_v6  ;;  %v4880_v19 = vld [vmem:[%s6023_s22 + $0x80] sm:$0xf]  ;;  %v5484_v63 = vld [vmem:[%s6023_s22 + $0x264] sm:$0xf0] }
 0x50b   : > { %v4882_v60 = vld [vmem:[%s6023_s22 + $0xa0] sm:$0xf0]  ;;  %v5427_v18 = vld [vmem:[%s6023_s22 + $0x9c] sm:$0xf0]  ;;  %3634 = vmatpush.bf16.msra.mxu1 %v5073_v57  ;;  %v5406_v24 = vld [vmem:[%s7835_s28 + $0x4] sm:$0xf0]  ;;  %v5113_v52 = vor.u32 %v5484_v63, %v5112_v5 }
 0x50c   : > { %v4885_v28 = vor.u32 %v5423_v37, %v4882_v60  ;;  %v5415_v21 = vld [vmem:[%s6023_s22 + $0x44] sm:$0xf]  ;;  %3617 = vmatpush.bf16.msra.mxu0 %v4913_v38  ;;  %v4881_v46 = vor.u32 %v5427_v18, %v4880_v19  ;;  %v4848_v58 = vld [vmem:[%s6023_s22 + $0x40] sm:$0xf]  ;;  %v4952_v0 = vld [vmem:[%s6023_s22 + $0x108] sm:$0xf] }
 0x50d   : > { %v4850_v14 = vld [vmem:[%s6023_s22 + $0x60] sm:$0xf0]  ;;  %3662 = vmatpush.bf16.msra.mxu3 %v5077_v56  ;;  %v5419_v50 = vld [vmem:[%s6023_s22 + $0x5c] sm:$0xf0]  ;;  %v3599_v36 = vsel %vm3588_vm7, %v5213_v10, 0 }
 0x50e   : > { %v5405_v8 = vld [vmem:[%s7835_s28 + $0x4] sm:$0xf]  ;;  %3646 = vmatpush.bf16.msra.mxu2 %v4885_v28  ;;  %v4853_v33 = vor.u32 %v5415_v21, %v4850_v14  ;;  %v4808_v2 = vld [vmem:[%s7835_s28] sm:$0xf]  ;;  %v4849_v9 = vor.u32 %v5419_v50, %v4848_v58  ;;  %v5444_v11 = vld [vmem:[%s6023_s22 + $0x124] sm:$0xf0] }
 0x50f   : > { %v7841_v44 = vor.u32 %v5405_v8, %v4810_v49  ;;  %3669 = vmatpush.bf16.msrb.mxu1 %v5049_v7  ;;  %v5407_v29 = vld [vmem:[%s6023_s22 + $0x4] sm:$0xf]  ;;  %v5496_v41 = vld [vmem:[%s6023_s22 + $0x2cc] sm:$0xf]  ;;  %v4816_v13 = vld [vmem:[%s6023_s22] sm:$0xf]  ;;  %v7868_v45 = vor.u32 %v5406_v24, %v4808_v2  ;;  %v4953_v22 = vor.u32 %v5444_v11, %v4952_v0 }
 0x510   : > { %v4818_v17 = vld [vmem:[%s6023_s22 + $0x20] sm:$0xf0]  ;;  %3618 = vmatpush.bf16.msra.mxu0 %v4881_v46  ;;  %v5178_v3 = vld [vmem:[%s6023_s22 + $0x2e8] sm:$0xf0]  ;;  %v5411_v34 = vld [vmem:[%s6023_s22 + $0x1c] sm:$0xf0] }
 0x511   : > { %3686 = vmatpush.bf16.msrb.mxu3 %v3596_v12  ;;  %5230 = vmatmul.msk.bf16.vlgmr.msra.gmra.mxu1 %vm3584_vm10, %v7841_v44  ;;  %v4821_v25 = vor.u32 %v5407_v29, %v4818_v17  ;;  %v5464_v23 = vld [vmem:[%s6023_s22 + $0x1cc] sm:$0xf]  ;;  %v5080_v32 = vld [vmem:[%s6023_s22 + $0x208] sm:$0xf]  ;;  %v5181_v16 = vor.u32 %v5496_v41, %v5178_v3  ;;  %v4817_v26 = vor.u32 %v5411_v34, %v4816_v13  ;;  %v5056_v47 = vld [vmem:[%s6023_s22 + $0x1d0] sm:$0xf] }
 0x512   : > { %5231 = vmatmul.msk.bf16.vlgmr.msra.gmra.mxu3 %vm3584_vm10, %v7841_v44  ;;  %3647 = vmatpush.bf16.msra.mxu2 %v4853_v33  ;;  %v5050_v35 = vld [vmem:[%s6023_s22 + $0x1e8] sm:$0xf0]  ;;  %v5476_v1 = vld [vmem:[%s6023_s22 + $0x224] sm:$0xf0]  ;;  %v5469_v53 = vld [vmem:[%s6023_s22 + $0x1ec] sm:$0xf0] }
 0x513   : > { %3670 = vmatpush.bf16.msrb.mxu1 %v5017_v20  ;;  %v4920_v61 = vld [vmem:[%s6023_s22 + $0xc8] sm:$0xf]  ;;  %v5053_v37 = vor.u32 %v5464_v23, %v5050_v35  ;;  %v5488_v60 = vld [vmem:[%s6023_s22 + $0x28c] sm:$0xf]  ;;  %v5081_v6 = vor.u32 %v5476_v1, %v5080_v32  ;;  %v5057_v27 = vor.u32 %v5469_v53, %v5056_v47  ;;  %v5024_v4 = vld [vmem:[%s6023_s22 + $0x190] sm:$0xf] }
 0x514   : > { %3619 = vmatpush.bf16.msra.mxu0 %v4849_v9  ;;  %v5436_v40 = vld [vmem:[%s6023_s22 + $0xe4] sm:$0xf0]  ;;  %v5146_v56 = vld [vmem:[%s6023_s22 + $0x2a8] sm:$0xf0]  ;;  %v5461_v30 = vld [vmem:[%s6023_s22 + $0x1ac] sm:$0xf0] }
 0x515   : > { %3687 = vmatpush.bf16.msrb.mxu3 %v5177_v42  ;;  %v5456_v31 = vld [vmem:[%s6023_s22 + $0x18c] sm:$0xf]  ;;  %v4921_v12 = vor.u32 %v5436_v40, %v4920_v61  ;;  %v4888_v48 = vld [vmem:[%s6023_s22 + $0x88] sm:$0xf]  ;;  %v5149_v7 = vor.u32 %v5488_v60, %v5146_v56  ;;  %v5025_v18 = vor.u32 %v5461_v30, %v5024_v4  ;;  %v4992_v55 = vld [vmem:[%s6023_s22 + $0x150] sm:$0xf] }
 0x516   : > { %3648 = vmatpush.bf16.msra.mxu2 %v4821_v25  ;;  %v5018_v57 = vld [vmem:[%s6023_s22 + $0x1a8] sm:$0xf0]  ;;  %v5428_v28 = vld [vmem:[%s6023_s22 + $0xa4] sm:$0xf0]  ;;  %v5453_v33 = vld [vmem:[%s6023_s22 + $0x16c] sm:$0xf0] }
 0x517   : > { %3671 = vmatpush.bf16.msrb.mxu1 %v4985_v43  ;;  %v5021_v21 = vor.u32 %v5456_v31, %v5018_v57  ;;  %v5480_v38 = vld [vmem:[%s6023_s22 + $0x24c] sm:$0xf]  ;;  %v4889_v19 = vor.u32 %v5428_v28, %v4888_v48  ;;  %v4856_v42 = vld [vmem:[%s6023_s22 + $0x48] sm:$0xf]  ;;  %v5465_v46 = vld [vmem:[%s6023_s22 + $0x1d4] sm:$0xf] }
 0x518   : > { %3620 = vmatpush.bf16.msra.mxu0 %v4817_v26  ;;  %v5114_v14 = vld [vmem:[%s6023_s22 + $0x268] sm:$0xf0]  ;;  %v5420_v51 = vld [vmem:[%s6023_s22 + $0x64] sm:$0xf0]  ;;  %v5216_v39 = vld [vmem:[%s6023_s22 + $0x310] sm:$0xf] }
 0x519   : > { %3688 = vmatpush.bf16.msrb.mxu3 %v5145_v62  ;;  %3649 = vmatmul.bf16.vlgmr.msra.gmra.mxu2 %v7868_v45  ;;  %v5448_v8 = vld [vmem:[%s6023_s22 + $0x14c] sm:$0xf]  ;;  %v5117_v20 = vor.u32 %v5480_v38, %v5114_v14  ;;  %v5509_v29 = vld [vmem:[%s6023_s22 + $0x32c] sm:$0x30]  ;;  %v5058_v17 = vld [vmem:[%s6023_s22 + $0x1f0] sm:$0xf0]  ;;  %v4857_v50 = vor.u32 %v5420_v51, %v4856_v42  ;;  %v4993_v62 = vor.u32 %v5453_v33, %v4992_v55 }
 0x51a   : > { %3714 = vmatpush.bf16.msrb.mxu2 %v3599_v36  ;;  %v4986_v49 = vld [vmem:[%s6023_s22 + $0x168] sm:$0xf0]  ;;  %v4824_v5 = vld [vmem:[%s6023_s22 + $0x8] sm:$0xf]  ;;  %v4960_v25 = vld [vmem:[%s6023_s22 + $0x110] sm:$0xf]  ;;  %v5217_v24 = vor.u32 %v5509_v29, %v5216_v39  ;;  %v5061_v0 = vor.u32 %v5465_v46, %v5058_v17 }
 0x51b   : > { %3672 = vmatpush.bf16.msrb.mxu1 %v4953_v22  ;;  %v5472_v54 = vld [vmem:[%s6023_s22 + $0x20c] sm:$0xf]  ;;  %3621 = vmatmul.bf16.vlgmr.msra.gmra.mxu0 %v7868_v45  ;;  %v4989_v15 = vor.u32 %v5448_v8, %v4986_v49  ;;  %v5412_v43 = vld [vmem:[%s6023_s22 + $0x24] sm:$0xf0]  ;;  %v5445_v2 = vld [vmem:[%s6023_s22 + $0x12c] sm:$0xf0] }
 0x51c   : > { %3697 = vmatpush.bf16.msrb.mxu0 %v5053_v37  ;;  %v5082_v59 = vld [vmem:[%s6023_s22 + $0x228] sm:$0xf0]  ;;  %v5457_v9 = vld [vmem:[%s6023_s22 + $0x194] sm:$0xf]  ;;  %v4825_v13 = vor.u32 %v5412_v43, %v4824_v5  ;;  %v4961_v34 = vor.u32 %v5445_v2, %v4960_v25  ;;  %v4928_v23 = vld [vmem:[%s6023_s22 + $0xd0] sm:$0xf] }
 0x51d   : > { %3689 = vmatpush.bf16.msrb.mxu3 %v5113_v52  ;;  %v5440_v10 = vld [vmem:[%s6023_s22 + $0x10c] sm:$0xf]  ;;  %v5085_v63 = vor.u32 %v5472_v54, %v5082_v59  ;;  %v5026_v11 = vld [vmem:[%s6023_s22 + $0x1b0] sm:$0xf0]  ;;  %v3602_v52 = vsel %vm3588_vm7, %v5217_v24, 0 }
 0x51e   : > { %3715 = vmatpush.bf16.msrb.mxu2 %v5181_v16  ;;  %v4954_v58 = vld [vmem:[%s6023_s22 + $0x128] sm:$0xf0]  ;;  %v5437_v35 = vld [vmem:[%s6023_s22 + $0xec] sm:$0xf0]  ;;  %v5029_v22 = vor.u32 %v5457_v9, %v5026_v11  ;;  %v5449_v16 = vld [vmem:[%s6023_s22 + $0x154] sm:$0xf] }
 0x51f   : > { %3673 = vmatpush.bf16.msrb.mxu1 %v4921_v12  ;;  %v4957_v36 = vor.u32 %v5440_v10, %v4954_v58  ;;  %v5432_v41 = vld [vmem:[%s6023_s22 + $0xcc] sm:$0xf]  ;;  %v5184_v1 = vld [vmem:[%s6023_s22 + $0x2d0] sm:$0xf]  ;;  %v4994_v26 = vld [vmem:[%s6023_s22 + $0x170] sm:$0xf0]  ;;  %v4929_v53 = vor.u32 %v5437_v35, %v4928_v23 }
 0x520   : > { %3698 = vmatpush.bf16.msrb.mxu0 %v5021_v21  ;;  %v4922_v3 = vld [vmem:[%s6023_s22 + $0xe8] sm:$0xf0]  ;;  %v5501_v61 = vld [vmem:[%s6023_s22 + $0x2ec] sm:$0xf0]  ;;  %v4962_v48 = vld [vmem:[%s6023_s22 + $0x130] sm:$0xf0] }
 0x521   : > { %3690 = vmatpush.bf16.msrb.mxu3 %v5081_v6  ;;  %v4925_v32 = vor.u32 %v5432_v41, %v4922_v3  ;;  %v5424_v40 = vld [vmem:[%s6023_s22 + $0x8c] sm:$0xf]  ;;  %v5185_v37 = vor.u32 %v5501_v61, %v5184_v1  ;;  %v4896_v60 = vld [vmem:[%s6023_s22 + $0x90] sm:$0xf]  ;;  %v4997_v6 = vor.u32 %v5449_v16, %v4994_v26  ;;  %v4930_v42 = vld [vmem:[%s6023_s22 + $0xf0] sm:$0xf0] }
 0x522   : > { %3716 = vmatpush.bf16.msrb.mxu2 %v5149_v7  ;;  %v4890_v47 = vld [vmem:[%s6023_s22 + $0xa8] sm:$0xf0]  ;;  %v5429_v56 = vld [vmem:[%s6023_s22 + $0xac] sm:$0xf0]  ;;  %v5218_v33 = vld [vmem:[%s6023_s22 + $0x330] sm:$0x30] }
 0x523   : > { %3674 = vmatpush.bf16.msrb.mxu1 %v4889_v19  ;;  %v4893_v31 = vor.u32 %v5424_v40, %v4890_v47  ;;  %v5152_v57 = vld [vmem:[%s6023_s22 + $0x290] sm:$0xf]  ;;  %v5416_v7 = vld [vmem:[%s6023_s22 + $0x4c] sm:$0xf]  ;;  %v4897_v4 = vor.u32 %v5429_v56, %v4896_v60  ;;  %v5466_v59 = vld [vmem:[%s6023_s22 + $0x1dc] sm:$0xf] }
 0x524   : > { %5232 = vmatmul.msk.bf16.vlgmr.msrb.gmra.mxu3 %vm3584_vm10, %v7841_v44  ;;  %3699 = vmatpush.bf16.msrb.mxu0 %v4989_v15  ;;  %v5493_v12 = vld [vmem:[%s6023_s22 + $0x2ac] sm:$0xf0]  ;;  %v4858_v28 = vld [vmem:[%s6023_s22 + $0x68] sm:$0xf0]  ;;  %v5066_v15 = vld [vmem:[%s6023_s22 + $0x1f8] sm:$0xf0] }
 0x525   : > { %3725 = vmatpush.bf16.msra.mxu3 %v5057_v27  ;;  %v5441_v27 = vld [vmem:[%s6023_s22 + $0x114] sm:$0xf]  ;;  %v4864_v30 = vld [vmem:[%s6023_s22 + $0x50] sm:$0xf]  ;;  %v5153_v21 = vor.u32 %v5493_v12, %v5152_v57  ;;  %v4861_v19 = vor.u32 %v5416_v7, %v4858_v28  ;;  %v5408_v51 = vld [vmem:[%s6023_s22 + $0xc] sm:$0xf]  ;;  %v5069_v43 = vor.u32 %v5466_v59, %v5066_v15 }
 0x526   : > { %3717 = vmatpush.bf16.msrb.mxu2 %v5117_v20  ;;  %v5421_v38 = vld [vmem:[%s6023_s22 + $0x6c] sm:$0xf0]  ;;  %v4965_v49 = vor.u32 %v5441_v27, %v4962_v48  ;;  %v4826_v55 = vld [vmem:[%s6023_s22 + $0x28] sm:$0xf0]  ;;  %v5505_v20 = vld [vmem:[%s6023_s22 + $0x314] sm:$0xf] }
 0x527   : > { %3675 = vmatpush.bf16.msrb.mxu1 %v4857_v50  ;;  %v5120_v14 = vld [vmem:[%s6023_s22 + $0x250] sm:$0xf]  ;;  %v4865_v54 = vor.u32 %v5421_v38, %v4864_v30  ;;  %v4829_v10 = vor.u32 %v5408_v51, %v4826_v55  ;;  %v5221_v58 = vor.u32 %v5505_v20, %v5218_v33  ;;  %v5425_v5 = vld [vmem:[%s6023_s22 + $0x94] sm:$0xf]  ;;  %v5064_v2 = vld [vmem:[%s6023_s22 + $0x1d8] sm:$0xf] }
 0x528   : > { %3700 = vmatpush.bf16.msrb.mxu0 %v4957_v36  ;;  %v5485_v8 = vld [vmem:[%s6023_s22 + $0x26c] sm:$0xf0]  ;;  %v5470_v24 = vld [vmem:[%s6023_s22 + $0x1f4] sm:$0xf0]  ;;  %v5034_v36 = vld [vmem:[%s6023_s22 + $0x1b8] sm:$0xf0] }
 0x529   : > { %3726 = vmatpush.bf16.msra.mxu3 %v5025_v18  ;;  %v5433_v18 = vld [vmem:[%s6023_s22 + $0xd4] sm:$0xf]  ;;  %v5121_v46 = vor.u32 %v5485_v8, %v5120_v14  ;;  %v4832_v39 = vld [vmem:[%s6023_s22 + $0x10] sm:$0xf]  ;;  %v3605_v9 = vsel %vm3588_vm7, %v5221_v58, 0 }
 0x52a   : > { %3718 = vmatpush.bf16.msrb.mxu2 %v5085_v63  ;;  %v5413_v29 = vld [vmem:[%s6023_s22 + $0x2c] sm:$0xf0]  ;;  %v4933_v17 = vor.u32 %v5433_v18, %v4930_v42  ;;  %v4898_v63 = vld [vmem:[%s6023_s22 + $0xb0] sm:$0xf0]  ;;  %v5032_v35 = vld [vmem:[%s6023_s22 + $0x198] sm:$0xf] }
 0x52b   : > { %3676 = vmatpush.bf16.msrb.mxu1 %v4825_v13  ;;  %v5088_v50 = vld [vmem:[%s6023_s22 + $0x210] sm:$0xf]  ;;  %v4833_v25 = vor.u32 %v5413_v29, %v4832_v39  ;;  %v4901_v41 = vor.u32 %v5425_v5, %v4898_v63  ;;  %v5497_v3 = vld [vmem:[%s6023_s22 + $0x2d4] sm:$0xf]  ;;  %v5506_v1 = vld [vmem:[%s6023_s22 + $0x31c] sm:$0xf] }
 0x52c   : > { %3701 = vmatpush.bf16.msrb.mxu0 %v4925_v32  ;;  %v5186_v13 = vld [vmem:[%s6023_s22 + $0x2f0] sm:$0xf0]  ;;  %v5226_v61 = vld [vmem:[%s6023_s22 + $0x338] sm:$0x30]  ;;  %v5000_v57 = vld [vmem:[%s6023_s22 + $0x158] sm:$0xf] }
 0x52d   : > { %3727 = vmatpush.bf16.msra.mxu3 %v4993_v62  ;;  %5233 = vmatmul.msk.bf16.vlgmr.msrb.gmra.mxu2 %vm3584_vm10, %v7841_v44  ;;  %v5477_v62 = vld [vmem:[%s6023_s22 + $0x22c] sm:$0xf0]  ;;  %v4866_v23 = vld [vmem:[%s6023_s22 + $0x70] sm:$0xf0]  ;;  %v5189_v16 = vor.u32 %v5497_v3, %v5186_v13  ;;  %v5450_v26 = vld [vmem:[%s6023_s22 + $0x15c] sm:$0xf] }
 0x52e   : > { %3753 = vmatpush.bf16.msra.mxu2 %v5061_v0  ;;  %3677 = vmatmul.bf16.vlgmr.msrb.gmra.mxu1 %v7868_v45  ;;  %v5458_v0 = vld [vmem:[%s6023_s22 + $0x19c] sm:$0xf]  ;;  %v5089_v11 = vor.u32 %v5477_v62, %v5088_v50  ;;  %v5409_v56 = vld [vmem:[%s6023_s22 + $0x14] sm:$0xf]  ;;  %v5454_v12 = vld [vmem:[%s6023_s22 + $0x174] sm:$0xf0] }
 0x52f   : > { %3742 = vmatpush.bf16.msra.mxu1 %v3602_v52  ;;  %v5417_v52 = vld [vmem:[%s6023_s22 + $0x54] sm:$0xf]  ;;  %v5037_v32 = vor.u32 %v5458_v0, %v5034_v36  ;;  %v5002_v40 = vld [vmem:[%s6023_s22 + $0x178] sm:$0xf0]  ;;  %v4968_v38 = vld [vmem:[%s6023_s22 + $0x118] sm:$0xf]  ;;  %v5001_v14 = vor.u32 %v5454_v12, %v5000_v57 }
 0x530   : > { %3702 = vmatpush.bf16.msrb.mxu0 %v4893_v31  ;;  %v4869_v47 = vor.u32 %v5417_v52, %v4866_v23  ;;  %v5229_v31 = vor.u32 %v5506_v1, %v5226_v61  ;;  %v5005_v27 = vor.u32 %v5450_v26, %v5002_v40  ;;  %v5442_v7 = vld [vmem:[%s6023_s22 + $0x11c] sm:$0xf]  ;;  %v5481_v30 = vld [vmem:[%s6023_s22 + $0x254] sm:$0xf]  ;;  %v5224_v51 = vld [vmem:[%s6023_s22 + $0x318] sm:$0xf] }
 0x531   : > { %3728 = vmatpush.bf16.msra.mxu3 %v4961_v34  ;;  %v5065_v34 = vor.u32 %v5470_v24, %v5064_v2  ;;  %v4970_v28 = vld [vmem:[%s6023_s22 + $0x138] sm:$0xf0]  ;;  %v5510_v55 = vld [vmem:[%s6023_s22 + $0x334] sm:$0x30]  ;;  %v5473_v59 = vld [vmem:[%s6023_s22 + $0x214] sm:$0xf] }
 0x532   : > { %3754 = vmatpush.bf16.msra.mxu2 %v5029_v22  ;;  %v5462_v22 = vld [vmem:[%s6023_s22 + $0x1b4] sm:$0xf0]  ;;  %v3611_v8 = vsel %vm3588_vm7, %v5229_v31, 0  ;;  %v4973_v18 = vor.u32 %v5442_v7, %v4970_v28  ;;  %v5194_v42 = vld [vmem:[%s6023_s22 + $0x2f8] sm:$0xf0]  ;;  %v5225_v29 = vor.u32 %v5510_v55, %v5224_v51 }
 0x533   : > { %3743 = vmatpush.bf16.msra.mxu1 %v5185_v37  ;;  %v5154_v37 = vld [vmem:[%s6023_s22 + $0x2b0] sm:$0xf0]  ;;  %v5033_v60 = vor.u32 %v5462_v22, %v5032_v35  ;;  %v5434_v33 = vld [vmem:[%s6023_s22 + $0xdc] sm:$0xf]  ;;  %v5502_v36 = vld [vmem:[%s6023_s22 + $0x2f4] sm:$0xf0] }
 0x534   : > { %3703 = vmatpush.bf16.msrb.mxu0 %v4861_v19  ;;  %v5498_v19 = vld [vmem:[%s6023_s22 + $0x2dc] sm:$0xf]  ;;  %v5090_v15 = vld [vmem:[%s6023_s22 + $0x230] sm:$0xf0]  ;;  %v3608_v2 = vsel %vm3588_vm7, %v5225_v29, 0 }
 0x535   : > { %3729 = vmatpush.bf16.msra.mxu3 %v4929_v53  ;;  %v5489_v53 = vld [vmem:[%s6023_s22 + $0x294] sm:$0xf]  ;;  %v5197_v39 = vor.u32 %v5498_v19, %v5194_v42  ;;  %v5490_v50 = vld [vmem:[%s6023_s22 + $0x29c] sm:$0xf]  ;;  %v5093_v5 = vor.u32 %v5473_v59, %v5090_v15  ;;  %v5494_v1 = vld [vmem:[%s6023_s22 + $0x2b4] sm:$0xf0] }
 0x536   : > { %3755 = vmatpush.bf16.msra.mxu2 %v4997_v6  ;;  %v4834_v6 = vld [vmem:[%s6023_s22 + $0x30] sm:$0xf0]  ;;  %v5157_v48 = vor.u32 %v5489_v53, %v5154_v37  ;;  %v5162_v62 = vld [vmem:[%s6023_s22 + $0x2b8] sm:$0xf0]  ;;  %v4872_v61 = vld [vmem:[%s6023_s22 + $0x58] sm:$0xf] }
 0x537   : > { %3744 = vmatpush.bf16.msra.mxu1 %v5153_v21  ;;  %v5122_v21 = vld [vmem:[%s6023_s22 + $0x270] sm:$0xf0]  ;;  %v5426_v63 = vld [vmem:[%s6023_s22 + $0x9c] sm:$0xf]  ;;  %v5165_v0 = vor.u32 %v5490_v50, %v5162_v62  ;;  %v5128_v31 = vld [vmem:[%s6023_s22 + $0x258] sm:$0xf] }
 0x538   : > { %3704 = vmatpush.bf16.msrb.mxu0 %v4829_v10  ;;  %v5125_v20 = vor.u32 %v5481_v30, %v5122_v21  ;;  %v5438_v10 = vld [vmem:[%s6023_s22 + $0xf4] sm:$0xf0]  ;;  %v5482_v3 = vld [vmem:[%s6023_s22 + $0x25c] sm:$0xf]  ;;  %v2944_v59 = vld [vmem:[%s8148_s9 + $0x40] sm:$0xff] }
 0x539   : > { %3730 = vmatpush.bf16.msra.mxu3 %v4897_v4  ;;  %v4837_v4 = vor.u32 %v5409_v56, %v4834_v6  ;;  %v5130_v13 = vld [vmem:[%s6023_s22 + $0x278] sm:$0xf0]  ;;  %v5486_v57 = vld [vmem:[%s6023_s22 + $0x274] sm:$0xf0]  ;;  %v2938_v50 = vld [vmem:[%s8148_s9 + $0x10] sm:$0xff] }
 0x53a   : > { %3756 = vmatpush.bf16.msra.mxu2 %v4965_v49  ;;  %v5446_v49 = vld [vmem:[%s6023_s22 + $0x134] sm:$0xf0]  ;;  %v4874_v52 = vld [vmem:[%s6023_s22 + $0x78] sm:$0xf0]  ;;  %v5133_v22 = vor.u32 %v5482_v3, %v5130_v13  ;;  %v5129_v7 = vor.u32 %v5486_v57, %v5128_v31 }
 0x53b   : > { %3745 = vmatpush.bf16.msra.mxu1 %v5121_v46  ;;  %3705 = vmatmul.bf16.vlgmr.msrb.gmra.mxu0 %v7868_v45  ;;  %v4969_v46 = vor.u32 %v5446_v49, %v4968_v38  ;;  %v5474_v40 = vld [vmem:[%s6023_s22 + $0x21c] sm:$0xf]  ;;  %v4840_v12 = vld [vmem:[%s6023_s22 + $0x18] sm:$0xf]  ;;  %v2937_v49 = vld [vmem:[%s8148_s9 + $0x8] sm:$0xff] }
 0x53c   : > { %3809 = vmatpush.bf16.msra.mxu0 %v5069_v43  ;;  %v4906_v43 = vld [vmem:[%s6023_s22 + $0xb8] sm:$0xf0]  ;;  %v5478_v30 = vld [vmem:[%s6023_s22 + $0x234] sm:$0xf0] }
 0x53d   : > { %3731 = vmatpush.bf16.msra.mxu3 %v4865_v54  ;;  %v4938_v54 = vld [vmem:[%s6023_s22 + $0xf8] sm:$0xf0] }
 0x53e   : > { %3757 = vmatpush.bf16.msra.mxu2 %v4933_v17  ;;  %v4936_v17 = vld [vmem:[%s6023_s22 + $0xd8] sm:$0xf]  ;;  %v4941_v58 = vor.u32 %v5434_v33, %v4938_v54  ;;  %v5410_v53 = vld [vmem:[%s6023_s22 + $0x1c] sm:$0xf] }
 0x53f   : > { %3746 = vmatpush.bf16.msra.mxu1 %v5089_v11  ;;  %v4937_v24 = vor.u32 %v5438_v10, %v4936_v17  ;;  %v5430_v11 = vld [vmem:[%s6023_s22 + $0xb4] sm:$0xf0]  ;;  %v4842_v37 = vld [vmem:[%s6023_s22 + $0x38] sm:$0xf0] }
 0x540   : > { %3810 = vmatpush.bf16.msra.mxu0 %v5037_v32  ;;  %v5160_v32 = vld [vmem:[%s6023_s22 + $0x298] sm:$0xf] }
 0x541   : > { %3732 = vmatpush.bf16.msra.mxu3 %v4833_v25  ;;  %v5192_v25 = vld [vmem:[%s6023_s22 + $0x2d8] sm:$0xf] }
 0x542   : > { %3758 = vmatpush.bf16.msra.mxu2 %v4901_v41  ;;  %5234 = vmatmul.msk.bf16.vlgmr.msra.gmra.mxu1 %vm3584_vm10, %v7841_v44  ;;  %v4909_v41 = vor.u32 %v5426_v63, %v4906_v43  ;;  %v5193_v23 = vor.u32 %v5502_v36, %v5192_v25  ;;  %v2946_v25 = vld [vmem:[%s8148_s9 + $0x50] sm:$0xff] }
 0x543   : > { %3781 = vmatpush.bf16.msrb.mxu1 %v5065_v34  ;;  %v5418_v34 = vld [vmem:[%s6023_s22 + $0x5c] sm:$0xf] }
 0x544   : > { %3733 = vmatmul.bf16.vlgmr.msra.gmra.mxu3 %v7868_v45  ;;  %3811 = vmatpush.bf16.msra.mxu0 %v5005_v27  ;;  %v4877_v26 = vor.u32 %v5418_v34, %v4874_v52  ;;  %v5414_v27 = vld [vmem:[%s6023_s22 + $0x34] sm:$0xf0]  ;;  %v2940_v52 = vld [vmem:[%s8148_s9 + $0x20] sm:$0xff] }
 0x545   : > { %3770 = vmatpush.bf16.msrb.mxu3 %v3605_v9  ;;  %v4904_v9 = vld [vmem:[%s6023_s22 + $0x98] sm:$0xf]  ;;  %v4841_v28 = vor.u32 %v5414_v27, %v4840_v12  ;;  %v2949_v12 = vld [vmem:[%s8148_s9 + $0x68] sm:$0xff] }
 0x546   : > { %3759 = vmatpush.bf16.msra.mxu2 %v4869_v47  ;;  %v4905_v35 = vor.u32 %v5430_v11, %v4904_v9  ;;  %v5098_v47 = vld [vmem:[%s6023_s22 + $0x238] sm:$0xf0] }
 0x547   : > { %3782 = vmatpush.bf16.msrb.mxu1 %v5033_v60  ;;  %v5161_v60 = vor.u32 %v5494_v1, %v5160_v32  ;;  %v5101_v6 = vor.u32 %v5474_v40, %v5098_v47  ;;  %v2939_v9 = vld [vmem:[%s8148_s9 + $0x18] sm:$0xff]  ;;  %v2948_v40 = vld [vmem:[%s8148_s9 + $0x60] sm:$0xff] }
 0x548   : > { %3812 = vmatpush.bf16.msra.mxu0 %v4973_v18  ;;  %v2936_v18 = vld [vmem:[%s8148_s9] sm:$0xff] }
 0x549   : > { %3771 = vmatpush.bf16.msrb.mxu3 %v5189_v16  ;;  %v5422_v16 = vld [vmem:[%s6023_s22 + $0x74] sm:$0xf0] }
 0x54a   : > { %3760 = vmatpush.bf16.msra.mxu2 %v4837_v4  ;;  %v4873_v56 = vor.u32 %v5422_v16, %v4872_v61  ;;  %v5096_v4 = vld [vmem:[%s6023_s22 + $0x218] sm:$0xf] }
 0x54b   : > { %3783 = vmatpush.bf16.msrb.mxu1 %v5001_v14  ;;  %v5097_v21 = vor.u32 %v5478_v30, %v5096_v4 }
 0x54c   : > { %3813 = vmatpush.bf16.msra.mxu0 %v4941_v58 }
 0x54d   : > { %3772 = vmatpush.bf16.msrb.mxu3 %v5157_v48  ;;  %3761 = vmatmul.bf16.vlgmr.msra.gmra.mxu2 %v7868_v45  ;;  %v4845_v48 = vor.u32 %v5410_v53, %v4842_v37 }
 0x54e   : > { %3826 = vmatpush.bf16.msrb.mxu2 %v3611_v8 }
 0x54f   : > { %3784 = vmatpush.bf16.msrb.mxu1 %v4969_v46 }
 0x550   : > { %3814 = vmatpush.bf16.msra.mxu0 %v4909_v41 }
 0x551   : > { %3773 = vmatpush.bf16.msrb.mxu3 %v5125_v20 }
 0x552   : > { %3827 = vmatpush.bf16.msrb.mxu2 %v5197_v39 }
 0x553   : > { %3785 = vmatpush.bf16.msrb.mxu1 %v4937_v24 }
 0x554   : > { %3815 = vmatpush.bf16.msra.mxu0 %v4877_v26 }
 0x555   : > { %3774 = vmatpush.bf16.msrb.mxu3 %v5093_v5 }
 0x556   : > { %3828 = vmatpush.bf16.msrb.mxu2 %v5165_v0 }
 0x557   : > { %3786 = vmatpush.bf16.msrb.mxu1 %v4905_v35  ;;  %v2947_v35 = vld [vmem:[%s8148_s9 + $0x58] sm:$0xff] }
 0x558   : > { %5235 = vmatmul.msk.bf16.vlgmr.msrb.gmra.mxu3 %vm3584_vm10, %v7841_v44  ;;  %3816 = vmatpush.bf16.msra.mxu0 %v4845_v48 }
 0x559   : > { %3798 = vmatpush.bf16.msra.mxu3 %v3608_v2 }
 0x55a   : > { %3829 = vmatpush.bf16.msrb.mxu2 %v5133_v22 }
 0x55b   : > { %3787 = vmatpush.bf16.msrb.mxu1 %v4873_v56  ;;  %3817 = vmatmul.bf16.vlgmr.msra.gmra.mxu0 %v7868_v45 }
 0x55d   : > { %3799 = vmatpush.bf16.msra.mxu3 %v5193_v23 }
 0x55e   : > { %3830 = vmatpush.bf16.msrb.mxu2 %v5101_v6 }
 0x55f   : > { %3788 = vmatpush.bf16.msrb.mxu1 %v4841_v28  ;;  %v2943_v28 = vld [vmem:[%s8148_s9 + $0x38] sm:$0xff] }
 0x561   : > { %3800 = vmatpush.bf16.msra.mxu3 %v5161_v60  ;;  %5237 = vmatmul.msk.bf16.vlgmr.msrb.gmra.mxu2 %vm3584_vm10, %v7841_v44  ;;  %v2941_v60 = vld [vmem:[%s8148_s9 + $0x28] sm:$0xff] }
 0x562   : > { %3789 = vmatmul.bf16.vlgmr.msrb.gmra.mxu1 %v7868_v45 }
 0x565   : > { %3801 = vmatpush.bf16.msra.mxu3 %v5129_v7 }
 0x569   : > { %3802 = vmatpush.bf16.msra.mxu3 %v5097_v21 }
 0x56c   : > { %5236 = vmatmul.msk.bf16.vlgmr.msra.gmra.mxu3 %vm3584_vm10, %v7841_v44  ;;  %v2945_v44 = vld [vmem:[%s8148_s9 + $0x48] sm:$0xff] }
 0x58e   : > { %v3636_v14 = vpop.f32.mrf.mxu1 }
 0x595   : > { %v3664_v38 = vpop.f32.mrf.mxu3 }
 0x596   : > { %v3638_v33 = vpop.f32.mrf.mxu1 }
 0x598   : > { %v3622_v42 = vpop.f32.mrf.mxu0 }
 0x599   : > { %v3637_v55 = vadd.f32 %v3636_v14, %v3622_v42  ;;  %v2951_v42 = vld [vmem:[%s8148_s9 + $0x78] sm:$0xff] }
 0x59b   : > { %v3837_v45 = vadd.f32 %v3637_v55, %v2936_v18 }
 0x59c   : > { %v3650_v19 = vpop.f32.mrf.mxu2 }
 0x59d   : > { %v3666_v8 = vpop.f32.mrf.mxu3  ;;  %v3665_v51 = vadd.f32 %v3664_v38, %v3650_v19  ;;  %3853 = vst [vmem:[%s8148_s9] sm:$0xff] %v3837_v45 }
 0x59f   : > { %v3838_v20 = vadd.f32 %v3665_v51, %v2937_v49 }
 0x5a0   : > { %v3624_v15 = vpop.f32.mrf.mxu0 }
 0x5a1   : > { %3854 = vst [vmem:[%s8148_s9 + $0x8] sm:$0xff] %v3838_v20  ;;  %v3639_v39 = vadd.f32 %v3638_v33, %v3624_v15 }
 0x5a3   : > { %v3845_v10 = vadd.f32 %v3639_v39, %v2944_v59 }
 0x5a4   : > { %v3652_v54 = vpop.f32.mrf.mxu2 }
 0x5a5   : > { %v3667_v46 = vadd.f32 %v3666_v8, %v3652_v54  ;;  %3861 = vst [vmem:[%s8148_s9 + $0x40] sm:$0xff] %v3845_v10  ;;  %v2942_v8 = vld [vmem:[%s8148_s9 + $0x30] sm:$0xff] }
 0x5a7   : > { %v3692_v29 = vpop.f32.mrf.mxu3  ;;  %v3846_v17 = vadd.f32 %v3667_v46, %v2945_v44  ;;  %v2950_v44 = vld [vmem:[%s8148_s9 + $0x70] sm:$0xff] }
 0x5a9   : > { %3862 = vst [vmem:[%s8148_s9 + $0x48] sm:$0xff] %v3846_v17 }
 0x5ab   : > { %v3678_v58 = vpop.f32.mrf.mxu1 }
 0x5ac   : > { %v3693_v62 = vadd.f32 %v3692_v29, %v3678_v58 }
 0x5ae   : > { %v3839_v5 = vadd.f32 %v3693_v62, %v2938_v50 }
 0x5af   : > { %v3694_v63 = vpop.f32.mrf.mxu3 }
 0x5b0   : > { %3855 = vst [vmem:[%s8148_s9 + $0x10] sm:$0xff] %v3839_v5  ;;  %v3720_v24 = vpop.f32.mrf.mxu2 }
 0x5b3   : > { %v3680_v43 = vpop.f32.mrf.mxu1 }
 0x5b4   : > { %v3695_v2 = vadd.f32 %v3694_v63, %v3680_v43 }
 0x5b6   : > { %v3847_v0 = vadd.f32 %v3695_v2, %v2946_v25 }
 0x5b8   : > { %3863 = vst [vmem:[%s8148_s9 + $0x50] sm:$0xff] %v3847_v0  ;;  %v3706_v36 = vpop.f32.mrf.mxu0  ;;  %v3722_v13 = vpop.f32.mrf.mxu2 }
 0x5b9   : > { %v3721_v11 = vadd.f32 %v3720_v24, %v3706_v36 }
 0x5bb   : > { %v3840_v41 = vadd.f32 %v3721_v11, %v2939_v9 }
 0x5bd   : > { %3856 = vst [vmem:[%s8148_s9 + $0x18] sm:$0xff] %v3840_v41 }
 0x5bf   : > { %v3748_v3 = vpop.f32.mrf.mxu1 }
 0x5c0   : > { %v3708_v23 = vpop.f32.mrf.mxu0 }
 0x5c1   : > { %v3723_v32 = vadd.f32 %v3722_v13, %v3708_v23 }
 0x5c3   : > { %v3848_v61 = vadd.f32 %v3723_v32, %v2947_v35 }
 0x5c5   : > { %3864 = vst [vmem:[%s8148_s9 + $0x58] sm:$0xff] %v3848_v61 }
 0x5c7   : > { %v3734_v34 = vpop.f32.mrf.mxu3  ;;  %v3750_v16 = vpop.f32.mrf.mxu1 }
 0x5c8   : > { %v3749_v22 = vadd.f32 %v3748_v3, %v3734_v34 }
 0x5ca   : > { %v3841_v1 = vadd.f32 %v3749_v22, %v2940_v52 }
 0x5cc   : > { %3857 = vst [vmem:[%s8148_s9 + $0x20] sm:$0xff] %v3841_v1 }
 0x5cf   : > { %v3736_v26 = vpop.f32.mrf.mxu3 }
 0x5d0   : > { %v3751_v47 = vadd.f32 %v3750_v16, %v3736_v26  ;;  %v3762_v53 = vpop.f32.mrf.mxu2 }
 0x5d2   : > { %v3849_v37 = vadd.f32 %v3751_v47, %v2948_v40 }
 0x5d4   : > { %3865 = vst [vmem:[%s8148_s9 + $0x60] sm:$0xff] %v3849_v37 }
 0x5d8   : > { %v3764_v31 = vpop.f32.mrf.mxu2  ;;  %v3818_v48 = vpop.f32.mrf.mxu0 }
 0x5db   : > { %v3776_v56 = vpop.f32.mrf.mxu3 }
 0x5dc   : > { %v3777_v6 = vadd.f32 %v3776_v56, %v3762_v53 }
 0x5de   : > { %v3842_v57 = vadd.f32 %v3777_v6, %v2941_v60 }
 0x5df   : > { %v3790_v14 = vpop.f32.mrf.mxu1 }
 0x5e0   : > { %3858 = vst [vmem:[%s8148_s9 + $0x28] sm:$0xff] %v3842_v57  ;;  %v3820_v18 = vpop.f32.mrf.mxu0 }
 0x5e3   : > { %v3778_v27 = vpop.f32.mrf.mxu3 }
 0x5e4   : > { %v3779_v7 = vadd.f32 %v3778_v27, %v3764_v31  ;;  %v3832_v4 = vpop.f32.mrf.mxu2 }
 0x5e5   : > { %v3833_v21 = vadd.f32 %v3832_v4, %v3818_v48 }
 0x5e6   : > { %v3850_v30 = vadd.f32 %v3779_v7, %v2949_v12 }
 0x5e7   : > { %v3844_v38 = vadd.f32 %v3833_v21, %v2943_v28  ;;  %v3792_v33 = vpop.f32.mrf.mxu1 }
 0x5e8   : > { %3866 = vst [vmem:[%s8148_s9 + $0x68] sm:$0xff] %v3850_v30 }
 0x5e9   : > { %3860 = vst [vmem:[%s8148_s9 + $0x38] sm:$0xff] %v3844_v38 }
 0x5ec   : > { %v3834_v51 = vpop.f32.mrf.mxu2 }
 0x5ed   : > { %v3835_v55 = vadd.f32 %v3834_v51, %v3820_v18 }
 0x5ef   : > { %v3804_v49 = vpop.f32.mrf.mxu3  ;;  %v3852_v45 = vadd.f32 %v3835_v55, %v2951_v42 }
 0x5f0   : > { %v3805_v19 = vadd.f32 %v3804_v49, %v3790_v14 }
 0x5f1   : > { %3868 = vst [vmem:[%s8148_s9 + $0x78] sm:$0xff] %v3852_v45 }
 0x5f2   : > { %v3843_v20 = vadd.f32 %v3805_v19, %v2942_v8 }
 0x5f4   : > { %3859 = vst [vmem:[%s8148_s9 + $0x30] sm:$0xff] %v3843_v20 }
 0x5f7   : > { %v3806_v54 = vpop.f32.mrf.mxu3 }
 0x5f8   : > { %v3807_v59 = vadd.f32 %v3806_v54, %v3792_v33 }
 0x5fa   : > { %v3851_v15 = vadd.f32 %v3807_v59, %v2950_v44 }
 0x5fc   : > { %3867 = vst [vmem:[%s8148_s9 + $0x70] sm:$0xff] %v3851_v15 }
 0x5fd PF: > { %p19_p1 = scmp.ge.s32.totalorder %s5973_s27, 13   ;;  %s8159_s30 = smov %s5835_s10 }
 0x5fe   : > { %s8160_s10 = smov %s5839_s11  ;;  %s8161_s11 = smov %s5985_s15 }
 0x5ff   : > { %s8162_s12 = smov %s5973_s27  ;;  %21 = sbr.rel (!%p19_p1) target bundleno = 7 (0x7), region = 119 }
 0x604   :  { %3880 = vsyncpa [#allocation4], 1 }
 0x605   :  { %3882 = vsyncpa [#allocation4 + $0x1], 1 }
 0x606   :  { %3883 = vsyncpa [#allocation6], 1 }
 0x607   :  { %3884 = vsyncpa [#allocation9], 1 }

</bundles_post_ra>
